<compile_context>
chip_gen: v7x
topology: tpu7x:2x2x1
jax: 0.10.0
libtpu: 0.0.40
codegen_flags: <defaults>
</compile_context>

<pallas_src>
import jax
import jax.numpy as jnp
import numpy as np
from jax.experimental import pallas as pl
from jax.experimental.pallas import tpu as pltpu

EPS = 1e-5


def conv1x1_bn_kernel(x_ref, w_ref, gb_ref, o_ref):
    # x_ref:  (Cin, M)          bf16   (resident across the Cout grid)
    # w_ref:  (tile_Cout, Cin)  bf16
    # gb_ref: (tile_Cout, 2)    f32    [:, 0] = gamma, [:, 1] = beta
    # o_ref:  (tile_Cout, M)    f32
    x = x_ref[...]
    w = w_ref[...]

    # 1x1 conv == matmul on the MXU; result is already NCHW-ordered (Cout, M).
    # bf16 inputs, f32 accumulation.
    y = jnp.dot(w, x, preferred_element_type=jnp.float32)         # (tile, M) f32

    # Batch mean over (N, H, W) == lane reduction over the M columns (XLU slot;
    # per perf review, keep it here rather than folding into the MXU).
    mean = jnp.mean(y, axis=1, keepdims=True)                      # (tile, 1)

    # Biased variance (what PyTorch uses for normalization), two-pass form to
    # avoid E[y^2] - E[y]^2 cancellation.
    diff = y - mean
    var = jnp.mean(diff * diff, axis=1, keepdims=True)             # (tile, 1)

    # Fold normalize + affine into one per-channel scale/shift, then a single
    # FMA pass over y.
    inv = jax.lax.rsqrt(var + EPS)
    gb = gb_ref[...]
    gamma = gb[:, 0:1]                                             # (tile, 1)
    beta = gb[:, 1:2]                                              # (tile, 1)
    a = gamma * inv
    b = beta - mean * a
    o_ref[...] = (y * a + b).astype(o_ref.dtype)


def conv1x1_bn(x_nchw, w_oihw, gamma, beta, *, tile_cout=384):
    N, Cin, H, W = x_nchw.shape
    Cout = w_oihw.shape[0]
    M = N * H * W

    if N == 1:
        # Pure reshape: NCHW flatten for N=1 is already (Cin, M). No copy.
        x_cm = x_nchw.reshape(Cin, M)
    else:
        # TODO(synk): for N>1 fold this transpose into the kernel (grid over N)
        # instead of a wrapper-side HBM pass; not needed for the N=1 spec shape.
        x_cm = jnp.moveaxis(x_nchw, 1, 0).reshape(Cin, M)

    # bf16 MXU inputs (f32 accumulation inside the kernel): fewer MXU passes on
    # v5e, half the input DMA on all generations.
    x_cm = x_cm.astype(jnp.bfloat16)
    w2d = w_oihw.reshape(Cout, Cin).astype(jnp.bfloat16)

    # Pack gamma/beta into one (Cout, 2) array -> one VMEM tile, one DMA.
    gb = jnp.stack(
        [gamma.astype(jnp.float32), beta.astype(jnp.float32)], axis=1
    )  # (Cout, 2)

    # 1-D grid over Cout: 2 blocks of 384 for the spec shape (per-channel BN
    # makes the blocks independent; >3 blocks would just add per-step overhead).
    if Cout % tile_cout != 0:
        tile_cout = Cout
    num_blocks = Cout // tile_cout

    cost = pl.CostEstimate(
        flops=2 * Cout * Cin * M,
        transcendentals=0,
        bytes_accessed=(x_cm.size * 2 + w2d.size * 2 + gb.size * 4
                        + Cout * M * 4),
    )

    out_cm = pl.pallas_call(
        conv1x1_bn_kernel,
        out_shape=jax.ShapeDtypeStruct((Cout, M), jnp.float32),
        grid=(num_blocks,),
        in_specs=[
            pl.BlockSpec((Cin, M), lambda i: (0, 0)),          # x: resident
            pl.BlockSpec((tile_cout, Cin), lambda i: (i, 0)),  # w: per block
            pl.BlockSpec((tile_cout, 2), lambda i: (i, 0)),    # gamma/beta
        ],
        out_specs=pl.BlockSpec((tile_cout, M), lambda i: (i, 0)),
        compiler_params=pltpu.CompilerParams(
            dimension_semantics=("parallel",),       # v7x: split across 2 TCs
            vmem_limit_bytes=16 << 20,               # fits v7x's 64 MiB easily
        ),
        cost_estimate=cost,
    )(x_cm, w2d, gb)

    if N == 1:
        # (Cout, M) is exactly flat NCHW for N=1 -> free reshape back.
        return out_cm.reshape(1, Cout, H, W)
    return jnp.moveaxis(out_cm.reshape(Cout, N, H, W), 0, 1)


if __name__ == "__main__":
    # Shapes implied by the module: input (1, 128, 14, 14), conv 128 -> 768.
    N, Cin, H, W = 1, 128, 14, 14
    Cout = 768
    M = N * H * W

    key = jax.random.PRNGKey(0)
    kx, kw, kg, kb = jax.random.split(key, 4)

    x = jax.random.normal(kx, (N, Cin, H, W), dtype=jnp.float32)
    # Conv2d(128, 768, 1x1, bias=False) weight, deterministic init.
    w = jax.random.normal(kw, (Cout, Cin, 1, 1), dtype=jnp.float32) * 0.05
    # BatchNorm2d(768) affine params (perturbed from 1/0 so they matter).
    gamma = 1.0 + 0.1 * jax.random.normal(kg, (Cout,), dtype=jnp.float32)
    beta = 0.1 * jax.random.normal(kb, (Cout,), dtype=jnp.float32)

    out = jax.block_until_ready(conv1x1_bn(x, w, gamma, beta))
    assert out.shape == (N, Cout, H, W)

    x2d = x.reshape(Cin, M)

    # Reference 1: same precision policy as the kernel (bf16 matmul inputs,
    # f32 accumulation + f32 BN) -- tight tolerance.
    y = jnp.dot(w.reshape(Cout, Cin).astype(jnp.bfloat16),
                x2d.astype(jnp.bfloat16),
                preferred_element_type=jnp.float32)
    mean = y.mean(axis=1, keepdims=True)
    var = ((y - mean) ** 2).mean(axis=1, keepdims=True)
    ref_bf16 = ((y - mean) * jax.lax.rsqrt(var + EPS) * gamma[:, None]
                + beta[:, None]).reshape(N, Cout, H, W)
    np.testing.assert_allclose(np.asarray(out), np.asarray(ref_bf16),
                               rtol=2e-3, atol=2e-3)

    # Reference 2: full f32 PyTorch semantics (1x1 conv, training-mode BN) --
    # looser tolerance accounts for the bf16 MXU inputs; BN normalization
    # absorbs most of the input-precision loss.
    y32 = w.reshape(Cout, Cin) @ x2d
    mean32 = y32.mean(axis=1, keepdims=True)
    var32 = ((y32 - mean32) ** 2).mean(axis=1, keepdims=True)
    ref32 = ((y32 - mean32) / jnp.sqrt(var32 + EPS) * gamma[:, None]
             + beta[:, None]).reshape(N, Cout, H, W)
    np.testing.assert_allclose(np.asarray(out), np.asarray(ref32),
                               rtol=5e-2, atol=5e-2)

    print("KERNEL_OK")
</pallas_src>

<mosaic_0001>
module attributes {stable_mosaic.version = 11 : i64} {
  func.func @conv1x1_bn_kernel(%arg0: i32, %arg1: memref<128x196xbf16, #tpu.memory_space<vmem>>, %arg2: memref<384x128xbf16, #tpu.memory_space<vmem>>, %arg3: memref<384x2xf32, #tpu.memory_space<vmem>>, %arg4: memref<384x196xf32, #tpu.memory_space<vmem>>) attributes {dimension_semantics = [#tpu.dimension_semantics<parallel>], iteration_bounds = array<i64: 2>, scalar_prefetch = 0 : i64, scratch_operands = 0 : i64, tpu.core_type = #tpu.core_type<tc>, window_params = [{pipeline_mode = #tpu.pipeline_mode<synchronous>, transform_indices = @transform_0, window_bounds = array<i64: 128, 196>}, {transform_indices = @transform_1, window_bounds = array<i64: 384, 128>}, {transform_indices = @transform_2, window_bounds = array<i64: 384, 2>}, {transform_indices = @transform_3, window_bounds = array<i64: 384, 196>}]} {
    %c0 = arith.constant 0 : index
    %c0_0 = arith.constant 0 : index
    %0 = vector.load %arg1[%c0, %c0_0] : memref<128x196xbf16, #tpu.memory_space<vmem>>, vector<128x196xbf16>
    %c0_1 = arith.constant 0 : index
    %c0_2 = arith.constant 0 : index
    %1 = vector.load %arg2[%c0_1, %c0_2] : memref<384x128xbf16, #tpu.memory_space<vmem>>, vector<384x128xbf16>
    %cst = arith.constant dense<0.000000e+00> : vector<384x196xf32>
    %2 = tpu.matmul %1, %0, %cst {dimension_numbers = #tpu.dot_dimension_numbers<[1], [0], [0], [1], [0, 0, 1, 1], [], []>} : vector<384x128xbf16>, vector<128x196xbf16>, vector<384x196xf32> -> vector<384x196xf32>
    %cst_3 = arith.constant dense<0.000000e+00> : vector<384xf32>
    %3 = vector.multi_reduction <add>, %2, %cst_3 [1] : vector<384x196xf32> to vector<384xf32>
    %4 = vector.shape_cast %3 : vector<384xf32> to vector<384x1xf32>
    %cst_4 = arith.constant 1.960000e+02 : f32
    %5 = vector.broadcast %cst_4 : f32 to vector<384x1xf32>
    %6 = arith.divf %4, %5 : vector<384x1xf32>
    %7 = vector.broadcast %6 : vector<384x1xf32> to vector<384x196xf32>
    %8 = arith.subf %2, %7 : vector<384x196xf32>
    %9 = arith.mulf %8, %8 : vector<384x196xf32>
    %cst_5 = arith.constant dense<0.000000e+00> : vector<384xf32>
    %10 = vector.multi_reduction <add>, %9, %cst_5 [1] : vector<384x196xf32> to vector<384xf32>
    %11 = vector.shape_cast %10 : vector<384xf32> to vector<384x1xf32>
    %cst_6 = arith.constant 1.960000e+02 : f32
    %12 = vector.broadcast %cst_6 : f32 to vector<384x1xf32>
    %13 = arith.divf %11, %12 : vector<384x1xf32>
    %cst_7 = arith.constant 9.99999974E-6 : f32
    %14 = vector.broadcast %cst_7 : f32 to vector<384x1xf32>
    %15 = arith.addf %13, %14 : vector<384x1xf32>
    %16 = math.rsqrt %15 : vector<384x1xf32>
    %c0_8 = arith.constant 0 : index
    %c0_9 = arith.constant 0 : index
    %17 = vector.load %arg3[%c0_8, %c0_9] : memref<384x2xf32, #tpu.memory_space<vmem>>, vector<384x2xf32>
    %18 = vector.extract_strided_slice %17 {offsets = [0, 0], sizes = [384, 1], strides = [1, 1]} : vector<384x2xf32> to vector<384x1xf32>
    %19 = vector.extract_strided_slice %17 {offsets = [0, 1], sizes = [384, 1], strides = [1, 1]} : vector<384x2xf32> to vector<384x1xf32>
    %20 = arith.mulf %18, %16 : vector<384x1xf32>
    %21 = arith.mulf %6, %20 : vector<384x1xf32>
    %22 = arith.subf %19, %21 : vector<384x1xf32>
    %23 = vector.broadcast %20 : vector<384x1xf32> to vector<384x196xf32>
    %24 = arith.mulf %2, %23 : vector<384x196xf32>
    %25 = vector.broadcast %22 : vector<384x1xf32> to vector<384x196xf32>
    %26 = arith.addf %24, %25 : vector<384x196xf32>
    %c0_10 = arith.constant 0 : index
    %c0_11 = arith.constant 0 : index
    %27 = vector.load %arg4[%c0_10, %c0_11] : memref<384x196xf32, #tpu.memory_space<vmem>>, vector<384x196xf32>
    tpu.vector_store %arg4[%c0_10, %c0_11], %26 {strides = array<i32>} : memref<384x196xf32, #tpu.memory_space<vmem>>, vector<384x196xf32>,
    return
  }
  func.func @transform_0(%arg0: i32) -> (i32, i32) {
    %c0_i32 = arith.constant 0 : i32
    %c0_i32_0 = arith.constant 0 : i32
    %c0_i32_1 = arith.constant 0 : i32
    return %c0_i32, %c0_i32_0 : i32, i32
  }
  func.func @transform_1(%arg0: i32) -> (i32, i32) {
    %c0_i32 = arith.constant 0 : i32
    %c0_i32_0 = arith.constant 0 : i32
    return %arg0, %c0_i32 : i32, i32
  }
  func.func @transform_2(%arg0: i32) -> (i32, i32) {
    %c0_i32 = arith.constant 0 : i32
    %c0_i32_0 = arith.constant 0 : i32
    return %arg0, %c0_i32 : i32, i32
  }
  func.func @transform_3(%arg0: i32) -> (i32, i32) {
    %c0_i32 = arith.constant 0 : i32
    %c0_i32_0 = arith.constant 0 : i32
    return %arg0, %c0_i32 : i32, i32
  }
}

</mosaic_0001>

<bundles_post_ra>
// kernel: tpu_custom_call.1
= control target key start
LH: loop header
LB: loop body
LE: loop exit
PB: predicated region body
PF: predicated region fallthrough
CT: control target
= control target key end

     0   :  { %s3010_s12 = smov 0   ;;  %s4703_s0 = inlined_call_operand.vmem [shape: bf16[128,196], index: 0, kind: input, shape index: {}]   ;;  %s4704_s1 = inlined_call_operand.vmem [shape: bf16[768,128], index: 1, kind: input, shape index: {}]   ;;  %s4705_s2 = inlined_call_operand.vmem [shape: f32[768,2], index: 2, kind: input, shape index: {}]   ;;  %s4706_s3 = inlined_call_operand.vmem [shape: f32[768,196], index: 3, kind: output, shape index: {}]  }
   0x1 LB: > { %s2752_s13 = sadd.s32 4294967295, %s2985_s12   ;;  %p2756_p0 = scmp.ge.s32.totalorder %s2985_s12, 1  ;;  %s2985_s12 = sphi %s3010_s12, %s13_s12  }
   0x2   : > { %p149_p1 = scmp.lt.s32.totalorder %s2985_s12, 3 }
   0x4   : > { %p150_p2 = pnand %p2756_p0, %p149_p1 }
   0x6   : > { %153 = sbr.rel (%p150_p2) target bundleno = 1031 (0x407), region = 32 }
   0xd   : > { %v2835_v0 = vld [vmem:[%s4703_s0 + $0x4] ss:$8 sps:$4 sm:$0xff]   ;;  %s179_s16 = smul.u32 48, %s2752_s13  ;;  %v2837_v1 = vld [vmem:[%s4703_s0] ss:$8 sps:$4 sm:$0xff]   ;;  %v2987_v2 = vmov 0  }
   0xe   : > { %519 = vmatprep.mubr.bf16.mxu0 %v2987_v2  ;;  %639 = vmatprep.mubr.bf16.mxu1 %v2987_v2  ;;  %v2838_v3 = vld [vmem:[%s4703_s0 + $0x14] ss:$8 sps:$4 sm:$0xff]   ;;  %v2840_v4 = vld [vmem:[%s4703_s0 + $0x10] ss:$8 sps:$4 sm:$0xff]   ;;  %v2841_v5 = vld [vmem:[%s4703_s0 + $0x24] ss:$8 sps:$4 sm:$0xff]  }
   0xf   : > { %487 = vmatprep.subr.bf16.mxu0 %v2835_v0  ;;  %2804 = vmatprep.subr.bf16.mxu1 %v2835_v0  ;;  %p180_p3 = scmp.lt.s32.totalorder %s179_s16, 95  ;;  %v2843_v6 = vld [vmem:[%s4703_s0 + $0x20] ss:$8 sps:$4 sm:$0xff]   ;;  %v2844_v7 = vld [vmem:[%s4703_s0 + $0x34] ss:$8 sps:$4 sm:$0xff]   ;;  %vm760_vm0 = vcmask 556032  }
  0x10   : > { %488 = vmatpush1.bf16.msra.mxu0 %v2837_v1  ;;  %2812 = vmatpush1.bf16.msra.mxu1 %v2837_v1  ;;  %v2846_v8 = vld [vmem:[%s4703_s0 + $0x30] ss:$8 sps:$4 sm:$0xff]   ;;  %v2847_v9 = vld [vmem:[%s4703_s0 + $0x44] ss:$8 sps:$4 sm:$0xff]   ;;  %v2849_v10 = vld [vmem:[%s4703_s0 + $0x40] ss:$8 sps:$4 sm:$0xff]  }
  0x11   : > { %489 = vmatprep.subr.bf16.mxu0 %v2838_v3  ;;  %2805 = vmatprep.subr.bf16.mxu1 %v2838_v3  ;;  %s5225_s16 = smov (!%p180_p3, %s179_s16), 95  ;;  %v2850_v11 = vld [vmem:[%s4703_s0 + $0x54] ss:$8 sps:$4 sm:$0xff]   ;;  %v2852_v12 = vld [vmem:[%s4703_s0 + $0x50] ss:$8 sps:$4 sm:$0xff]   ;;  %s2988_s30 = smov 1  }
  0x12   : > { %2831 = vset.pattern.permute.xlu0 %v2987_v2  ;;  %2832 = vset.pattern.permute.xlu1 %v2987_v2  ;;  %s2757_s25 = sshll.u32 %s5225_s16, 2  ;;  %v2853_v13 = vld [vmem:[%s4703_s0 + $0x64] ss:$8 sps:$4 sm:$0xff]   ;;  %v2855_v14 = vld [vmem:[%s4703_s0 + $0x60] ss:$8 sps:$4 sm:$0xff]   ;;  %s2758_s26 = sshll.u32 %s5225_s16, 3 }
  0x13   : > { %s3049_s5 = scalar_lea.vmem %s4704_s1, %s2757_s25  ;;  %v2856_v15 = vld [vmem:[%s4703_s0 + $0x74] ss:$8 sps:$4 sm:$0xff]   ;;  %v2858_v16 = vld [vmem:[%s4703_s0 + $0x70] ss:$8 sps:$4 sm:$0xff]   ;;  %s3800_s29 = scalar_lea.vmem %s4705_s2, %s2758_s26 }
  0x14   : > { %490 = vmatpush1.bf16.msra.mxu0 %v2840_v4  ;;  %2813 = vmatpush1.bf16.msra.mxu1 %v2840_v4  ;;  %v2859_v17 = vld [vmem:[%s3049_s5] sm:$0xff]   ;;  %v2861_v19 = vld [vmem:[%s3049_s5 + $0x8] sm:$0xff]   ;;  %v2863_v21 = vld [vmem:[%s3049_s5 + $0x10] sm:$0xff]   ;;  %s2803_s4 = sshll.u32 %s5225_s16, 4 }
  0x15   : > { %491 = vmatprep.subr.bf16.mxu0 %v2841_v5  ;;  %2806 = vmatprep.subr.bf16.mxu1 %v2841_v5  ;;  %v2860_v18 = vld [vmem:[%s3049_s5 + $0x60] sm:$0xff]   ;;  %v2862_v20 = vld [vmem:[%s3049_s5 + $0x68] sm:$0xff]   ;;  %v2864_v22 = vld [vmem:[%s3049_s5 + $0x70] sm:$0xff]   ;;  %s4416_s7 = scalar_lea.vmem %s4706_s3, %s2803_s4 }
  0x16   : > { %v2865_v23 = vld [vmem:[%s3049_s5 + $0x18] sm:$0xff]   ;;  %v2867_v25 = vld [vmem:[%s3049_s5 + $0x20] sm:$0xff]   ;;  %v2869_v27 = vld [vmem:[%s3049_s5 + $0x28] sm:$0xff]  }
  0x17   : > { %v2866_v24 = vld [vmem:[%s3049_s5 + $0x78] sm:$0xff]   ;;  %v2868_v26 = vld [vmem:[%s3049_s5 + $0x80] sm:$0xff]   ;;  %v2870_v28 = vld [vmem:[%s3049_s5 + $0x88] sm:$0xff]  }
  0x18   : > { %492 = vmatpush1.bf16.msra.mxu0 %v2843_v6  ;;  %2814 = vmatpush1.bf16.msra.mxu1 %v2843_v6  ;;  %v2871_v29 = vld [vmem:[%s3049_s5 + $0x30] sm:$0xff]   ;;  %v2873_v31 = vld [vmem:[%s3049_s5 + $0x38] sm:$0xff]   ;;  %v2875_v33 = vld [vmem:[%s3049_s5 + $0x40] sm:$0xff]  }
  0x19   : > { %493 = vmatprep.subr.bf16.mxu0 %v2844_v7  ;;  %2807 = vmatprep.subr.bf16.mxu1 %v2844_v7  ;;  %v2872_v30 = vld [vmem:[%s3049_s5 + $0x90] sm:$0xff]   ;;  %v2874_v32 = vld [vmem:[%s3049_s5 + $0x98] sm:$0xff]   ;;  %v2876_v34 = vld [vmem:[%s3049_s5 + $0xa0] sm:$0xff]  }
  0x1a   : > { %v2877_v35 = vld [vmem:[%s3049_s5 + $0x48] sm:$0xff]   ;;  %v2879_v37 = vld [vmem:[%s3049_s5 + $0x50] sm:$0xff]   ;;  %v2881_v39 = vld [vmem:[%s3049_s5 + $0x58] sm:$0xff]  }
  0x1b   : > { %v2878_v36 = vld [vmem:[%s3049_s5 + $0xa8] sm:$0xff]   ;;  %v2880_v38 = vld [vmem:[%s3049_s5 + $0xb0] sm:$0xff]   ;;  %v2882_v40 = vld [vmem:[%s3049_s5 + $0xb8] sm:$0xff]  }
  0x1c   : > { %494 = vmatpush1.bf16.msra.mxu0 %v2846_v8  ;;  %2815 = vmatpush1.bf16.msra.mxu1 %v2846_v8 }
  0x1d   : > { %495 = vmatprep.subr.bf16.mxu0 %v2847_v9  ;;  %2808 = vmatprep.subr.bf16.mxu1 %v2847_v9 }
  0x20   : > { %496 = vmatpush1.bf16.msra.mxu0 %v2849_v10  ;;  %2816 = vmatpush1.bf16.msra.mxu1 %v2849_v10 }
  0x21   : > { %497 = vmatprep.subr.bf16.mxu0 %v2850_v11  ;;  %2809 = vmatprep.subr.bf16.mxu1 %v2850_v11 }
  0x24   : > { %498 = vmatpush1.bf16.msra.mxu0 %v2852_v12  ;;  %2817 = vmatpush1.bf16.msra.mxu1 %v2852_v12 }
  0x25   : > { %499 = vmatprep.subr.bf16.mxu0 %v2853_v13  ;;  %2810 = vmatprep.subr.bf16.mxu1 %v2853_v13 }
  0x28   : > { %500 = vmatpush1.bf16.msra.mxu0 %v2855_v14  ;;  %2818 = vmatpush1.bf16.msra.mxu1 %v2855_v14 }
  0x29   : > { %501 = vmatprep.subr.bf16.mxu0 %v2856_v15  ;;  %2811 = vmatprep.subr.bf16.mxu1 %v2856_v15 }
  0x2c   : > { %502 = vmatpush1.bf16.msra.mxu0 %v2858_v16  ;;  %2819 = vmatpush1.bf16.msra.mxu1 %v2858_v16 }
  0x2f   : > { %520 = vmatmul.mubr.bf16.vlgmr.msra.gmra.mrb[0].mxu0 %v2859_v17  ;;  %640 = vmatmul.mubr.bf16.vlgmr.msra.gmra.mrb[0].mxu1 %v2860_v18 }
  0x30   : > { %529 = vmatprep.mubr.bf16.mxu0 %v2987_v2  ;;  %649 = vmatprep.mubr.bf16.mxu1 %v2987_v2 }
  0x37   : > { %530 = vmatmul.mubr.bf16.gmra.mrb[4].mxu0 %v2861_v19  ;;  %650 = vmatmul.mubr.bf16.gmra.mrb[4].mxu1 %v2862_v20 }
  0x38   : > { %539 = vmatprep.mubr.bf16.mxu0 %v2987_v2  ;;  %659 = vmatprep.mubr.bf16.mxu1 %v2987_v2 }
  0x3f   : > { %540 = vmatmul.mubr.bf16.gmra.mrb[8].mxu0 %v2863_v21  ;;  %660 = vmatmul.mubr.bf16.gmra.mrb[8].mxu1 %v2864_v22 }
  0x40   : > { %549 = vmatprep.mubr.bf16.mxu0 %v2987_v2  ;;  %669 = vmatprep.mubr.bf16.mxu1 %v2987_v2 }
  0x47   : > { %550 = vmatmul.mubr.bf16.gmra.mrb[12].mxu0 %v2865_v23  ;;  %670 = vmatmul.mubr.bf16.gmra.mrb[12].mxu1 %v2866_v24 }
  0x48   : > { %559 = vmatprep.mubr.bf16.mxu0 %v2987_v2  ;;  %679 = vmatprep.mubr.bf16.mxu1 %v2987_v2 }
  0x4f   : > { %560 = vmatmul.mubr.bf16.gmra.mrb[16].mxu0 %v2867_v25  ;;  %680 = vmatmul.mubr.bf16.gmra.mrb[16].mxu1 %v2868_v26 }
  0x50   : > { %569 = vmatprep.mubr.bf16.mxu0 %v2987_v2  ;;  %689 = vmatprep.mubr.bf16.mxu1 %v2987_v2 }
  0x57   : > { %570 = vmatmul.mubr.bf16.gmra.mrb[20].mxu0 %v2869_v27  ;;  %690 = vmatmul.mubr.bf16.gmra.mrb[20].mxu1 %v2870_v28 }
  0x58   : > { %579 = vmatprep.mubr.bf16.mxu0 %v2987_v2  ;;  %699 = vmatprep.mubr.bf16.mxu1 %v2987_v2 }
  0x5f   : > { %580 = vmatmul.mubr.bf16.gmra.mrb[24].mxu0 %v2871_v29  ;;  %700 = vmatmul.mubr.bf16.gmra.mrb[24].mxu1 %v2872_v30 }
  0x60   : > { %589 = vmatprep.mubr.bf16.mxu0 %v2987_v2  ;;  %709 = vmatprep.mubr.bf16.mxu1 %v2987_v2 }
  0x67   : > { %590 = vmatmul.mubr.bf16.gmra.mrb[28].mxu0 %v2873_v31  ;;  %710 = vmatmul.mubr.bf16.gmra.mrb[28].mxu1 %v2874_v32 }
  0x68   : > { %599 = vmatprep.mubr.bf16.mxu0 %v2987_v2  ;;  %719 = vmatprep.mubr.bf16.mxu1 %v2987_v2 }
  0x6f   : > { %600 = vmatmul.mubr.bf16.gmra.mrb[32].mxu0 %v2875_v33  ;;  %720 = vmatmul.mubr.bf16.gmra.mrb[32].mxu1 %v2876_v34 }
  0x70   : > { %609 = vmatprep.mubr.bf16.mxu0 %v2987_v2  ;;  %729 = vmatprep.mubr.bf16.mxu1 %v2987_v2 }
  0x77   : > { %610 = vmatmul.mubr.bf16.gmra.mrb[36].mxu0 %v2877_v35  ;;  %730 = vmatmul.mubr.bf16.gmra.mrb[36].mxu1 %v2878_v36 }
  0x78   : > { %619 = vmatprep.mubr.bf16.mxu0 %v2987_v2  ;;  %739 = vmatprep.mubr.bf16.mxu1 %v2987_v2 }
  0x7f   : > { %620 = vmatmul.mubr.bf16.gmra.mrb[40].mxu0 %v2879_v37  ;;  %740 = vmatmul.mubr.bf16.gmra.mrb[40].mxu1 %v2880_v38 }
  0x80   : > { %629 = vmatprep.mubr.bf16.mxu0 %v2987_v2  ;;  %749 = vmatprep.mubr.bf16.mxu1 %v2987_v2 }
  0x87   : > { %630 = vmatmul.mubr.bf16.gmra.mrb[44].mxu0 %v2881_v39  ;;  %750 = vmatmul.mubr.bf16.gmra.mrb[44].mxu1 %v2882_v40 }
 0x102   : > { %v3124_v41 = vpop.f32.mrb[0].mxu0  ;;  %v3126_v42 = vpop.f32.mrb[0].mxu1 }
 0x103   : > { %4885 = vst [vmem:[#allocation2_spill] sm:$0xff] %v3124_v41  ;;  %4886 = vst [vmem:[#allocation3_spill] sm:$0xff] %v3126_v42  ;;  %v3128_v43 = vpop.f32.mrb[1].mxu0  ;;  %v3130_v44 = vpop.f32.mrb[1].mxu1 }
 0x104   : > { %4887 = vst [vmem:[#allocation4_spill] sm:$0xff] %v3128_v43  ;;  %4888 = vst [vmem:[#allocation5_spill] sm:$0xff] %v3130_v44  ;;  %v3132_v45 = vpop.f32.mrb[2].mxu0  ;;  %v3134_v46 = vpop.f32.mrb[2].mxu1  ;;  %v761_v47 = vsel %vm760_vm0, %v3128_v43, 0.0  ;;  %v857_v48 = vsel %vm760_vm0, %v3130_v44, 0.0 }
 0x105   : > { %4889 = vst [vmem:[#allocation6_spill] sm:$0xff] %v3132_v45  ;;  %4890 = vst [vmem:[#allocation7_spill] sm:$0xff] %v3134_v46  ;;  %v3140_v49 = vpop.f32.mrb[3].mxu0  ;;  %v3142_v50 = vpop.f32.mrb[3].mxu1  ;;  %v762_v51 = vadd.f32 %v761_v47, %v3124_v41  ;;  %v858_v52 = vadd.f32 %v857_v48, %v3126_v42 }
 0x106   : > { %4891 = vst [vmem:[#allocation8_spill] sm:$0xff] %v3140_v49  ;;  %4892 = vst [vmem:[#allocation9_spill] sm:$0xff] %v3142_v50  ;;  %v861_v53 = vsel %vm760_vm0, %v3142_v50, 0.0  ;;  %v765_v54 = vsel %vm760_vm0, %v3140_v49, 0.0 }
 0x107   : > { %763 = vadd.xlane.f32.xlu0 %v762_v51  ;;  %v862_v55 = vadd.f32 %v861_v53, %v3134_v46  ;;  %v766_v56 = vadd.f32 %v765_v54, %v3132_v45 }
 0x109   : > { %863 = vadd.xlane.f32.xlu1 %v862_v55 }
 0x10a   : > { %v3152_v57 = vpop.f32.mrb[4].mxu0  ;;  %v3154_v58 = vpop.f32.mrb[4].mxu1 }
 0x10b   : > { %4893 = vst [vmem:[#allocation10_spill] sm:$0xff] %v3152_v57  ;;  %4894 = vst [vmem:[#allocation11_spill] sm:$0xff] %v3154_v58  ;;  %859 = vadd.xlane.f32.xlu0 %v858_v52  ;;  %v3156_v59 = vpop.f32.mrb[5].mxu0  ;;  %v3158_v60 = vpop.f32.mrb[5].mxu1 }
 0x10c   : > { %4895 = vst [vmem:[#allocation12_spill] sm:$0xff] %v3156_v59  ;;  %4896 = vst [vmem:[#allocation13_spill] sm:$0xff] %v3158_v60  ;;  %v3160_v61 = vpop.f32.mrb[6].mxu0  ;;  %v769_v62 = vsel %vm760_vm0, %v3156_v59, 0.0  ;;  %v3164_v63 = vpop.f32.mrb[6].mxu1  ;;  %v865_v0 = vsel %vm760_vm0, %v3158_v60, 0.0 }
 0x10d   : > { %4897 = vst [vmem:[#allocation14_spill] sm:$0xff] %v3160_v61  ;;  %4898 = vst [vmem:[#allocation15_spill] sm:$0xff] %v3164_v63  ;;  %v770_v1 = vadd.f32 %v769_v62, %v3152_v57  ;;  %v3169_v2 = vpop.f32.mrb[7].mxu0  ;;  %v3171_v3 = vpop.f32.mrb[7].mxu1  ;;  %v866_v4 = vadd.f32 %v865_v0, %v3154_v58 }
 0x10e   : > { %4899 = vst [vmem:[#allocation16_spill] sm:$0xff] %v3169_v2  ;;  %4900 = vst [vmem:[#allocation17_spill] sm:$0xff] %v3171_v3  ;;  %v773_v5 = vsel %vm760_vm0, %v3169_v2, 0.0  ;;  %v869_v6 = vsel %vm760_vm0, %v3171_v3, 0.0 }
 0x10f   : > { %767 = vadd.xlane.f32.xlu0 %v766_v56  ;;  %771 = vadd.xlane.f32.xlu1 %v770_v1  ;;  %v774_v7 = vadd.f32 %v773_v5, %v3160_v61  ;;  %v870_v8 = vadd.f32 %v869_v6, %v3164_v63 }
 0x112   : > { %v3180_v9 = vpop.f32.mrb[8].mxu0  ;;  %v3182_v10 = vpop.f32.mrb[8].mxu1 }
 0x113   : > { %4901 = vst [vmem:[#allocation18_spill] sm:$0xff] %v3180_v9  ;;  %4902 = vst [vmem:[#allocation19_spill] sm:$0xff] %v3182_v10  ;;  %867 = vadd.xlane.f32.xlu0 %v866_v4  ;;  %775 = vadd.xlane.f32.xlu1 %v774_v7  ;;  %v3184_v11 = vpop.f32.mrb[9].mxu0  ;;  %v3186_v12 = vpop.f32.mrb[9].mxu1 }
 0x114   : > { %4903 = vst [vmem:[#allocation20_spill] sm:$0xff] %v3184_v11  ;;  %4904 = vst [vmem:[#allocation21_spill] sm:$0xff] %v3186_v12  ;;  %v3188_v13 = vpop.f32.mrb[10].mxu0  ;;  %v777_v14 = vsel %vm760_vm0, %v3184_v11, 0.0  ;;  %v3192_v15 = vpop.f32.mrb[10].mxu1  ;;  %v873_v16 = vsel %vm760_vm0, %v3186_v12, 0.0 }
 0x115   : > { %4905 = vst [vmem:[#allocation22_spill] sm:$0xff] %v3188_v13  ;;  %4906 = vst [vmem:[#allocation23_spill] sm:$0xff] %v3192_v15  ;;  %v778_v17 = vadd.f32 %v777_v14, %v3180_v9  ;;  %v3197_v18 = vpop.f32.mrb[11].mxu0  ;;  %v3199_v19 = vpop.f32.mrb[11].mxu1  ;;  %v874_v20 = vadd.f32 %v873_v16, %v3182_v10 }
 0x116   : > { %4907 = vst [vmem:[#allocation24_spill] sm:$0xff] %v3197_v18  ;;  %4908 = vst [vmem:[#allocation25_spill] sm:$0xff] %v3199_v19  ;;  %v781_v21 = vsel %vm760_vm0, %v3197_v18, 0.0  ;;  %v877_v22 = vsel %vm760_vm0, %v3199_v19, 0.0 }
 0x117   : > { %871 = vadd.xlane.f32.xlu1 %v870_v8  ;;  %779 = vadd.xlane.f32.xlu0 %v778_v17  ;;  %v782_v23 = vadd.f32 %v781_v21, %v3188_v13  ;;  %v878_v24 = vadd.f32 %v877_v22, %v3192_v15 }
 0x11a   : > { %v3208_v25 = vpop.f32.mrb[12].mxu0  ;;  %v3210_v26 = vpop.f32.mrb[12].mxu1 }
 0x11b   : > { %4909 = vst [vmem:[#allocation26_spill] sm:$0xff] %v3208_v25  ;;  %4910 = vst [vmem:[#allocation27_spill] sm:$0xff] %v3210_v26  ;;  %875 = vadd.xlane.f32.xlu0 %v874_v20  ;;  %783 = vadd.xlane.f32.xlu1 %v782_v23  ;;  %v3212_v27 = vpop.f32.mrb[13].mxu0  ;;  %v3214_v28 = vpop.f32.mrb[13].mxu1 }
 0x11c   : > { %4911 = vst [vmem:[#allocation28_spill] sm:$0xff] %v3212_v27  ;;  %4912 = vst [vmem:[#allocation29_spill] sm:$0xff] %v3214_v28  ;;  %v3216_v29 = vpop.f32.mrb[14].mxu0  ;;  %v785_v30 = vsel %vm760_vm0, %v3212_v27, 0.0  ;;  %v3220_v31 = vpop.f32.mrb[14].mxu1  ;;  %v881_v32 = vsel %vm760_vm0, %v3214_v28, 0.0 }
 0x11d   : > { %4913 = vst [vmem:[#allocation30_spill] sm:$0xff] %v3216_v29  ;;  %4914 = vst [vmem:[#allocation31_spill] sm:$0xff] %v3220_v31  ;;  %v786_v33 = vadd.f32 %v785_v30, %v3208_v25  ;;  %v3225_v34 = vpop.f32.mrb[15].mxu0  ;;  %v3227_v35 = vpop.f32.mrb[15].mxu1  ;;  %v882_v36 = vadd.f32 %v881_v32, %v3210_v26 }
 0x11e   : > { %4915 = vst [vmem:[#allocation32_spill] sm:$0xff] %v3225_v34  ;;  %4916 = vst [vmem:[#allocation33_spill] sm:$0xff] %v3227_v35  ;;  %v789_v37 = vsel %vm760_vm0, %v3225_v34, 0.0  ;;  %v885_v38 = vsel %vm760_vm0, %v3227_v35, 0.0 }
 0x11f   : > { %879 = vadd.xlane.f32.xlu1 %v878_v24  ;;  %787 = vadd.xlane.f32.xlu0 %v786_v33  ;;  %v790_v39 = vadd.f32 %v789_v37, %v3216_v29  ;;  %v886_v40 = vadd.f32 %v885_v38, %v3220_v31 }
 0x122   : > { %v3236_v47 = vpop.f32.mrb[16].mxu0  ;;  %v3238_v48 = vpop.f32.mrb[16].mxu1 }
 0x123   : > { %4917 = vst [vmem:[#allocation34_spill] sm:$0xff] %v3236_v47  ;;  %4918 = vst [vmem:[#allocation35_spill] sm:$0xff] %v3238_v48  ;;  %883 = vadd.xlane.f32.xlu0 %v882_v36  ;;  %791 = vadd.xlane.f32.xlu1 %v790_v39  ;;  %v3240_v51 = vpop.f32.mrb[17].mxu0  ;;  %v3242_v52 = vpop.f32.mrb[17].mxu1 }
 0x124   : > { %4919 = vst [vmem:[#allocation36_spill] sm:$0xff] %v3240_v51  ;;  %4920 = vst [vmem:[#allocation37_spill] sm:$0xff] %v3242_v52  ;;  %v3244_v53 = vpop.f32.mrb[18].mxu0  ;;  %v793_v54 = vsel %vm760_vm0, %v3240_v51, 0.0  ;;  %v3248_v55 = vpop.f32.mrb[18].mxu1  ;;  %v889_v56 = vsel %vm760_vm0, %v3242_v52, 0.0 }
 0x125   : > { %4921 = vst [vmem:[#allocation38_spill] sm:$0xff] %v3244_v53  ;;  %4922 = vst [vmem:[#allocation39_spill] sm:$0xff] %v3248_v55  ;;  %v794_v62 = vadd.f32 %v793_v54, %v3236_v47  ;;  %v3253_v0 = vpop.f32.mrb[19].mxu0  ;;  %v3255_v1 = vpop.f32.mrb[19].mxu1  ;;  %v890_v4 = vadd.f32 %v889_v56, %v3238_v48 }
 0x126   : > { %4923 = vst [vmem:[#allocation40_spill] sm:$0xff] %v3253_v0  ;;  %4924 = vst [vmem:[#allocation41_spill] sm:$0xff] %v3255_v1  ;;  %v797_v5 = vsel %vm760_vm0, %v3253_v0, 0.0  ;;  %v893_v6 = vsel %vm760_vm0, %v3255_v1, 0.0 }
 0x127   : > { %887 = vadd.xlane.f32.xlu1 %v886_v40  ;;  %795 = vadd.xlane.f32.xlu0 %v794_v62  ;;  %v798_v7 = vadd.f32 %v797_v5, %v3244_v53  ;;  %v894_v8 = vadd.f32 %v893_v6, %v3248_v55 }
 0x12a   : > { %v3264_v14 = vpop.f32.mrb[20].mxu0  ;;  %v3266_v16 = vpop.f32.mrb[20].mxu1 }
 0x12b   : > { %4925 = vst [vmem:[#allocation42_spill] sm:$0xff] %v3264_v14  ;;  %4926 = vst [vmem:[#allocation43_spill] sm:$0xff] %v3266_v16  ;;  %891 = vadd.xlane.f32.xlu0 %v890_v4  ;;  %799 = vadd.xlane.f32.xlu1 %v798_v7  ;;  %v3268_v17 = vpop.f32.mrb[21].mxu0  ;;  %v3270_v20 = vpop.f32.mrb[21].mxu1 }
 0x12c   : > { %4927 = vst [vmem:[#allocation44_spill] sm:$0xff] %v3268_v17  ;;  %4928 = vst [vmem:[#allocation45_spill] sm:$0xff] %v3270_v20  ;;  %v3272_v21 = vpop.f32.mrb[22].mxu0  ;;  %v801_v22 = vsel %vm760_vm0, %v3268_v17, 0.0  ;;  %v3276_v23 = vpop.f32.mrb[22].mxu1  ;;  %v897_v24 = vsel %vm760_vm0, %v3270_v20, 0.0 }
 0x12d   : > { %4929 = vst [vmem:[#allocation46_spill] sm:$0xff] %v3272_v21  ;;  %4930 = vst [vmem:[#allocation47_spill] sm:$0xff] %v3276_v23  ;;  %v802_v30 = vadd.f32 %v801_v22, %v3264_v14  ;;  %v3281_v32 = vpop.f32.mrb[23].mxu0  ;;  %v3283_v33 = vpop.f32.mrb[23].mxu1  ;;  %v898_v36 = vadd.f32 %v897_v24, %v3266_v16 }
 0x12e   : > { %4931 = vst [vmem:[#allocation48_spill] sm:$0xff] %v3281_v32  ;;  %4932 = vst [vmem:[#allocation49_spill] sm:$0xff] %v3283_v33  ;;  %v805_v37 = vsel %vm760_vm0, %v3281_v32, 0.0  ;;  %v901_v38 = vsel %vm760_vm0, %v3283_v33, 0.0 }
 0x12f   : > { %895 = vadd.xlane.f32.xlu1 %v894_v8  ;;  %803 = vadd.xlane.f32.xlu0 %v802_v30  ;;  %v806_v39 = vadd.f32 %v805_v37, %v3272_v21  ;;  %v902_v40 = vadd.f32 %v901_v38, %v3276_v23 }
 0x132   : > { %v3292_v54 = vpop.f32.mrb[24].mxu0  ;;  %v3294_v56 = vpop.f32.mrb[24].mxu1 }
 0x133   : > { %4933 = vst [vmem:[#allocation50_spill] sm:$0xff] %v3292_v54  ;;  %4934 = vst [vmem:[#allocation51_spill] sm:$0xff] %v3294_v56  ;;  %899 = vadd.xlane.f32.xlu0 %v898_v36  ;;  %807 = vadd.xlane.f32.xlu1 %v806_v39  ;;  %v3296_v62 = vpop.f32.mrb[25].mxu0  ;;  %v3298_v4 = vpop.f32.mrb[25].mxu1 }
 0x134   : > { %4935 = vst [vmem:[#allocation52_spill] sm:$0xff] %v3296_v62  ;;  %4936 = vst [vmem:[#allocation53_spill] sm:$0xff] %v3298_v4  ;;  %v3300_v5 = vpop.f32.mrb[26].mxu0  ;;  %v809_v6 = vsel %vm760_vm0, %v3296_v62, 0.0  ;;  %v3304_v7 = vpop.f32.mrb[26].mxu1  ;;  %v905_v8 = vsel %vm760_vm0, %v3298_v4, 0.0 }
 0x135   : > { %4937 = vst [vmem:[#allocation54_spill] sm:$0xff] %v3300_v5  ;;  %4938 = vst [vmem:[#allocation55_spill] sm:$0xff] %v3304_v7  ;;  %v810_v22 = vadd.f32 %v809_v6, %v3292_v54  ;;  %v3309_v24 = vpop.f32.mrb[27].mxu0  ;;  %v3311_v30 = vpop.f32.mrb[27].mxu1  ;;  %v906_v36 = vadd.f32 %v905_v8, %v3294_v56 }
 0x136   : > { %4939 = vst [vmem:[#allocation56_spill] sm:$0xff] %v3309_v24  ;;  %4940 = vst [vmem:[#allocation57_spill] sm:$0xff] %v3311_v30  ;;  %v813_v37 = vsel %vm760_vm0, %v3309_v24, 0.0  ;;  %v909_v38 = vsel %vm760_vm0, %v3311_v30, 0.0 }
 0x137   : > { %903 = vadd.xlane.f32.xlu1 %v902_v40  ;;  %811 = vadd.xlane.f32.xlu0 %v810_v22  ;;  %v814_v39 = vadd.f32 %v813_v37, %v3300_v5  ;;  %v910_v4 = vadd.f32 %v909_v38, %v3304_v7 }
 0x13a   : > { %v3320_v33 = vpop.f32.mrb[28].mxu0  ;;  %v3322_v6 = vpop.f32.mrb[28].mxu1 }
 0x13b   : > { %4941 = vst [vmem:[#allocation58_spill] sm:$0xff] %v3320_v33  ;;  %4942 = vst [vmem:[#allocation59_spill] sm:$0xff] %v3322_v6  ;;  %907 = vadd.xlane.f32.xlu0 %v906_v36  ;;  %815 = vadd.xlane.f32.xlu1 %v814_v39  ;;  %v3324_v23 = vpop.f32.mrb[29].mxu0  ;;  %v3326_v8 = vpop.f32.mrb[29].mxu1 }
 0x13c   : > { %4943 = vst [vmem:[#allocation60_spill] sm:$0xff] %v3324_v23  ;;  %4944 = vst [vmem:[#allocation61_spill] sm:$0xff] %v3326_v8  ;;  %v3328_v24 = vpop.f32.mrb[30].mxu0  ;;  %v817_v40 = vsel %vm760_vm0, %v3324_v23, 0.0  ;;  %v3332_v22 = vpop.f32.mrb[30].mxu1  ;;  %v913_v37 = vsel %vm760_vm0, %v3326_v8, 0.0 }
 0x13d   : > { %4945 = vst [vmem:[#allocation62_spill] sm:$0xff] %v3328_v24  ;;  %4946 = vst [vmem:[#allocation63_spill] sm:$0xff] %v3332_v22  ;;  %v818_v38 = vadd.f32 %v817_v40, %v3320_v33  ;;  %v3337_v30 = vpop.f32.mrb[31].mxu0  ;;  %v3339_v36 = vpop.f32.mrb[31].mxu1  ;;  %v914_v39 = vadd.f32 %v913_v37, %v3322_v6 }
 0x13e   : > { %4947 = vst [vmem:[#allocation64_spill] sm:$0xff] %v3337_v30  ;;  %4948 = vst [vmem:[#allocation65_spill] sm:$0xff] %v3339_v36  ;;  %v821_v7 = vsel %vm760_vm0, %v3337_v30, 0.0  ;;  %v917_v5 = vsel %vm760_vm0, %v3339_v36, 0.0 }
 0x13f   : > { %911 = vadd.xlane.f32.xlu1 %v910_v4  ;;  %819 = vadd.xlane.f32.xlu0 %v818_v38  ;;  %v822_v23 = vadd.f32 %v821_v7, %v3328_v24  ;;  %v918_v8 = vadd.f32 %v917_v5, %v3332_v22 }
 0x142   : > { %v3348_v56 = vpop.f32.mrb[32].mxu0  ;;  %v3350_v40 = vpop.f32.mrb[32].mxu1 }
 0x143   : > { %4949 = vst [vmem:[#allocation66_spill] sm:$0xff] %v3348_v56  ;;  %4950 = vst [vmem:[#allocation67_spill] sm:$0xff] %v3350_v40  ;;  %915 = vadd.xlane.f32.xlu0 %v914_v39  ;;  %823 = vadd.xlane.f32.xlu1 %v822_v23  ;;  %v3352_v33 = vpop.f32.mrb[33].mxu0  ;;  %v3354_v37 = vpop.f32.mrb[33].mxu1 }
 0x144   : > { %4951 = vst [vmem:[#allocation68_spill] sm:$0xff] %v3352_v33  ;;  %4952 = vst [vmem:[#allocation69_spill] sm:$0xff] %v3354_v37  ;;  %v3356_v30 = vpop.f32.mrb[34].mxu0  ;;  %v825_v4 = vsel %vm760_vm0, %v3352_v33, 0.0  ;;  %v3360_v38 = vpop.f32.mrb[34].mxu1  ;;  %v921_v5 = vsel %vm760_vm0, %v3354_v37, 0.0 }
 0x145   : > { %4953 = vst [vmem:[#allocation70_spill] sm:$0xff] %v3356_v30  ;;  %4954 = vst [vmem:[#allocation71_spill] sm:$0xff] %v3360_v38  ;;  %v826_v7 = vadd.f32 %v825_v4, %v3348_v56  ;;  %v3365_v36 = vpop.f32.mrb[35].mxu0  ;;  %v3367_v39 = vpop.f32.mrb[35].mxu1  ;;  %v922_v23 = vadd.f32 %v921_v5, %v3350_v40 }
 0x146   : > { %4955 = vst [vmem:[#allocation72_spill] sm:$0xff] %v3365_v36  ;;  %4956 = vst [vmem:[#allocation73_spill] sm:$0xff] %v3367_v39  ;;  %v829_v22 = vsel %vm760_vm0, %v3365_v36, 0.0  ;;  %v925_v24 = vsel %vm760_vm0, %v3367_v39, 0.0 }
 0x147   : > { %919 = vadd.xlane.f32.xlu1 %v918_v8  ;;  %827 = vadd.xlane.f32.xlu0 %v826_v7  ;;  %v830_v33 = vadd.f32 %v829_v22, %v3356_v30  ;;  %v926_v37 = vadd.f32 %v925_v24, %v3360_v38 }
 0x14a   : > { %v3376_v6 = vpop.f32.mrb[36].mxu0  ;;  %v3378_v4 = vpop.f32.mrb[36].mxu1 }
 0x14b   : > { %4957 = vst [vmem:[#allocation74_spill] sm:$0xff] %v3376_v6  ;;  %4958 = vst [vmem:[#allocation75_spill] sm:$0xff] %v3378_v4  ;;  %923 = vadd.xlane.f32.xlu0 %v922_v23  ;;  %831 = vadd.xlane.f32.xlu1 %v830_v33  ;;  %v3380_v56 = vpop.f32.mrb[37].mxu0  ;;  %v3382_v5 = vpop.f32.mrb[37].mxu1 }
 0x14c   : > { %4959 = vst [vmem:[#allocation76_spill] sm:$0xff] %v3380_v56  ;;  %4960 = vst [vmem:[#allocation77_spill] sm:$0xff] %v3382_v5  ;;  %v3384_v36 = vpop.f32.mrb[38].mxu0  ;;  %v833_v8 = vsel %vm760_vm0, %v3380_v56, 0.0  ;;  %v3388_v7 = vpop.f32.mrb[38].mxu1  ;;  %v929_v24 = vsel %vm760_vm0, %v3382_v5, 0.0 }
 0x14d   : > { %4961 = vst [vmem:[#allocation78_spill] sm:$0xff] %v3384_v36  ;;  %4962 = vst [vmem:[#allocation79_spill] sm:$0xff] %v3388_v7  ;;  %v834_v22 = vadd.f32 %v833_v8, %v3376_v6  ;;  %v3393_v39 = vpop.f32.mrb[39].mxu0  ;;  %v3395_v23 = vpop.f32.mrb[39].mxu1  ;;  %v930_v33 = vadd.f32 %v929_v24, %v3378_v4 }
 0x14e   : > { %4963 = vst [vmem:[#allocation80_spill] sm:$0xff] %v3393_v39  ;;  %4964 = vst [vmem:[#allocation81_spill] sm:$0xff] %v3395_v23  ;;  %v837_v38 = vsel %vm760_vm0, %v3393_v39, 0.0  ;;  %v933_v30 = vsel %vm760_vm0, %v3395_v23, 0.0 }
 0x14f   : > { %927 = vadd.xlane.f32.xlu1 %v926_v37  ;;  %835 = vadd.xlane.f32.xlu0 %v834_v22  ;;  %v838_v56 = vadd.f32 %v837_v38, %v3384_v36  ;;  %v934_v5 = vadd.f32 %v933_v30, %v3388_v7 }
 0x152   : > { %v3404_v40 = vpop.f32.mrb[40].mxu0  ;;  %v3406_v8 = vpop.f32.mrb[40].mxu1 }
 0x153   : > { %4965 = vst [vmem:[#allocation82_spill] sm:$0xff] %v3404_v40  ;;  %4966 = vst [vmem:[#allocation83_spill] sm:$0xff] %v3406_v8  ;;  %931 = vadd.xlane.f32.xlu0 %v930_v33  ;;  %839 = vadd.xlane.f32.xlu1 %v838_v56  ;;  %v3408_v6 = vpop.f32.mrb[41].mxu0  ;;  %v3410_v24 = vpop.f32.mrb[41].mxu1 }
 0x154   : > { %4967 = vst [vmem:[#allocation84_spill] sm:$0xff] %v3408_v6  ;;  %4968 = vst [vmem:[#allocation85_spill] sm:$0xff] %v3410_v24  ;;  %v3412_v39 = vpop.f32.mrb[42].mxu0  ;;  %v841_v37 = vsel %vm760_vm0, %v3408_v6, 0.0  ;;  %v3416_v22 = vpop.f32.mrb[42].mxu1  ;;  %v937_v30 = vsel %vm760_vm0, %v3410_v24, 0.0 }
 0x155   : > { %4969 = vst [vmem:[#allocation86_spill] sm:$0xff] %v3412_v39  ;;  %4970 = vst [vmem:[#allocation87_spill] sm:$0xff] %v3416_v22  ;;  %v842_v38 = vadd.f32 %v841_v37, %v3404_v40  ;;  %v3421_v23 = vpop.f32.mrb[43].mxu0  ;;  %v3423_v33 = vpop.f32.mrb[43].mxu1  ;;  %v938_v56 = vadd.f32 %v937_v30, %v3406_v8 }
 0x156   : > { %4971 = vst [vmem:[#allocation88_spill] sm:$0xff] %v3421_v23  ;;  %4972 = vst [vmem:[#allocation89_spill] sm:$0xff] %v3423_v33  ;;  %v845_v7 = vsel %vm760_vm0, %v3421_v23, 0.0  ;;  %v941_v36 = vsel %vm760_vm0, %v3423_v33, 0.0 }
 0x157   : > { %935 = vadd.xlane.f32.xlu1 %v934_v5  ;;  %843 = vadd.xlane.f32.xlu0 %v842_v38  ;;  %v846_v6 = vadd.f32 %v845_v7, %v3412_v39  ;;  %v942_v24 = vadd.f32 %v941_v36, %v3416_v22 }
 0x15a   : > { %v3432_v4 = vpop.f32.mrb[44].mxu0  ;;  %v3434_v37 = vpop.f32.mrb[44].mxu1 }
 0x15b   : > { %4973 = vst [vmem:[#allocation90_spill] sm:$0xff] %v3432_v4  ;;  %4974 = vst [vmem:[#allocation91_spill] sm:$0xff] %v3434_v37  ;;  %939 = vadd.xlane.f32.xlu0 %v938_v56  ;;  %847 = vadd.xlane.f32.xlu1 %v846_v6  ;;  %v3436_v40 = vpop.f32.mrb[45].mxu0  ;;  %v3438_v30 = vpop.f32.mrb[45].mxu1 }
 0x15c   : > { %4975 = vst [vmem:[#allocation92_spill] sm:$0xff] %v3436_v40  ;;  %4976 = vst [vmem:[#allocation93_spill] sm:$0xff] %v3438_v30  ;;  %v3440_v23 = vpop.f32.mrb[46].mxu0  ;;  %v849_v5 = vsel %vm760_vm0, %v3436_v40, 0.0  ;;  %v3444_v38 = vpop.f32.mrb[46].mxu1  ;;  %v945_v36 = vsel %vm760_vm0, %v3438_v30, 0.0 }
 0x15d   : > { %4977 = vst [vmem:[#allocation94_spill] sm:$0xff] %v3440_v23  ;;  %4978 = vst [vmem:[#allocation95_spill] sm:$0xff] %v3444_v38  ;;  %v850_v7 = vadd.f32 %v849_v5, %v3432_v4  ;;  %v3449_v33 = vpop.f32.mrb[47].mxu0  ;;  %v3451_v56 = vpop.f32.mrb[47].mxu1  ;;  %v946_v6 = vadd.f32 %v945_v36, %v3434_v37 }
 0x15e   : > { %4979 = vst [vmem:[#allocation96_spill] sm:$0xff] %v3449_v33  ;;  %4980 = vst [vmem:[#allocation97_spill] sm:$0xff] %v3451_v56  ;;  %v853_v22 = vsel %vm760_vm0, %v3449_v33, 0.0  ;;  %v949_v39 = vsel %vm760_vm0, %v3451_v56, 0.0 }
 0x15f   : > { %943 = vadd.xlane.f32.xlu1 %v942_v24  ;;  %851 = vadd.xlane.f32.xlu0 %v850_v7  ;;  %v854_v40 = vadd.f32 %v853_v22, %v3440_v23  ;;  %v950_v30 = vadd.f32 %v949_v39, %v3444_v38 }
 0x163   : > { %947 = vadd.xlane.f32.xlu0 %v946_v6  ;;  %855 = vadd.xlane.f32.xlu1 %v854_v40 }
 0x167   : > { %951 = vadd.xlane.f32.xlu1 %v950_v30 }
 0x194   : > { %v764_v5 = vpop.xlane.xlu0 %763 }
 0x195   : > { %v3460_v4 = vmul.f32 0.0051020407, %v764_v5 }
 0x196   : > { %v864_v8 = vpop.xlane.xlu1 %863 }
 0x197   : > { %4981 = vst [vmem:[#allocation98_spill] sm:$0xff] %v3460_v4  ;;  %v3462_v36 = vmul.f32 0.0051020407, %v864_v8  ;;  %v1002_v33 = vsub.f32 %v3124_v41, %v3460_v4  ;;  %v1003_v24 = vsub.f32 %v3128_v43, %v3460_v4 }
 0x198   : > { %v860_v7 = vpop.xlane.xlu0 %859 }
 0x199   : > { %v3468_v56 = vmul.f32 0.0051020407, %v860_v7  ;;  %v1098_v22 = vmul.f32 %v1002_v33, %v1002_v33  ;;  %v1099_v39 = vmul.f32 %v1003_v24, %v1003_v24  ;;  %v1052_v40 = vsub.f32 %v3134_v46, %v3462_v36 }
 0x19a   : > { %v1053_v30 = vsub.f32 %v3142_v50, %v3462_v36 }
 0x19b   : > { %v1194_v8 = vsel %vm760_vm0, %v1099_v39, 0.0  ;;  %v1050_v6 = vsub.f32 %v3126_v42, %v3468_v56  ;;  %v1051_v5 = vsub.f32 %v3130_v44, %v3468_v56  ;;  %v1148_v4 = vmul.f32 %v1052_v40, %v1052_v40 }
 0x19c   : > { %v768_v43 = vpop.xlane.xlu0 %767  ;;  %v772_v41 = vpop.xlane.xlu1 %771  ;;  %v1195_v7 = vadd.f32 %v1194_v8, %v1098_v22  ;;  %v1149_v33 = vmul.f32 %v1053_v30, %v1053_v30 }
 0x19d   : > { %v3479_v24 = vmul.f32 0.0051020407, %v768_v43  ;;  %v3481_v38 = vmul.f32 0.0051020407, %v772_v41  ;;  %v1146_v46 = vmul.f32 %v1050_v6, %v1050_v6  ;;  %v1147_v23 = vmul.f32 %v1051_v5, %v1051_v5 }
 0x19e   : > { %1196 = vadd.xlane.f32.xlu0 %v1195_v7  ;;  %v1294_v39 = vsel %vm760_vm0, %v1149_v33, 0.0 }
 0x19f   : > { %v1290_v50 = vsel %vm760_vm0, %v1147_v23, 0.0  ;;  %v1006_v42 = vsub.f32 %v3152_v57, %v3481_v38  ;;  %v1007_v44 = vsub.f32 %v3156_v59, %v3481_v38  ;;  %v1004_v22 = vsub.f32 %v3132_v45, %v3479_v24 }
 0x1a0   : > { %v868_v43 = vpop.xlane.xlu0 %867  ;;  %v776_v40 = vpop.xlane.xlu1 %775  ;;  %v1291_v41 = vadd.f32 %v1290_v50, %v1146_v46  ;;  %v1005_v30 = vsub.f32 %v3140_v49, %v3479_v24  ;;  %v1295_v8 = vadd.f32 %v1294_v39, %v1148_v4 }
 0x1a1   : > { %v3493_v6 = vmul.f32 0.0051020407, %v868_v43  ;;  %v3495_v5 = vmul.f32 0.0051020407, %v776_v40  ;;  %v1102_v23 = vmul.f32 %v1006_v42, %v1006_v42  ;;  %v1103_v7 = vmul.f32 %v1007_v44, %v1007_v44 }
 0x1a2   : > { %1292 = vadd.xlane.f32.xlu0 %v1291_v41  ;;  %v1100_v33 = vmul.f32 %v1004_v22, %v1004_v22  ;;  %v1101_v57 = vmul.f32 %v1005_v30, %v1005_v30 }
 0x1a3   : > { %v1202_v59 = vsel %vm760_vm0, %v1103_v7, 0.0  ;;  %v1054_v45 = vsub.f32 %v3154_v58, %v3493_v6  ;;  %v1055_v46 = vsub.f32 %v3158_v60, %v3493_v6  ;;  %v1008_v50 = vsub.f32 %v3160_v61, %v3495_v5 }
 0x1a4   : > { %v872_v4 = vpop.xlane.xlu1 %871  ;;  %v780_v39 = vpop.xlane.xlu0 %779  ;;  %v1203_v43 = vadd.f32 %v1202_v59, %v1102_v23  ;;  %v1198_v42 = vsel %vm760_vm0, %v1101_v57, 0.0  ;;  %v1009_v44 = vsub.f32 %v3169_v2, %v3495_v5 }
 0x1a5   : > { %v3507_v22 = vmul.f32 0.0051020407, %v872_v4  ;;  %v3509_v40 = vmul.f32 0.0051020407, %v780_v39  ;;  %v1199_v41 = vadd.f32 %v1198_v42, %v1100_v33  ;;  %v1150_v30 = vmul.f32 %v1054_v45, %v1054_v45 }
 0x1a6   : > { %1204 = vadd.xlane.f32.xlu0 %v1203_v43  ;;  %v1151_v7 = vmul.f32 %v1055_v46, %v1055_v46  ;;  %v1104_v60 = vmul.f32 %v1008_v50, %v1008_v50  ;;  %v1105_v58 = vmul.f32 %v1009_v44, %v1009_v44 }
 0x1a7   : > { %1200 = vadd.xlane.f32.xlu1 %v1199_v41  ;;  %v1010_v61 = vsub.f32 %v3180_v9, %v3509_v40  ;;  %v1011_v57 = vsub.f32 %v3184_v11, %v3509_v40  ;;  %v1056_v59 = vsub.f32 %v3164_v63, %v3507_v22  ;;  %v1057_v23 = vsub.f32 %v3171_v3, %v3507_v22 }
 0x1a8   : > { %v876_v4 = vpop.xlane.xlu0 %875  ;;  %v784_v33 = vpop.xlane.xlu1 %783  ;;  %v1298_v45 = vsel %vm760_vm0, %v1151_v7, 0.0  ;;  %v1206_v46 = vsel %vm760_vm0, %v1105_v58, 0.0 }
 0x1a9   : > { %v3521_v50 = vmul.f32 0.0051020407, %v876_v4  ;;  %v3523_v39 = vmul.f32 0.0051020407, %v784_v33  ;;  %v1299_v43 = vadd.f32 %v1298_v45, %v1150_v30  ;;  %v1106_v42 = vmul.f32 %v1010_v61, %v1010_v61 }
 0x1aa   : > { %v1107_v44 = vmul.f32 %v1011_v57, %v1011_v57  ;;  %v1207_v41 = vadd.f32 %v1206_v46, %v1104_v60  ;;  %v1152_v2 = vmul.f32 %v1056_v59, %v1056_v59  ;;  %v1153_v11 = vmul.f32 %v1057_v23, %v1057_v23 }
 0x1ab   : > { %1300 = vadd.xlane.f32.xlu0 %v1299_v43  ;;  %1296 = vadd.xlane.f32.xlu1 %v1295_v8  ;;  %v1058_v3 = vsub.f32 %v3182_v10, %v3521_v50  ;;  %v1059_v7 = vsub.f32 %v3186_v12, %v3521_v50  ;;  %v1012_v58 = vsub.f32 %v3188_v13, %v3523_v39  ;;  %v4990_v12 = vld [vmem:[#allocation55_spill] sm:$0xff] }
 0x1ac   : > { %v880_v4 = vpop.xlane.xlu1 %879  ;;  %v788_v33 = vpop.xlane.xlu0 %787  ;;  %v1210_v30 = vsel %vm760_vm0, %v1107_v44, 0.0  ;;  %v1302_v61 = vsel %vm760_vm0, %v1153_v11, 0.0  ;;  %v1013_v60 = vsub.f32 %v3197_v18, %v3523_v39 }
 0x1ad   : > { %v3535_v57 = vmul.f32 0.0051020407, %v880_v4  ;;  %v3537_v8 = vmul.f32 0.0051020407, %v788_v33  ;;  %v1211_v59 = vadd.f32 %v1210_v30, %v1106_v42  ;;  %v1154_v23 = vmul.f32 %v1058_v3, %v1058_v3 }
 0x1ae   : > { %v1155_v45 = vmul.f32 %v1059_v7, %v1059_v7  ;;  %v1303_v46 = vadd.f32 %v1302_v61, %v1152_v2  ;;  %v1108_v43 = vmul.f32 %v1012_v58, %v1012_v58  ;;  %v1109_v63 = vmul.f32 %v1013_v60, %v1013_v60 }
 0x1af   : > { %1212 = vadd.xlane.f32.xlu0 %v1211_v59  ;;  %1208 = vadd.xlane.f32.xlu1 %v1207_v41  ;;  %v1014_v44 = vsub.f32 %v3208_v25, %v3537_v8  ;;  %v1015_v11 = vsub.f32 %v3212_v27, %v3537_v8  ;;  %v1060_v4 = vsub.f32 %v3192_v15, %v3535_v57  ;;  %v4988_v27 = vld [vmem:[#allocation58_spill] sm:$0xff] }
 0x1b0   : > { %v884_v18 = vpop.xlane.xlu0 %883  ;;  %v792_v33 = vpop.xlane.xlu1 %791  ;;  %v1306_v42 = vsel %vm760_vm0, %v1155_v45, 0.0  ;;  %v1214_v3 = vsel %vm760_vm0, %v1109_v63, 0.0  ;;  %v1061_v2 = vsub.f32 %v3199_v19, %v3535_v57 }
 0x1b1   : > { %v3549_v7 = vmul.f32 0.0051020407, %v884_v18  ;;  %v3551_v41 = vmul.f32 0.0051020407, %v792_v33  ;;  %v1307_v58 = vadd.f32 %v1306_v42, %v1154_v23  ;;  %v1110_v30 = vmul.f32 %v1014_v44, %v1014_v44 }
 0x1b2   : > { %v1111_v61 = vmul.f32 %v1015_v11, %v1015_v11  ;;  %v1215_v60 = vadd.f32 %v1214_v3, %v1108_v43  ;;  %v1156_v59 = vmul.f32 %v1060_v4, %v1060_v4  ;;  %v1157_v13 = vmul.f32 %v1061_v2, %v1061_v2 }
 0x1b3   : > { %1308 = vadd.xlane.f32.xlu0 %v1307_v58  ;;  %1304 = vadd.xlane.f32.xlu1 %v1303_v46  ;;  %v1062_v45 = vsub.f32 %v3210_v26, %v3549_v7  ;;  %v1063_v63 = vsub.f32 %v3214_v28, %v3549_v7  ;;  %v1016_v18 = vsub.f32 %v3216_v29, %v3551_v41 }
 0x1b4   : > { %v888_v19 = vpop.xlane.xlu1 %887  ;;  %v796_v33 = vpop.xlane.xlu0 %795  ;;  %v1218_v23 = vsel %vm760_vm0, %v1111_v61, 0.0  ;;  %v1310_v44 = vsel %vm760_vm0, %v1157_v13, 0.0  ;;  %v1017_v43 = vsub.f32 %v3225_v34, %v3551_v41 }
 0x1b5   : > { %v3563_v11 = vmul.f32 0.0051020407, %v888_v19  ;;  %v3565_v46 = vmul.f32 0.0051020407, %v796_v33  ;;  %v1219_v4 = vadd.f32 %v1218_v23, %v1110_v30  ;;  %v1158_v42 = vmul.f32 %v1062_v45, %v1062_v45 }
 0x1b6   : > { %v1159_v3 = vmul.f32 %v1063_v63, %v1063_v63  ;;  %v1311_v2 = vadd.f32 %v1310_v44, %v1156_v59  ;;  %v1112_v58 = vmul.f32 %v1016_v18, %v1016_v18  ;;  %v1113_v15 = vmul.f32 %v1017_v43, %v1017_v43 }
 0x1b7   : > { %1220 = vadd.xlane.f32.xlu0 %v1219_v4  ;;  %1216 = vadd.xlane.f32.xlu1 %v1215_v60  ;;  %v1018_v61 = vsub.f32 %v3236_v47, %v3565_v46  ;;  %v1019_v13 = vsub.f32 %v3240_v51, %v3565_v46  ;;  %v1064_v19 = vsub.f32 %v3220_v31, %v3563_v11  ;;  %v4986_v51 = vld [vmem:[#allocation54_spill] sm:$0xff] }
 0x1b8   : > { %v892_v34 = vpop.xlane.xlu0 %891  ;;  %v800_v33 = vpop.xlane.xlu1 %799  ;;  %v1314_v30 = vsel %vm760_vm0, %v1159_v3, 0.0  ;;  %v1222_v45 = vsel %vm760_vm0, %v1113_v15, 0.0  ;;  %v1065_v59 = vsub.f32 %v3227_v35, %v3563_v11 }
 0x1b9   : > { %v3577_v63 = vmul.f32 0.0051020407, %v892_v34  ;;  %v3579_v60 = vmul.f32 0.0051020407, %v800_v33  ;;  %v1315_v18 = vadd.f32 %v1314_v30, %v1158_v42  ;;  %v1114_v23 = vmul.f32 %v1018_v61, %v1018_v61 }
 0x1ba   : > { %v1115_v44 = vmul.f32 %v1019_v13, %v1019_v13  ;;  %v1223_v43 = vadd.f32 %v1222_v45, %v1112_v58  ;;  %v1160_v4 = vmul.f32 %v1064_v19, %v1064_v19  ;;  %v1161_v29 = vmul.f32 %v1065_v59, %v1065_v59 }
 0x1bb   : > { %1316 = vadd.xlane.f32.xlu0 %v1315_v18  ;;  %1312 = vadd.xlane.f32.xlu1 %v1311_v2  ;;  %v1066_v3 = vsub.f32 %v3238_v48, %v3577_v63  ;;  %v1067_v15 = vsub.f32 %v3242_v52, %v3577_v63  ;;  %v1020_v34 = vsub.f32 %v3244_v53, %v3579_v60  ;;  %v4984_v52 = vld [vmem:[#allocation51_spill] sm:$0xff] }
 0x1bc   : > { %v896_v35 = vpop.xlane.xlu1 %895  ;;  %v804_v33 = vpop.xlane.xlu0 %803  ;;  %v1226_v42 = vsel %vm760_vm0, %v1115_v44, 0.0  ;;  %v1318_v61 = vsel %vm760_vm0, %v1161_v29, 0.0  ;;  %v1021_v58 = vsub.f32 %v3253_v0, %v3579_v60 }
 0x1bd   : > { %v3591_v13 = vmul.f32 0.0051020407, %v896_v35  ;;  %v3593_v2 = vmul.f32 0.0051020407, %v804_v33  ;;  %v1227_v19 = vadd.f32 %v1226_v42, %v1114_v23  ;;  %v1162_v30 = vmul.f32 %v1066_v3, %v1066_v3 }
 0x1be   : > { %v1163_v45 = vmul.f32 %v1067_v15, %v1067_v15  ;;  %v1319_v59 = vadd.f32 %v1318_v61, %v1160_v4  ;;  %v1116_v18 = vmul.f32 %v1020_v34, %v1020_v34  ;;  %v1117_v31 = vmul.f32 %v1021_v58, %v1021_v58 }
 0x1bf   : > { %1228 = vadd.xlane.f32.xlu0 %v1227_v19  ;;  %1224 = vadd.xlane.f32.xlu1 %v1223_v43  ;;  %v1022_v44 = vsub.f32 %v3264_v14, %v3593_v2  ;;  %v1023_v29 = vsub.f32 %v3268_v17, %v3593_v2  ;;  %v1068_v35 = vsub.f32 %v3248_v55, %v3591_v13 }
 0x1c0   : > { %v900_v0 = vpop.xlane.xlu0 %899  ;;  %v808_v33 = vpop.xlane.xlu1 %807  ;;  %v1322_v23 = vsel %vm760_vm0, %v1163_v45, 0.0  ;;  %v1230_v3 = vsel %vm760_vm0, %v1117_v31, 0.0  ;;  %v1069_v4 = vsub.f32 %v3255_v1, %v3591_v13 }
 0x1c1   : > { %v3605_v15 = vmul.f32 0.0051020407, %v900_v0  ;;  %v3607_v43 = vmul.f32 0.0051020407, %v808_v33  ;;  %v1323_v34 = vadd.f32 %v1322_v23, %v1162_v30  ;;  %v1118_v42 = vmul.f32 %v1022_v44, %v1022_v44 }
 0x1c2   : > { %v1119_v61 = vmul.f32 %v1023_v29, %v1023_v29  ;;  %v1231_v58 = vadd.f32 %v1230_v3, %v1116_v18  ;;  %v1164_v19 = vmul.f32 %v1068_v35, %v1068_v35  ;;  %v1165_v53 = vmul.f32 %v1069_v4, %v1069_v4 }
 0x1c3   : > { %1324 = vadd.xlane.f32.xlu0 %v1323_v34  ;;  %1320 = vadd.xlane.f32.xlu1 %v1319_v59  ;;  %v1070_v45 = vsub.f32 %v3266_v16, %v3605_v15  ;;  %v1071_v31 = vsub.f32 %v3270_v20, %v3605_v15  ;;  %v1024_v0 = vsub.f32 %v3272_v21, %v3607_v43  ;;  %v4982_v20 = vld [vmem:[#allocation47_spill] sm:$0xff] }
 0x1c4   : > { %v904_v1 = vpop.xlane.xlu1 %903  ;;  %v812_v33 = vpop.xlane.xlu0 %811  ;;  %v1234_v30 = vsel %vm760_vm0, %v1119_v61, 0.0  ;;  %v1326_v44 = vsel %vm760_vm0, %v1165_v53, 0.0  ;;  %v1025_v18 = vsub.f32 %v3281_v32, %v3607_v43 }
 0x1c5   : > { %v3619_v29 = vmul.f32 0.0051020407, %v904_v1  ;;  %v3621_v59 = vmul.f32 0.0051020407, %v812_v33  ;;  %v1235_v35 = vadd.f32 %v1234_v30, %v1118_v42  ;;  %v1166_v23 = vmul.f32 %v1070_v45, %v1070_v45 }
 0x1c6   : > { %v1167_v3 = vmul.f32 %v1071_v31, %v1071_v31  ;;  %v1327_v4 = vadd.f32 %v1326_v44, %v1164_v19  ;;  %v1120_v34 = vmul.f32 %v1024_v0, %v1024_v0  ;;  %v1121_v55 = vmul.f32 %v1025_v18, %v1025_v18  ;;  %v4983_v19 = vld [vmem:[#allocation49_spill] sm:$0xff] }
 0x1c7   : > { %1236 = vadd.xlane.f32.xlu0 %v1235_v35  ;;  %1232 = vadd.xlane.f32.xlu1 %v1231_v58  ;;  %v1026_v61 = vsub.f32 %v3292_v54, %v3621_v59  ;;  %v1027_v53 = vsub.f32 %v3296_v62, %v3621_v59  ;;  %v1072_v1 = vsub.f32 %v4982_v20, %v3619_v29 }
 0x1c8   : > { %v908_v16 = vpop.xlane.xlu0 %907  ;;  %v816_v33 = vpop.xlane.xlu1 %815  ;;  %v1330_v42 = vsel %vm760_vm0, %v1167_v3, 0.0  ;;  %v1238_v45 = vsel %vm760_vm0, %v1121_v55, 0.0  ;;  %v1073_v31 = vsub.f32 %v4983_v19, %v3619_v29  ;;  %v4985_v55 = vld [vmem:[#allocation53_spill] sm:$0xff] }
 0x1c9   : > { %v3633_v0 = vmul.f32 0.0051020407, %v908_v16  ;;  %v3635_v58 = vmul.f32 0.0051020407, %v816_v33  ;;  %v1331_v30 = vadd.f32 %v1330_v42, %v1166_v23  ;;  %v1122_v44 = vmul.f32 %v1026_v61, %v1026_v61 }
 0x1ca   : > { %v1123_v18 = vmul.f32 %v1027_v53, %v1027_v53  ;;  %v1239_v35 = vadd.f32 %v1238_v45, %v1120_v34  ;;  %v1168_v17 = vmul.f32 %v1072_v1, %v1072_v1  ;;  %v1169_v14 = vmul.f32 %v1073_v31, %v1073_v31  ;;  %v4987_v34 = vld [vmem:[#allocation56_spill] sm:$0xff] }
 0x1cb   : > { %1332 = vadd.xlane.f32.xlu0 %v1331_v30  ;;  %1328 = vadd.xlane.f32.xlu1 %v1327_v4  ;;  %v1074_v3 = vsub.f32 %v4984_v52, %v3633_v0  ;;  %v1075_v48 = vsub.f32 %v4985_v55, %v3633_v0  ;;  %v1028_v16 = vsub.f32 %v4986_v51, %v3635_v58  ;;  %v4994_v55 = vld [vmem:[#allocation62_spill] sm:$0xff] }
 0x1cc   : > { %v912_v47 = vpop.xlane.xlu1 %911  ;;  %v820_v33 = vpop.xlane.xlu0 %819  ;;  %v1242_v23 = vsel %vm760_vm0, %v1123_v18, 0.0  ;;  %v1334_v61 = vsel %vm760_vm0, %v1169_v14, 0.0  ;;  %v1029_v53 = vsub.f32 %v4987_v34, %v3635_v58  ;;  %v4989_v14 = vld [vmem:[#allocation60_spill] sm:$0xff] }
 0x1cd   : > { %v3647_v1 = vmul.f32 0.0051020407, %v912_v47  ;;  %v3649_v4 = vmul.f32 0.0051020407, %v820_v33  ;;  %v1243_v42 = vadd.f32 %v1242_v23, %v1122_v44  ;;  %v1170_v45 = vmul.f32 %v1074_v3, %v1074_v3 }
 0x1ce   : > { %v1171_v31 = vmul.f32 %v1075_v48, %v1075_v48  ;;  %v1335_v30 = vadd.f32 %v1334_v61, %v1168_v17  ;;  %v1124_v28 = vmul.f32 %v1028_v16, %v1028_v16  ;;  %v1125_v26 = vmul.f32 %v1029_v53, %v1029_v53  ;;  %v4991_v17 = vld [vmem:[#allocation57_spill] sm:$0xff] }
 0x1cf   : > { %1244 = vadd.xlane.f32.xlu0 %v1243_v42  ;;  %1240 = vadd.xlane.f32.xlu1 %v1239_v35  ;;  %v1030_v18 = vsub.f32 %v4988_v27, %v3649_v4  ;;  %v1031_v25 = vsub.f32 %v4989_v14, %v3649_v4  ;;  %v1076_v47 = vsub.f32 %v4990_v12, %v3647_v1  ;;  %v4992_v14 = vld [vmem:[#allocation59_spill] sm:$0xff] }
 0x1d0   : > { %v916_v10 = vpop.xlane.xlu0 %915  ;;  %v824_v33 = vpop.xlane.xlu1 %823  ;;  %v1338_v44 = vsel %vm760_vm0, %v1171_v31, 0.0  ;;  %v1246_v48 = vsel %vm760_vm0, %v1125_v26, 0.0  ;;  %v1077_v3 = vsub.f32 %v4991_v17, %v3647_v1  ;;  %v4993_v26 = vld [vmem:[#allocation61_spill] sm:$0xff] }
 0x1d1   : > { %v3661_v16 = vmul.f32 0.0051020407, %v916_v10  ;;  %v3663_v35 = vmul.f32 0.0051020407, %v824_v33  ;;  %v1339_v23 = vadd.f32 %v1338_v44, %v1170_v45  ;;  %v1126_v61 = vmul.f32 %v1030_v18, %v1030_v18 }
 0x1d2   : > { %v1127_v53 = vmul.f32 %v1031_v25, %v1031_v25  ;;  %v1247_v42 = vadd.f32 %v1246_v48, %v1124_v28  ;;  %v1172_v9 = vmul.f32 %v1076_v47, %v1076_v47  ;;  %v1173_v49 = vmul.f32 %v1077_v3, %v1077_v3  ;;  %v4995_v28 = vld [vmem:[#allocation64_spill] sm:$0xff] }
 0x1d3   : > { %1340 = vadd.xlane.f32.xlu0 %v1339_v23  ;;  %1336 = vadd.xlane.f32.xlu1 %v1335_v30  ;;  %v1078_v31 = vsub.f32 %v4992_v14, %v3661_v16  ;;  %v1079_v27 = vsub.f32 %v4993_v26, %v3661_v16  ;;  %v1032_v10 = vsub.f32 %v4994_v55, %v3663_v35  ;;  %v4996_v55 = vld [vmem:[#allocation66_spill] sm:$0xff] }
 0x1d4   : > { %v920_v52 = vpop.xlane.xlu1 %919  ;;  %v828_v33 = vpop.xlane.xlu0 %827  ;;  %v1250_v45 = vsel %vm760_vm0, %v1127_v53, 0.0  ;;  %v1342_v25 = vsel %vm760_vm0, %v1173_v49, 0.0  ;;  %v1033_v18 = vsub.f32 %v4995_v28, %v3663_v35  ;;  %v4997_v49 = vld [vmem:[#allocation68_spill] sm:$0xff]  ;;  %v4998_v28 = vld [vmem:[#allocation63_spill] sm:$0xff] }
 0x1d5   : > { %v3675_v47 = vmul.f32 0.0051020407, %v920_v52  ;;  %v3677_v30 = vmul.f32 0.0051020407, %v828_v33  ;;  %v1251_v44 = vadd.f32 %v1250_v45, %v1126_v61  ;;  %v1174_v48 = vmul.f32 %v1078_v31, %v1078_v31 }
 0x1d6   : > { %v1175_v3 = vmul.f32 %v1079_v27, %v1079_v27  ;;  %v1343_v23 = vadd.f32 %v1342_v25, %v1172_v9  ;;  %v1128_v26 = vmul.f32 %v1032_v10, %v1032_v10  ;;  %v1129_v14 = vmul.f32 %v1033_v18, %v1033_v18  ;;  %v4999_v9 = vld [vmem:[#allocation65_spill] sm:$0xff] }
 0x1d7   : > { %1252 = vadd.xlane.f32.xlu0 %v1251_v44  ;;  %1248 = vadd.xlane.f32.xlu1 %v1247_v42  ;;  %v1034_v53 = vsub.f32 %v4996_v55, %v3677_v30  ;;  %v1035_v17 = vsub.f32 %v4997_v49, %v3677_v30  ;;  %v1080_v52 = vsub.f32 %v4998_v28, %v3675_v47  ;;  %v5000_v28 = vld [vmem:[#allocation67_spill] sm:$0xff] }
 0x1d8   : > { %v924_v12 = vpop.xlane.xlu0 %923  ;;  %v832_v33 = vpop.xlane.xlu1 %831  ;;  %v1346_v61 = vsel %vm760_vm0, %v1175_v3, 0.0  ;;  %v1254_v27 = vsel %vm760_vm0, %v1129_v14, 0.0  ;;  %v1081_v31 = vsub.f32 %v4999_v9, %v3675_v47  ;;  %v5001_v14 = vld [vmem:[#allocation69_spill] sm:$0xff]  ;;  %v5002_v9 = vld [vmem:[#allocation70_spill] sm:$0xff] }
 0x1d9   : > { %v3689_v10 = vmul.f32 0.0051020407, %v924_v12  ;;  %v3691_v42 = vmul.f32 0.0051020407, %v832_v33  ;;  %v1347_v45 = vadd.f32 %v1346_v61, %v1174_v48  ;;  %v1130_v25 = vmul.f32 %v1034_v53, %v1034_v53 }
 0x1da   : > { %v1131_v18 = vmul.f32 %v1035_v17, %v1035_v17  ;;  %v1255_v44 = vadd.f32 %v1254_v27, %v1128_v26  ;;  %v1176_v49 = vmul.f32 %v1080_v52, %v1080_v52  ;;  %v1177_v55 = vmul.f32 %v1081_v31, %v1081_v31  ;;  %v5003_v26 = vld [vmem:[#allocation72_spill] sm:$0xff] }
 0x1db   : > { %1348 = vadd.xlane.f32.xlu0 %v1347_v45  ;;  %1344 = vadd.xlane.f32.xlu1 %v1343_v23  ;;  %v1082_v3 = vsub.f32 %v5000_v28, %v3689_v10  ;;  %v1083_v62 = vsub.f32 %v5001_v14, %v3689_v10  ;;  %v1036_v12 = vsub.f32 %v5002_v9, %v3691_v42  ;;  %v5004_v9 = vld [vmem:[#allocation74_spill] sm:$0xff] }
 0x1dc   : > { %v928_v54 = vpop.xlane.xlu1 %927  ;;  %v836_v33 = vpop.xlane.xlu0 %835  ;;  %v1258_v48 = vsel %vm760_vm0, %v1131_v18, 0.0  ;;  %v1350_v17 = vsel %vm760_vm0, %v1177_v55, 0.0  ;;  %v1037_v53 = vsub.f32 %v5003_v26, %v3691_v42  ;;  %v5005_v55 = vld [vmem:[#allocation76_spill] sm:$0xff]  ;;  %v5006_v26 = vld [vmem:[#allocation71_spill] sm:$0xff] }
 0x1dd   : > { %v3703_v52 = vmul.f32 0.0051020407, %v928_v54  ;;  %v3705_v23 = vmul.f32 0.0051020407, %v836_v33  ;;  %v1259_v61 = vadd.f32 %v1258_v48, %v1130_v25  ;;  %v1178_v27 = vmul.f32 %v1082_v3, %v1082_v3 }
 0x1de   : > { %v1179_v31 = vmul.f32 %v1083_v62, %v1083_v62  ;;  %v1351_v45 = vadd.f32 %v1350_v17, %v1176_v49  ;;  %v1132_v14 = vmul.f32 %v1036_v12, %v1036_v12  ;;  %v1133_v28 = vmul.f32 %v1037_v53, %v1037_v53  ;;  %v5007_v49 = vld [vmem:[#allocation73_spill] sm:$0xff] }
 0x1df   : > { %1260 = vadd.xlane.f32.xlu0 %v1259_v61  ;;  %1256 = vadd.xlane.f32.xlu1 %v1255_v44  ;;  %v1038_v18 = vsub.f32 %v5004_v9, %v3705_v23  ;;  %v1039_v34 = vsub.f32 %v5005_v55, %v3705_v23  ;;  %v1084_v54 = vsub.f32 %v5006_v26, %v3703_v52  ;;  %v5009_v26 = vld [vmem:[#allocation75_spill] sm:$0xff] }
 0x1e0   : > { %v932_v51 = vpop.xlane.xlu0 %931  ;;  %v840_v33 = vpop.xlane.xlu1 %839  ;;  %v1354_v25 = vsel %vm760_vm0, %v1179_v31, 0.0  ;;  %v1262_v62 = vsel %vm760_vm0, %v1133_v28, 0.0  ;;  %v1085_v3 = vsub.f32 %v5007_v49, %v3703_v52  ;;  %v5010_v28 = vld [vmem:[#allocation77_spill] sm:$0xff]  ;;  %v5011_v49 = vld [vmem:[#allocation78_spill] sm:$0xff] }
 0x1e1   : > { %v3717_v12 = vmul.f32 0.0051020407, %v932_v51  ;;  %v3719_v44 = vmul.f32 0.0051020407, %v840_v33  ;;  %v1355_v48 = vadd.f32 %v1354_v25, %v1178_v27  ;;  %v1134_v17 = vmul.f32 %v1038_v18, %v1038_v18 }
 0x1e2   : > { %v1135_v53 = vmul.f32 %v1039_v34, %v1039_v34  ;;  %v1263_v61 = vadd.f32 %v1262_v62, %v1132_v14  ;;  %v1180_v55 = vmul.f32 %v1084_v54, %v1084_v54  ;;  %v1181_v9 = vmul.f32 %v1085_v3, %v1085_v3  ;;  %v5012_v14 = vld [vmem:[#allocation80_spill] sm:$0xff] }
 0x1e3   : > { %5008 = vst [vmem:[#allocation99_spill] sm:$0xff] %v3719_v44  ;;  %1356 = vadd.xlane.f32.xlu0 %v1355_v48  ;;  %1352 = vadd.xlane.f32.xlu1 %v1351_v45  ;;  %v1086_v31 = vsub.f32 %v5009_v26, %v3717_v12  ;;  %v1087_v19 = vsub.f32 %v5010_v28, %v3717_v12 }
 0x1e4   : > { %v1040_v51 = vsub.f32 %v5011_v49, %v3719_v44  ;;  %v936_v20 = vpop.xlane.xlu1 %935  ;;  %v844_v33 = vpop.xlane.xlu0 %843  ;;  %v1266_v27 = vsel %vm760_vm0, %v1135_v53, 0.0  ;;  %v1358_v34 = vsel %vm760_vm0, %v1181_v9, 0.0  ;;  %v1041_v18 = vsub.f32 %v5012_v14, %v3719_v44  ;;  %v5014_v49 = vld [vmem:[#allocation82_spill] sm:$0xff]  ;;  %v5015_v9 = vld [vmem:[#allocation84_spill] sm:$0xff]  ;;  %v5016_v14 = vld [vmem:[#allocation79_spill] sm:$0xff] }
 0x1e5   : > { %v3731_v54 = vmul.f32 0.0051020407, %v936_v20  ;;  %v3733_v45 = vmul.f32 0.0051020407, %v844_v33  ;;  %v1267_v25 = vadd.f32 %v1266_v27, %v1134_v17  ;;  %v1182_v62 = vmul.f32 %v1086_v31, %v1086_v31 }
 0x1e6   : > { %v1183_v3 = vmul.f32 %v1087_v19, %v1087_v19  ;;  %v1359_v48 = vadd.f32 %v1358_v34, %v1180_v55  ;;  %v1136_v28 = vmul.f32 %v1040_v51, %v1040_v51  ;;  %v1137_v26 = vmul.f32 %v1041_v18, %v1041_v18  ;;  %v5017_v55 = vld [vmem:[#allocation81_spill] sm:$0xff] }
 0x1e7   : > { %5013 = vst [vmem:[#allocation100_spill] sm:$0xff] %v3731_v54  ;;  %1268 = vadd.xlane.f32.xlu0 %v1267_v25  ;;  %1264 = vadd.xlane.f32.xlu1 %v1263_v61  ;;  %v1042_v53 = vsub.f32 %v5014_v49, %v3733_v45  ;;  %v1043_v32 = vsub.f32 %v5015_v9, %v3733_v45 }
 0x1e8   : > { %v1088_v20 = vsub.f32 %v5016_v14, %v3731_v54  ;;  %v940_v21 = vpop.xlane.xlu0 %939  ;;  %v848_v33 = vpop.xlane.xlu1 %847  ;;  %v1362_v17 = vsel %vm760_vm0, %v1183_v3, 0.0  ;;  %v1270_v19 = vsel %vm760_vm0, %v1137_v26, 0.0  ;;  %v1089_v31 = vsub.f32 %v5017_v55, %v3731_v54  ;;  %v5020_v14 = vld [vmem:[#allocation83_spill] sm:$0xff]  ;;  %v5021_v26 = vld [vmem:[#allocation85_spill] sm:$0xff]  ;;  %v5022_v55 = vld [vmem:[#allocation86_spill] sm:$0xff] }
 0x1e9   : > { %v3745_v51 = vmul.f32 0.0051020407, %v940_v21  ;;  %v3747_v61 = vmul.f32 0.0051020407, %v848_v33  ;;  %v1363_v27 = vadd.f32 %v1362_v17, %v1182_v62  ;;  %v1138_v34 = vmul.f32 %v1042_v53, %v1042_v53 }
 0x1ea   : > { %v1139_v18 = vmul.f32 %v1043_v32, %v1043_v32  ;;  %v1271_v25 = vadd.f32 %v1270_v19, %v1136_v28  ;;  %v1184_v9 = vmul.f32 %v1088_v20, %v1088_v20  ;;  %v1185_v49 = vmul.f32 %v1089_v31, %v1089_v31  ;;  %v5023_v28 = vld [vmem:[#allocation88_spill] sm:$0xff] }
 0x1eb   : > { %5018 = vst [vmem:[#allocation101_spill] sm:$0xff] %v3745_v51  ;;  %5019 = vst [vmem:[#allocation102_spill] sm:$0xff] %v3747_v61  ;;  %1364 = vadd.xlane.f32.xlu0 %v1363_v27  ;;  %1360 = vadd.xlane.f32.xlu1 %v1359_v48  ;;  %v1090_v3 = vsub.f32 %v5020_v14, %v3745_v51  ;;  %v1091_v44 = vsub.f32 %v5021_v26, %v3745_v51 }
 0x1ec   : > { %v1044_v21 = vsub.f32 %v5022_v55, %v3747_v61  ;;  %v944_v54 = vpop.xlane.xlu1 %943  ;;  %v852_v33 = vpop.xlane.xlu0 %851  ;;  %v1274_v62 = vsel %vm760_vm0, %v1139_v18, 0.0  ;;  %v1366_v32 = vsel %vm760_vm0, %v1185_v49, 0.0  ;;  %v1045_v53 = vsub.f32 %v5023_v28, %v3747_v61  ;;  %v5025_v55 = vld [vmem:[#allocation90_spill] sm:$0xff]  ;;  %v5026_v49 = vld [vmem:[#allocation92_spill] sm:$0xff]  ;;  %v5027_v28 = vld [vmem:[#allocation87_spill] sm:$0xff] }
 0x1ed   : > { %v3759_v20 = vmul.f32 0.0051020407, %v944_v54  ;;  %v3761_v48 = vmul.f32 0.0051020407, %v852_v33  ;;  %v1275_v17 = vadd.f32 %v1274_v62, %v1138_v34  ;;  %v1186_v19 = vmul.f32 %v1090_v3, %v1090_v3 }
 0x1ee   : > { %v1187_v31 = vmul.f32 %v1091_v44, %v1091_v44  ;;  %v1367_v27 = vadd.f32 %v1366_v32, %v1184_v9  ;;  %v1140_v26 = vmul.f32 %v1044_v21, %v1044_v21  ;;  %v1141_v14 = vmul.f32 %v1045_v53, %v1045_v53  ;;  %v5028_v9 = vld [vmem:[#allocation89_spill] sm:$0xff] }
 0x1ef   : > { %5024 = vst [vmem:[#allocation103_spill] sm:$0xff] %v3759_v20  ;;  %1276 = vadd.xlane.f32.xlu0 %v1275_v17  ;;  %1272 = vadd.xlane.f32.xlu1 %v1271_v25  ;;  %v1046_v18 = vsub.f32 %v5025_v55, %v3761_v48  ;;  %v1047_v51 = vsub.f32 %v5026_v49, %v3761_v48 }
 0x1f0   : > { %v1092_v54 = vsub.f32 %v5027_v28, %v3759_v20  ;;  %v948_v61 = vpop.xlane.xlu0 %947  ;;  %v856_v33 = vpop.xlane.xlu1 %855  ;;  %v1370_v34 = vsel %vm760_vm0, %v1187_v31, 0.0  ;;  %v1278_v44 = vsel %vm760_vm0, %v1141_v14, 0.0  ;;  %v1093_v3 = vsub.f32 %v5028_v9, %v3759_v20  ;;  %v5030_v14 = vld [vmem:[#allocation93_spill] sm:$0xff]  ;;  %v5031_v9 = vld [vmem:[#allocation94_spill] sm:$0xff] }
 0x1f1   : > { %v3773_v21 = vmul.f32 0.0051020407, %v948_v61  ;;  %v3775_v25 = vmul.f32 0.0051020407, %v856_v33  ;;  %v1371_v62 = vadd.f32 %v1370_v34, %v1186_v19  ;;  %v1142_v32 = vmul.f32 %v1046_v18, %v1046_v18 }
 0x1f2   : > { %v1143_v53 = vmul.f32 %v1047_v51, %v1047_v51  ;;  %v1279_v17 = vadd.f32 %v1278_v44, %v1140_v26  ;;  %v1188_v49 = vmul.f32 %v1092_v54, %v1092_v54  ;;  %v1189_v55 = vmul.f32 %v1093_v3, %v1093_v3  ;;  %v5032_v51 = vld [vmem:[#allocation96_spill] sm:$0xff] }
 0x1f3   : > { %5029 = vst [vmem:[#allocation104_spill] sm:$0xff] %v3773_v21  ;;  %1372 = vadd.xlane.f32.xlu0 %v1371_v62  ;;  %1368 = vadd.xlane.f32.xlu1 %v1367_v27  ;;  %v1094_v31 = vsub.f32 %v3434_v37, %v3773_v21  ;;  %v1095_v28 = vsub.f32 %v5030_v14, %v3773_v21  ;;  %v5033_v37 = vld [vmem:[#allocation95_spill] sm:$0xff] }
 0x1f4   : > { %v1048_v61 = vsub.f32 %v5031_v9, %v3775_v25  ;;  %v952_v20 = vpop.xlane.xlu1 %951  ;;  %v1282_v33 = vsel %vm760_vm0, %v1143_v53, 0.0  ;;  %v1374_v19 = vsel %vm760_vm0, %v1189_v55, 0.0  ;;  %v1049_v26 = vsub.f32 %v5032_v51, %v3775_v25  ;;  %v5034_v55 = vld [vmem:[#allocation97_spill] sm:$0xff] }
 0x1f5   : > { %v3787_v18 = vmul.f32 0.0051020407, %v952_v20  ;;  %v1283_v27 = vadd.f32 %v1282_v33, %v1142_v32  ;;  %v1190_v54 = vmul.f32 %v1094_v31, %v1094_v31  ;;  %v1191_v34 = vmul.f32 %v1095_v28, %v1095_v28 }
 0x1f6   : > { %v1375_v44 = vadd.f32 %v1374_v19, %v1188_v49  ;;  %v1144_v3 = vmul.f32 %v1048_v61, %v1048_v61  ;;  %v1145_v62 = vmul.f32 %v1049_v26, %v1049_v26 }
 0x1f7   : > { %1284 = vadd.xlane.f32.xlu0 %v1283_v27  ;;  %1280 = vadd.xlane.f32.xlu1 %v1279_v17  ;;  %v1378_v14 = vsel %vm760_vm0, %v1191_v34, 0.0  ;;  %v1096_v53 = vsub.f32 %v5033_v37, %v3787_v18  ;;  %v1097_v9 = vsub.f32 %v5034_v55, %v3787_v18  ;;  %v3849_v37 = vld [vmem:[%s3800_s29 + $0xe0] sm:$0xff] }
 0x1f8   : > { %v1379_v21 = vadd.f32 %v1378_v14, %v1190_v54  ;;  %v1286_v20 = vsel %vm760_vm0, %v1145_v62, 0.0 }
 0x1f9   : > { %v1287_v51 = vadd.f32 %v1286_v20, %v1144_v3  ;;  %v1192_v32 = vmul.f32 %v1096_v53, %v1096_v53  ;;  %v1193_v28 = vmul.f32 %v1097_v9, %v1097_v9 }
 0x1fb   : > { %1380 = vadd.xlane.f32.xlu0 %v1379_v21  ;;  %1376 = vadd.xlane.f32.xlu1 %v1375_v44  ;;  %v1382_v49 = vsel %vm760_vm0, %v1193_v28, 0.0  ;;  %v3803_v44 = vld [vmem:[%s3800_s29] sm:$0xff] }
 0x1fc   : > { %v1383_v17 = vadd.f32 %v1382_v49, %v1192_v32 }
 0x1ff   : > { %1288 = vadd.xlane.f32.xlu1 %v1287_v51 }
 0x203   : > { %1384 = vadd.xlane.f32.xlu1 %v1383_v17 }
 0x22b   : > { %v1197_v31 = vpop.xlane.xlu0 %1196 }
 0x22c   : > { %v1386_v61 = vmul.f32 0.0051020407, %v1197_v31 }
 0x22e   : > { %v1434_v33 = vadd.f32 1e-05, %v1386_v61  ;;  %v3807_v61 = vld [vmem:[%s3800_s29 + $0xc0] sm:$0xff] }
 0x22f   : > { %v1293_v19 = vpop.xlane.xlu0 %1292 }
 0x230   : > { %2883 = vrsqrt.f32 %v1434_v33  ;;  %v1410_v26 = vmul.f32 0.0051020407, %v1293_v19 }
 0x232   : > { %v1458_v14 = vadd.f32 1e-05, %v1410_v26 }
 0x233   : > { %v1205_v27 = vpop.xlane.xlu0 %1204 }
 0x234   : > { %2885 = vrsqrt.f32 %v1458_v14  ;;  %v1201_v54 = vpop.xlane.xlu1 %1200  ;;  %v1388_v20 = vmul.f32 0.0051020407, %v1205_v27 }
 0x235   : > { %v1387_v34 = vmul.f32 0.0051020407, %v1201_v54  ;;  %v5035_v54 = vld [vmem:[#allocation98_spill] sm:$0xff] }
 0x236   : > { %v1436_v26 = vadd.f32 1e-05, %v1388_v20 }
 0x237   : > { %v1435_v9 = vadd.f32 1e-05, %v1387_v34 }
 0x238   : > { %v1301_v21 = vpop.xlane.xlu0 %1300  ;;  %v1297_v51 = vpop.xlane.xlu1 %1296 }
 0x239   : > { %2887 = vrsqrt.f32 %v1435_v9  ;;  %v1412_v3 = vmul.f32 0.0051020407, %v1301_v21  ;;  %v1411_v62 = vmul.f32 0.0051020407, %v1297_v51 }
 0x23a   : > { %v2884_v53 = vpop.eup %2883 }
 0x23b   : > { %v1460_v32 = vadd.f32 1e-05, %v1412_v3  ;;  %v1459_v28 = vadd.f32 1e-05, %v1411_v62  ;;  %v1578_v49 = vmul.f32 %v2884_v53, %v3803_v44  ;;  %v3813_v62 = vld [vmem:[%s3800_s29 + $0x8] sm:$0xff] }
 0x23c   : > { %v1213_v17 = vpop.xlane.xlu0 %1212  ;;  %v1209_v31 = vpop.xlane.xlu1 %1208 }
 0x23d   : > { %2889 = vrsqrt.f32 %v1460_v32  ;;  %v1389_v33 = vmul.f32 0.0051020407, %v1209_v31  ;;  %1916 = vperm.xlu0 %2831, %v1578_v49   ;;  %v1390_v14 = vmul.f32 0.0051020407, %v1213_v17  ;;  %v1626_v34 = vmul.f32 %v1578_v49, %v5035_v54  ;;  %v3819_v31 = vld [vmem:[%s3800_s29 + $0xc8] sm:$0xff] }
 0x23e   : > { %v2886_v19 = vpop.eup %2885  ;;  %2891 = vrsqrt.f32 %v1459_v28 }
 0x23f   : > { %v1602_v27 = vmul.f32 %v2886_v19, %v3807_v61  ;;  %v1437_v9 = vadd.f32 1e-05, %v1389_v33  ;;  %2893 = vrsqrt.f32 %v1436_v26  ;;  %v1438_v20 = vadd.f32 1e-05, %v1390_v14  ;;  %v3822_v33 = vld [vmem:[%s3800_s29 + $0xd0] sm:$0xff] }
 0x240   : > { %v1305_v21 = vpop.xlane.xlu1 %1304  ;;  %v1309_v51 = vpop.xlane.xlu0 %1308 }
 0x241   : > { %v1413_v3 = vmul.f32 0.0051020407, %v1305_v21  ;;  %1722 = vrot.lane.b32.xlu0 %v1626_v34, %s2988_s30  ;;  %2036 = vperm.xlu1 %2832, %v1602_v27   ;;  %v1650_v32 = vmul.f32 %v1602_v27, %v3468_v56  ;;  %2895 = vrsqrt.f32 %v1437_v9  ;;  %v1414_v28 = vmul.f32 0.0051020407, %v1309_v51 }
 0x242   : > { %2897 = vrsqrt.f32 %v1438_v20 }
 0x243   : > { %v2888_v53 = vpop.eup %2887  ;;  %v1461_v49 = vadd.f32 1e-05, %v1413_v3  ;;  %v1462_v14 = vadd.f32 1e-05, %v1414_v28  ;;  %v3835_v28 = vld [vmem:[%s3800_s29 + $0x18] sm:$0xff] }
 0x244   : > { %v1579_v17 = vmul.f32 %v2888_v53, %v3813_v62  ;;  %v1217_v54 = vpop.xlane.xlu1 %1216  ;;  %v1221_v9 = vpop.xlane.xlu0 %1220 }
 0x245   : > { %1770 = vrot.lane.b32.xlu0 %v1650_v32, %s2988_s30  ;;  %2899 = vrsqrt.f32 %v1461_v49  ;;  %v1391_v21 = vmul.f32 0.0051020407, %v1217_v54  ;;  %v3831_v32 = vld [vmem:[%s3800_s29 + $0x10] sm:$0xff]  ;;  %v1392_v49 = vmul.f32 0.0051020407, %v1221_v9 }
 0x246   : > { %1921 = vperm.xlu1 %2832, %v1579_v17   ;;  %v1627_v56 = vmul.f32 %v1579_v17, %v3479_v24  ;;  %2901 = vrsqrt.f32 %v1462_v14 }
 0x247   : > { %v2890_v19 = vpop.eup %2889  ;;  %v1439_v17 = vadd.f32 1e-05, %v1391_v21 }
 0x248   : > { %v2892_v26 = vpop.eup %2891  ;;  %v1604_v27 = vmul.f32 %v2890_v19, %v3822_v33  ;;  %v1313_v53 = vpop.xlane.xlu1 %1312 }
 0x249   : > { %v1603_v34 = vmul.f32 %v2892_v26, %v3819_v31  ;;  %v2894_v3 = vpop.eup %2893  ;;  %v1415_v19 = vmul.f32 0.0051020407, %v1313_v53  ;;  %v1317_v26 = vpop.xlane.xlu0 %1316  ;;  %2903 = vrsqrt.f32 %v1439_v17 }
 0x24a   : > { %1724 = vrot.lane.b32.xlu1 %v1627_v56, %s2988_s30  ;;  %v1652_v20 = vmul.f32 %v1604_v27, %v3493_v6  ;;  %v3841_v56 = vld [vmem:[%s3800_s29 + $0xd8] sm:$0xff]  ;;  %v1416_v9 = vmul.f32 0.0051020407, %v1317_v26 }
 0x24b   : > { %2041 = vperm.xlu0 %2831, %v1603_v34   ;;  %v1651_v51 = vmul.f32 %v1603_v34, %v3462_v36  ;;  %v2896_v24 = vpop.eup %2895  ;;  %v1580_v36 = vmul.f32 %v2894_v3, %v3831_v32  ;;  %v3844_v34 = vld [vmem:[%s3800_s29 + $0x20] sm:$0xff] }
 0x24c   : > { %v2898_v54 = vpop.eup %2897  ;;  %v1581_v6 = vmul.f32 %v2896_v24, %v3835_v28  ;;  %v1225_v55 = vpop.xlane.xlu1 %1224  ;;  %v1464_v24 = vadd.f32 1e-05, %v1416_v9 }
 0x24d   : > { %v1582_v3 = vmul.f32 %v2898_v54, %v3844_v34  ;;  %v1229_v26 = vpop.xlane.xlu0 %1228 }
 0x24e   : > { %1772 = vrot.lane.b32.xlu1 %v1651_v51, %s2988_s30  ;;  %v1440_v51 = vadd.f32 1e-05, %v1392_v49  ;;  %v1628_v49 = vmul.f32 %v1580_v36, %v3481_v38  ;;  %v3860_v38 = vld [vmem:[%s3800_s29 + $0x28] sm:$0xff] }
 0x24f   : > { %1774 = vrot.lane.b32.xlu0 %v1652_v20, %s2988_s30  ;;  %v2900_v14 = vpop.eup %2899  ;;  %v1463_v20 = vadd.f32 1e-05, %v1415_v19  ;;  %v1630_v17 = vmul.f32 %v1582_v3, %v3509_v40  ;;  %v1394_v40 = vmul.f32 0.0051020407, %v1229_v26 }
 0x250   : > { %v1605_v21 = vmul.f32 %v2900_v14, %v3841_v56  ;;  %v2902_v53 = vpop.eup %2901  ;;  %2905 = vrsqrt.f32 %v1440_v51  ;;  %v1321_v54 = vpop.xlane.xlu1 %1320  ;;  %v1629_v14 = vmul.f32 %v1581_v6, %v3495_v5 }
 0x251   : > { %2907 = vrsqrt.f32 %v1463_v20  ;;  %v1606_v19 = vmul.f32 %v2902_v53, %v3849_v37  ;;  %v1417_v20 = vmul.f32 0.0051020407, %v1321_v54  ;;  %v1442_v26 = vadd.f32 1e-05, %v1394_v40 }
 0x252   : > { %1926 = vperm.xlu1 %2832, %v1580_v36   ;;  %2909 = vrsqrt.f32 %v1464_v24  ;;  %v1653_v53 = vmul.f32 %v1605_v21, %v3507_v22  ;;  %v1325_v24 = vpop.xlane.xlu0 %1324 }
 0x253   : > { %1931 = vperm.xlu0 %2831, %v1581_v6   ;;  %v1654_v51 = vmul.f32 %v1606_v19, %v3521_v50  ;;  %v2904_v9 = vpop.eup %2903  ;;  %v1465_v54 = vadd.f32 1e-05, %v1417_v20 }
 0x254   : > { %v1583_v5 = vmul.f32 %v2904_v9, %v3860_v38  ;;  %v1233_v50 = vpop.xlane.xlu1 %1232 }
 0x255   : > { %v1395_v20 = vmul.f32 0.0051020407, %v1233_v50 }
 0x256   : > { %2046 = vperm.xlu1 %2832, %v1604_v27   ;;  %v1393_v27 = vmul.f32 0.0051020407, %v1225_v55 }
 0x257   : > { %2051 = vperm.xlu0 %2831, %v1605_v21  }
 0x258   : > { %v1441_v36 = vadd.f32 1e-05, %v1393_v27  ;;  %v1418_v27 = vmul.f32 0.0051020407, %v1325_v24  ;;  %v1237_v24 = vpop.xlane.xlu0 %1236 }
 0x25a   : > { %1726 = vrot.lane.b32.xlu1 %v1628_v49, %s2988_s30  ;;  %v2906_v55 = vpop.eup %2905  ;;  %v3867_v49 = vld [vmem:[%s3800_s29 + $0xe8] sm:$0xff]  ;;  %2911 = vrsqrt.f32 %v1441_v36  ;;  %v1466_v9 = vadd.f32 1e-05, %v1418_v27  ;;  %v3884_v27 = vld [vmem:[%s3800_s29 + $0x38] sm:$0xff] }
 0x25b   : > { %1730 = vrot.lane.b32.xlu0 %v1630_v17, %s2988_s30  ;;  %v2908_v6 = vpop.eup %2907  ;;  %v3870_v17 = vld [vmem:[%s3800_s29 + $0x30] sm:$0xff]  ;;  %2913 = vrsqrt.f32 %v1442_v26  ;;  %5036 = vst [vmem:[#allocation98_spill] sm:$0xff] %v3884_v27 }
 0x25c   : > { %v1607_v22 = vmul.f32 %v2908_v6, %v3867_v49  ;;  %v1584_v21 = vmul.f32 %v2906_v55, %v3870_v17  ;;  %2915 = vrsqrt.f32 %v1465_v54  ;;  %v1333_v54 = vpop.xlane.xlu0 %1332 }
 0x25d   : > { %2917 = vrsqrt.f32 %v1466_v9 }
 0x25e   : > { %1728 = vrot.lane.b32.xlu1 %v1629_v14, %s2988_s30  ;;  %v2910_v14 = vpop.eup %2909  ;;  %v1632_v40 = vmul.f32 %v1584_v21, %v3537_v8  ;;  %v1396_v8 = vmul.f32 0.0051020407, %v1237_v24  ;;  %v1655_v50 = vmul.f32 %v1607_v22, %v3535_v57  ;;  %v1420_v24 = vmul.f32 0.0051020407, %v1333_v54 }
 0x25f   : > { %1778 = vrot.lane.b32.xlu0 %v1654_v51, %s2988_s30  ;;  %v3875_v51 = vld [vmem:[%s3800_s29 + $0xf0] sm:$0xff] }
 0x260   : > { %v1608_v36 = vmul.f32 %v2910_v14, %v3875_v51 }
 0x262   : > { %1776 = vrot.lane.b32.xlu1 %v1653_v53, %s2988_s30  ;;  %v1329_v53 = vpop.xlane.xlu1 %1328  ;;  %v1656_v55 = vmul.f32 %v1608_v36, %v3549_v7 }
 0x263   : > { %1941 = vperm.xlu0 %2831, %v1583_v5   ;;  %v1419_v14 = vmul.f32 0.0051020407, %v1329_v53 }
 0x264   : > { %v2912_v6 = vpop.eup %2911 }
 0x265   : > { %v2914_v9 = vpop.eup %2913 }
 0x266   : > { %1936 = vperm.xlu1 %2832, %v1582_v3   ;;  %v1631_v3 = vmul.f32 %v1583_v5, %v3523_v39  ;;  %v1241_v26 = vpop.xlane.xlu1 %1240  ;;  %v1585_v39 = vmul.f32 %v2912_v6, %v3884_v27  ;;  %v2916_v7 = vpop.eup %2915  ;;  %v3891_v5 = vld [vmem:[%s3800_s29 + $0xf8] sm:$0xff]  ;;  %v3899_v27 = vld [vmem:[%s3800_s29 + $0x100] sm:$0xff] }
 0x267   : > { %2061 = vperm.xlu0 %2831, %v1607_v22   ;;  %5037 = vst [vmem:[#allocation105_spill] sm:$0xff] %v3891_v5  ;;  %v1609_v53 = vmul.f32 %v2916_v7, %v3891_v5  ;;  %v2918_v22 = vpop.eup %2917  ;;  %v1245_v6 = vpop.xlane.xlu0 %1244 }
 0x26a   : > { %2056 = vperm.xlu1 %2832, %v1606_v19   ;;  %v1443_v19 = vadd.f32 1e-05, %v1395_v20  ;;  %v1467_v20 = vadd.f32 1e-05, %v1419_v14  ;;  %v1397_v14 = vmul.f32 0.0051020407, %v1241_v26  ;;  %v1657_v26 = vmul.f32 %v1609_v53, %v3563_v11 }
 0x26b   : > { %1734 = vrot.lane.b32.xlu0 %v1632_v40, %s2988_s30  ;;  %v3894_v40 = vld [vmem:[%s3800_s29 + $0x40] sm:$0xff] }
 0x26c   : > { %2919 = vrsqrt.f32 %v1443_v19  ;;  %v1586_v57 = vmul.f32 %v2914_v9, %v3894_v40  ;;  %v1610_v19 = vmul.f32 %v2918_v22, %v3899_v27  ;;  %v1341_v9 = vpop.xlane.xlu0 %1340 }
 0x26e   : > { %1732 = vrot.lane.b32.xlu1 %v1631_v3, %s2988_s30  ;;  %v1444_v3 = vadd.f32 1e-05, %v1396_v8  ;;  %v1634_v8 = vmul.f32 %v1586_v57, %v3565_v46  ;;  %v1658_v7 = vmul.f32 %v1610_v19, %v3577_v63  ;;  %v1398_v46 = vmul.f32 0.0051020407, %v1245_v6 }
 0x26f   : > { %1782 = vrot.lane.b32.xlu0 %v1656_v55, %s2988_s30  ;;  %v1337_v55 = vpop.xlane.xlu1 %1336 }
 0x270   : > { %2921 = vrsqrt.f32 %v1444_v3  ;;  %v1253_v63 = vpop.xlane.xlu0 %1252  ;;  %v1446_v6 = vadd.f32 1e-05, %v1398_v46 }
 0x271   : > { %2923 = vrsqrt.f32 %v1467_v20  ;;  %v1421_v20 = vmul.f32 0.0051020407, %v1337_v55 }
 0x272   : > { %1780 = vrot.lane.b32.xlu1 %v1655_v50, %s2988_s30  ;;  %v1468_v50 = vadd.f32 1e-05, %v1420_v24  ;;  %v3908_v24 = vld [vmem:[%s3800_s29 + $0x48] sm:$0xff] }
 0x273   : > { %1951 = vperm.xlu0 %2831, %v1585_v39   ;;  %v1249_v54 = vpop.xlane.xlu1 %1248  ;;  %5038 = vst [vmem:[#allocation106_spill] sm:$0xff] %v3908_v24  ;;  %v1469_v55 = vadd.f32 1e-05, %v1421_v20 }
 0x274   : > { %2925 = vrsqrt.f32 %v1468_v50  ;;  %v1349_v5 = vpop.xlane.xlu0 %1348 }
 0x276   : > { %1946 = vperm.xlu1 %2832, %v1584_v21   ;;  %v1633_v21 = vmul.f32 %v1585_v39, %v3551_v41  ;;  %v2920_v3 = vpop.eup %2919 }
 0x277   : > { %2071 = vperm.xlu0 %2831, %v1609_v53   ;;  %v1345_v22 = vpop.xlane.xlu1 %1344  ;;  %v1587_v41 = vmul.f32 %v2920_v3, %v3908_v24  ;;  %v3923_v24 = vld [vmem:[%s3800_s29 + $0x110] sm:$0xff] }
 0x27a   : > { %2066 = vperm.xlu1 %2832, %v1608_v36   ;;  %v1445_v36 = vadd.f32 1e-05, %v1397_v14  ;;  %v2922_v50 = vpop.eup %2921  ;;  %v1422_v14 = vmul.f32 0.0051020407, %v1341_v9 }
 0x27b   : > { %1738 = vrot.lane.b32.xlu0 %v1634_v8, %s2988_s30  ;;  %v2924_v39 = vpop.eup %2923  ;;  %v3915_v8 = vld [vmem:[%s3800_s29 + $0x108] sm:$0xff]  ;;  %v1257_v3 = vpop.xlane.xlu1 %1256 }
 0x27c   : > { %2927 = vrsqrt.f32 %v1445_v36  ;;  %v1399_v36 = vmul.f32 0.0051020407, %v1249_v54 }
 0x27d   : > { %2929 = vrsqrt.f32 %v1446_v6  ;;  %v1261_v6 = vpop.xlane.xlu0 %1260 }
 0x27e   : > { %1736 = vrot.lane.b32.xlu1 %v1633_v21, %s2988_s30  ;;  %v3918_v21 = vld [vmem:[%s3800_s29 + $0x50] sm:$0xff]  ;;  %v2926_v53 = vpop.eup %2925  ;;  %2931 = vrsqrt.f32 %v1469_v55  ;;  %v1423_v55 = vmul.f32 0.0051020407, %v1345_v22 }
 0x27f   : > { %1786 = vrot.lane.b32.xlu0 %v1658_v7, %s2988_s30  ;;  %v1611_v7 = vmul.f32 %v2924_v39, %v3915_v8  ;;  %v1588_v11 = vmul.f32 %v2922_v50, %v3918_v21  ;;  %v1612_v9 = vmul.f32 %v2926_v53, %v3923_v24  ;;  %v1353_v20 = vpop.xlane.xlu1 %1352 }
 0x280   : > { %v1471_v22 = vadd.f32 1e-05, %v1423_v55  ;;  %v1401_v55 = vmul.f32 0.0051020407, %v1257_v3 }
 0x281   : > { %v1636_v46 = vmul.f32 %v1588_v11, %v3593_v2  ;;  %v1660_v50 = vmul.f32 %v1612_v9, %v3605_v15  ;;  %v1400_v2 = vmul.f32 0.0051020407, %v1253_v63  ;;  %v1659_v54 = vmul.f32 %v1611_v7, %v3591_v13 }
 0x282   : > { %1784 = vrot.lane.b32.xlu1 %v1657_v26, %s2988_s30  ;;  %v1470_v26 = vadd.f32 1e-05, %v1422_v14  ;;  %v3932_v14 = vld [vmem:[%s3800_s29 + $0x58] sm:$0xff] }
 0x283   : > { %1961 = vperm.xlu0 %2831, %v1587_v41   ;;  %5039 = vst [vmem:[#allocation107_spill] sm:$0xff] %v3932_v14  ;;  %v3937_v15 = vpop.xlane.xlu1 %1264  ;;  %v1448_v63 = vadd.f32 1e-05, %v1400_v2 }
 0x284   : > { %2933 = vrsqrt.f32 %v1470_v26  ;;  %v3941_v26 = vld [vmem:[%s3800_s29 + $0x118] sm:$0xff] }
 0x286   : > { %1956 = vperm.xlu1 %2832, %v1586_v57   ;;  %v1635_v57 = vmul.f32 %v1587_v41, %v3579_v60  ;;  %v2928_v39 = vpop.eup %2927 }
 0x287   : > { %2081 = vperm.xlu0 %2831, %v1611_v7   ;;  %v2930_v53 = vpop.eup %2929  ;;  %v1589_v60 = vmul.f32 %v2928_v39, %v3932_v14  ;;  %v3949_v39 = vld [vmem:[%s3800_s29 + $0x120] sm:$0xff]  ;;  %v1361_v14 = vpop.xlane.xlu1 %1360 }
 0x288   : > { %v2932_v41 = vpop.eup %2931 }
 0x289   : > { %v1613_v13 = vmul.f32 %v2932_v41, %v3941_v26 }
 0x28a   : > { %2076 = vperm.xlu1 %2832, %v1610_v19   ;;  %v1447_v19 = vadd.f32 1e-05, %v1399_v36  ;;  %v1424_v36 = vmul.f32 0.0051020407, %v1349_v5 }
 0x28b   : > { %1742 = vrot.lane.b32.xlu0 %v1636_v46, %s2988_s30  ;;  %v3944_v46 = vld [vmem:[%s3800_s29 + $0x60] sm:$0xff]  ;;  %v1661_v3 = vmul.f32 %v1613_v13, %v3619_v29 }
 0x28c   : > { %2935 = vrsqrt.f32 %v1447_v19  ;;  %v1590_v7 = vmul.f32 %v2930_v53, %v3944_v46 }
 0x28d   : > { %2937 = vrsqrt.f32 %v1448_v63  ;;  %v3956_v63 = vpop.xlane.xlu1 %1272 }
 0x28e   : > { %1740 = vrot.lane.b32.xlu1 %v1635_v57, %s2988_s30  ;;  %v1357_v57 = vpop.xlane.xlu0 %1356  ;;  %2939 = vrsqrt.f32 %v1471_v22  ;;  %v1638_v2 = vmul.f32 %v1590_v7, %v3621_v59  ;;  %v3960_v59 = vld [vmem:[%s3800_s29 + $0x68] sm:$0xff]  ;;  %v1425_v22 = vmul.f32 0.0051020407, %v1353_v20 }
 0x28f   : > { %1790 = vrot.lane.b32.xlu0 %v1660_v50, %s2988_s30  ;;  %v2934_v50 = vpop.eup %2933  ;;  %5040 = vst [vmem:[#allocation108_spill] sm:$0xff] %v3960_v59 }
 0x290   : > { %v1614_v5 = vmul.f32 %v2934_v50, %v3949_v39 }
 0x291   : > { %v3972_v20 = vpop.xlane.xlu1 %1368 }
 0x292   : > { %1788 = vrot.lane.b32.xlu1 %v1659_v54, %s2988_s30  ;;  %v1472_v54 = vadd.f32 1e-05, %v1424_v36  ;;  %v1269_v19 = vpop.xlane.xlu0 %1268  ;;  %v1662_v53 = vmul.f32 %v1614_v5, %v3633_v0  ;;  %v1402_v36 = vmul.f32 0.0051020407, %v1261_v6  ;;  %v1426_v6 = vmul.f32 0.0051020407, %v1357_v57 }
 0x293   : > { %1971 = vperm.xlu0 %2831, %v1589_v60  }
 0x294   : > { %2941 = vrsqrt.f32 %v1472_v54  ;;  %v3967_v54 = vld [vmem:[%s3800_s29 + $0x128] sm:$0xff] }
 0x296   : > { %1966 = vperm.xlu1 %2832, %v1588_v11   ;;  %v1637_v11 = vmul.f32 %v1589_v60, %v3607_v43  ;;  %v2936_v41 = vpop.eup %2935  ;;  %v1365_v50 = vpop.xlane.xlu0 %1364 }
 0x297   : > { %2091 = vperm.xlu0 %2831, %v1613_v13   ;;  %v2938_v43 = vpop.eup %2937  ;;  %v1591_v60 = vmul.f32 %v2936_v41, %v3960_v59  ;;  %v3977_v59 = vld [vmem:[%s3800_s29 + $0x130] sm:$0xff] }
 0x298   : > { %v2940_v0 = vpop.eup %2939 }
 0x299   : > { %v1615_v29 = vmul.f32 %v2940_v0, %v3967_v54 }
 0x29a   : > { %2086 = vperm.xlu1 %2832, %v1612_v9   ;;  %v1449_v9 = vadd.f32 1e-05, %v1401_v55  ;;  %v1473_v55 = vadd.f32 1e-05, %v1425_v22  ;;  %v1277_v41 = vpop.xlane.xlu0 %1276  ;;  %v1403_v22 = vmul.f32 0.0051020407, %v3937_v15 }
 0x29b   : > { %1746 = vrot.lane.b32.xlu0 %v1638_v2, %s2988_s30  ;;  %v3970_v2 = vld [vmem:[%s3800_s29 + $0x70] sm:$0xff]  ;;  %v1663_v15 = vmul.f32 %v1615_v29, %v3647_v1 }
 0x29c   : > { %2943 = vrsqrt.f32 %v1449_v9  ;;  %v1592_v13 = vmul.f32 %v2938_v43, %v3970_v2  ;;  %v3981_v9 = vpop.xlane.xlu1 %1280  ;;  %v1639_v43 = vmul.f32 %v1591_v60, %v3635_v58 }
 0x29e   : > { %1744 = vrot.lane.b32.xlu1 %v1637_v11, %s2988_s30  ;;  %v1450_v11 = vadd.f32 1e-05, %v1402_v36  ;;  %v1640_v36 = vmul.f32 %v1592_v13, %v3649_v4  ;;  %v3991_v4 = vld [vmem:[%s3800_s29 + $0x78] sm:$0xff] }
 0x29f   : > { %1794 = vrot.lane.b32.xlu0 %v1662_v53, %s2988_s30  ;;  %v2942_v53 = vpop.eup %2941  ;;  %5041 = vst [vmem:[#allocation109_spill] sm:$0xff] %v3991_v4 }
 0x2a0   : > { %2945 = vrsqrt.f32 %v1450_v11  ;;  %v1616_v57 = vmul.f32 %v2942_v53, %v3977_v59  ;;  %v3994_v53 = vpop.xlane.xlu1 %1376 }
 0x2a1   : > { %2947 = vrsqrt.f32 %v1473_v55  ;;  %v1427_v55 = vmul.f32 0.0051020407, %v1361_v14  ;;  %v1428_v14 = vmul.f32 0.0051020407, %v1365_v50 }
 0x2a2   : > { %1792 = vrot.lane.b32.xlu1 %v1661_v3, %s2988_s30  ;;  %v1474_v3 = vadd.f32 1e-05, %v1426_v6  ;;  %v1664_v0 = vmul.f32 %v1616_v57, %v3661_v16  ;;  %v1404_v6 = vmul.f32 0.0051020407, %v1269_v19  ;;  %v4005_v19 = vld [vmem:[%s3800_s29 + $0x80] sm:$0xff] }
 0x2a3   : > { %1981 = vperm.xlu0 %2831, %v1591_v60  }
 0x2a4   : > { %2949 = vrsqrt.f32 %v1474_v3 }
 0x2a6   : > { %1976 = vperm.xlu1 %2832, %v1590_v7   ;;  %v3985_v7 = vpop.xlane.xlu0 %1372  ;;  %v2944_v11 = vpop.eup %2943 }
 0x2a7   : > { %2101 = vperm.xlu0 %2831, %v1615_v29   ;;  %v1593_v58 = vmul.f32 %v2944_v11, %v3991_v4  ;;  %v4009_v11 = vpop.xlane.xlu1 %1288  ;;  %v4012_v4 = vld [vmem:[%s3800_s29 + $0x140] sm:$0xff] }
 0x2aa   : > { %2096 = vperm.xlu1 %2832, %v1614_v5   ;;  %v1451_v5 = vadd.f32 1e-05, %v1403_v22  ;;  %v2946_v3 = vpop.eup %2945  ;;  %v3998_v60 = vpop.xlane.xlu0 %1284  ;;  %v1475_v22 = vadd.f32 1e-05, %v1427_v55  ;;  %v1405_v55 = vmul.f32 0.0051020407, %v3956_v63 }
 0x2ab   : > { %1750 = vrot.lane.b32.xlu0 %v1640_v36, %s2988_s30  ;;  %v2948_v16 = vpop.eup %2947  ;;  %v4002_v36 = vld [vmem:[%s3800_s29 + $0x138] sm:$0xff]  ;;  %v1594_v29 = vmul.f32 %v2946_v3, %v4005_v19  ;;  %v1429_v63 = vmul.f32 0.0051020407, %v3972_v20  ;;  %v1430_v20 = vmul.f32 0.0051020407, %v3985_v7 }
 0x2ac   : > { %2951 = vrsqrt.f32 %v1451_v5  ;;  %v1617_v1 = vmul.f32 %v2948_v16, %v4002_v36  ;;  %v1641_v16 = vmul.f32 %v1593_v58, %v3663_v35 }
 0x2ad   : > { %v1642_v50 = vmul.f32 %v1594_v29, %v3677_v30  ;;  %v4028_v30 = vld [vmem:[%s3800_s29 + $0x88] sm:$0xff] }
 0x2ae   : > { %1748 = vrot.lane.b32.xlu1 %v1639_v43, %s2988_s30  ;;  %v1452_v43 = vadd.f32 1e-05, %v1404_v6  ;;  %v4014_v6 = vpop.xlane.xlu0 %1380  ;;  %v1665_v35 = vmul.f32 %v1617_v1, %v3675_v47 }
 0x2af   : > { %1798 = vrot.lane.b32.xlu0 %v1664_v0, %s2988_s30  ;;  %v2950_v0 = vpop.eup %2949 }
 0x2b0   : > { %2953 = vrsqrt.f32 %v1452_v43  ;;  %v1618_v5 = vmul.f32 %v2950_v0, %v4012_v4 }
 0x2b1   : > { %2955 = vrsqrt.f32 %v1475_v22  ;;  %v1453_v22 = vadd.f32 1e-05, %v1405_v55 }
 0x2b2   : > { %1796 = vrot.lane.b32.xlu1 %v1663_v15, %s2988_s30  ;;  %v1476_v15 = vadd.f32 1e-05, %v1428_v14  ;;  %v1666_v43 = vmul.f32 %v1618_v5, %v3689_v10 }
 0x2b3   : > { %1991 = vperm.xlu0 %2831, %v1593_v58  }
 0x2b4   : > { %2957 = vrsqrt.f32 %v1476_v15 }
 0x2b5   : > { %2959 = vrsqrt.f32 %v1453_v22 }
 0x2b6   : > { %1986 = vperm.xlu1 %2832, %v1592_v13   ;;  %v4020_v13 = vpop.xlane.xlu1 %1384  ;;  %v2952_v14 = vpop.eup %2951 }
 0x2b7   : > { %2111 = vperm.xlu0 %2831, %v1617_v1   ;;  %v1595_v10 = vmul.f32 %v2952_v14, %v4028_v30 }
 0x2ba   : > { %2106 = vperm.xlu1 %2832, %v1616_v57   ;;  %v1406_v57 = vmul.f32 0.0051020407, %v1277_v41  ;;  %v2954_v58 = vpop.eup %2953  ;;  %v4043_v41 = vld [vmem:[%s3800_s29 + $0x90] sm:$0xff] }
 0x2bb   : > { %1754 = vrot.lane.b32.xlu0 %v1642_v50, %s2988_s30  ;;  %v2956_v50 = vpop.eup %2955  ;;  %v1596_v14 = vmul.f32 %v2954_v58, %v4043_v41  ;;  %v1643_v58 = vmul.f32 %v1595_v10, %v3691_v42  ;;  %v1431_v42 = vmul.f32 0.0051020407, %v3994_v53 }
 0x2bc   : > { %v4022_v3 = vpop.permute.xlu0 %1916  ;;  %v1454_v55 = vadd.f32 1e-05, %v1406_v57  ;;  %v1478_v57 = vadd.f32 1e-05, %v1430_v20 }
 0x2bd   : > { %5042 = vst [vmem:[#allocation110_spill] sm:$0xff] %v4022_v3  ;;  %v1644_v7 = vmul.f32 %v1596_v14, %v3705_v23  ;;  %v1479_v53 = vadd.f32 1e-05, %v1431_v42 }
 0x2be   : > { %1752 = vrot.lane.b32.xlu1 %v1641_v16, %s2988_s30  ;;  %v4040_v16 = vld [vmem:[%s3800_s29 + $0x148] sm:$0xff]  ;;  %2961 = vrsqrt.f32 %v1454_v55 }
 0x2bf   : > { %1802 = vrot.lane.b32.xlu0 %v1666_v43, %s2988_s30  ;;  %v1477_v43 = vadd.f32 1e-05, %v1429_v63  ;;  %v1619_v1 = vmul.f32 %v2956_v50, %v4040_v16 }
 0x2c0   : > { %v4032_v0 = vpop.permute.xlu0 %1722  ;;  %v4034_v15 = vpop.permute.xlu1 %2036 }
 0x2c1   : > { %5043 = vst [vmem:[#allocation111_spill] sm:$0xff] %v4034_v15  ;;  %v2958_v15 = vpop.eup %2957  ;;  %2963 = vrsqrt.f32 %v1477_v43 }
 0x2c2   : > { %1800 = vrot.lane.b32.xlu1 %v1665_v35, %s2988_s30  ;;  %v4053_v35 = vld [vmem:[%s3800_s29 + $0x150] sm:$0xff]  ;;  %2965 = vrsqrt.f32 %v1478_v57  ;;  %v2960_v20 = vpop.eup %2959 }
 0x2c3   : > { %2001 = vperm.xlu0 %2831, %v1595_v10   ;;  %v1620_v63 = vmul.f32 %v2958_v15, %v4053_v35  ;;  %v4071_v15 = vld [vmem:[%s3800_s29 + $0x98] sm:$0xff]  ;;  %v1667_v10 = vmul.f32 %v1619_v1, %v3703_v52  ;;  %v1432_v52 = vmul.f32 0.0051020407, %v4014_v6 }
 0x2c4   : > { %v4046_v3 = vpop.permute.xlu0 %1770  ;;  %5046 = vst [vmem:[#allocation114_spill] sm:$0xff] %v4071_v15  ;;  %v1597_v57 = vmul.f32 %v2960_v20, %v4071_v15  ;;  %v4130_v15 = vld [vmem:[%s3800_s29 + $0xb0] sm:$0xff] }
 0x2c5   : > { %v4048_v47 = vpop.permute.xlu1 %1921  ;;  %v1668_v55 = vmul.f32 %v1620_v63, %v3717_v12  ;;  %5059 = vst [vmem:[#allocation121_spill] sm:$0xff] %v4130_v15 }
 0x2c6   : > { %5044 = vst [vmem:[#allocation112_spill] sm:$0xff] %v4048_v47  ;;  %1996 = vperm.xlu1 %2832, %v1594_v29   ;;  %v1407_v29 = vmul.f32 0.0051020407, %v3981_v9 }
 0x2c7   : > { %2121 = vperm.xlu0 %2831, %v1619_v1  }
 0x2c8   : > { %v1455_v9 = vadd.f32 1e-05, %v1407_v29  ;;  %v2962_v43 = vpop.eup %2961 }
 0x2c9   : > { %v4055_v22 = vpop.permute.xlu1 %1724 }
 0x2ca   : > { %v4059_v47 = vpop.permute.xlu0 %2041  ;;  %2116 = vperm.xlu1 %2832, %v1618_v5   ;;  %v1408_v5 = vmul.f32 0.0051020407, %v3998_v60  ;;  %v4087_v60 = vld [vmem:[%s3800_s29 + $0xa0] sm:$0xff]  ;;  %2967 = vrsqrt.f32 %v1455_v9 }
 0x2cb   : > { %5045 = vst [vmem:[#allocation113_spill] sm:$0xff] %v4059_v47  ;;  %1758 = vrot.lane.b32.xlu0 %v1644_v7, %s2988_s30  ;;  %v2964_v7 = vpop.eup %2963  ;;  %v1598_v20 = vmul.f32 %v2962_v43, %v4087_v60  ;;  %v5053_v43 = vld [vmem:[#allocation99_spill] sm:$0xff] }
 0x2cc   : > { %v1456_v29 = vadd.f32 1e-05, %v1408_v5  ;;  %v1480_v5 = vadd.f32 1e-05, %v1432_v52  ;;  %v5054_v52 = vld [vmem:[#allocation101_spill] sm:$0xff] }
 0x2cd   : > { %v4064_v50 = vpop.permute.xlu1 %1772  ;;  %v1646_v6 = vmul.f32 %v1598_v20, %v3733_v45 }
 0x2ce   : > { %v4067_v23 = vpop.permute.xlu0 %1774  ;;  %1756 = vrot.lane.b32.xlu1 %v1643_v58, %s2988_s30  ;;  %v4084_v58 = vld [vmem:[%s3800_s29 + $0x158] sm:$0xff]  ;;  %2969 = vrsqrt.f32 %v1456_v29  ;;  %v1645_v29 = vmul.f32 %v1597_v57, %v5053_v43 }
 0x2cf   : > { %1806 = vrot.lane.b32.xlu0 %v1668_v55, %s2988_s30  ;;  %5049 = vst [vmem:[#allocation117_spill] sm:$0xff] %v4084_v58  ;;  %v1621_v55 = vmul.f32 %v2964_v7, %v4084_v58  ;;  %2971 = vrsqrt.f32 %v1479_v53 }
 0x2d0   : > { %2973 = vrsqrt.f32 %v1480_v5  ;;  %v5056_v5 = vld [vmem:[#allocation100_spill] sm:$0xff] }
 0x2d1   : > { %v4077_v12 = vpop.permute.xlu1 %1926 }
 0x2d2   : > { %5047 = vst [vmem:[#allocation115_spill] sm:$0xff] %v4077_v12  ;;  %v4080_v47 = vpop.permute.xlu0 %1931  ;;  %1804 = vrot.lane.b32.xlu1 %v1667_v10, %s2988_s30  ;;  %v2966_v12 = vpop.eup %2965  ;;  %v4097_v10 = vld [vmem:[%s3800_s29 + $0x160] sm:$0xff] }
 0x2d3   : > { %5048 = vst [vmem:[#allocation116_spill] sm:$0xff] %v4080_v47  ;;  %2011 = vperm.xlu0 %2831, %v1597_v57   ;;  %5052 = vst [vmem:[#allocation120_spill] sm:$0xff] %v4097_v10  ;;  %v1622_v42 = vmul.f32 %v2966_v12, %v4097_v10  ;;  %v4115_v12 = vld [vmem:[%s3800_s29 + $0xa8] sm:$0xff]  ;;  %v1669_v57 = vmul.f32 %v1621_v55, %v5056_v5 }
 0x2d4   : > { %5055 = vst [vmem:[#allocation99_spill] sm:$0xff] %v4115_v12 }
 0x2d5   : > { %v4090_v1 = vpop.permute.xlu1 %2046  ;;  %v1670_v53 = vmul.f32 %v1622_v42, %v5054_v52 }
 0x2d6   : > { %5050 = vst [vmem:[#allocation118_spill] sm:$0xff] %v4090_v1  ;;  %v4094_v47 = vpop.permute.xlu0 %2051  ;;  %2006 = vperm.xlu1 %2832, %v1596_v14   ;;  %v1409_v14 = vmul.f32 0.0051020407, %v4009_v11  ;;  %v2968_v1 = vpop.eup %2967  ;;  %v1433_v11 = vmul.f32 0.0051020407, %v4020_v13 }
 0x2d7   : > { %5051 = vst [vmem:[#allocation119_spill] sm:$0xff] %v4094_v47  ;;  %2131 = vperm.xlu0 %2831, %v1621_v55   ;;  %v1599_v52 = vmul.f32 %v2968_v1, %v4115_v12 }
 0x2d8   : > { %v1481_v13 = vadd.f32 1e-05, %v1433_v11 }
 0x2d9   : > { %v4099_v9 = vpop.permute.xlu1 %1726 }
 0x2da   : > { %v4103_v7 = vpop.permute.xlu0 %1730  ;;  %2126 = vperm.xlu1 %2832, %v1620_v63   ;;  %v1457_v63 = vadd.f32 1e-05, %v1409_v14 }
 0x2db   : > { %1762 = vrot.lane.b32.xlu0 %v1646_v6, %s2988_s30  ;;  %v2970_v6 = vpop.eup %2969 }
 0x2dc   : > { %v2972_v58 = vpop.eup %2971  ;;  %2975 = vrsqrt.f32 %v1457_v63 }
 0x2dd   : > { %v4108_v47 = vpop.permute.xlu1 %1728  ;;  %v2974_v5 = vpop.eup %2973  ;;  %2977 = vrsqrt.f32 %v1481_v13  ;;  %v4154_v13 = vld [vmem:[%s3800_s29 + $0xb8] sm:$0xff] }
 0x2de   : > { %v4111_v45 = vpop.permute.xlu0 %1778  ;;  %1760 = vrot.lane.b32.xlu1 %v1645_v29, %s2988_s30  ;;  %v4127_v29 = vld [vmem:[%s3800_s29 + $0x168] sm:$0xff] }
 0x2df   : > { %1810 = vrot.lane.b32.xlu0 %v1670_v53, %s2988_s30  ;;  %5058 = vst [vmem:[#allocation100_spill] sm:$0xff] %v4127_v29  ;;  %v1623_v55 = vmul.f32 %v2972_v58, %v4127_v29  ;;  %v1600_v53 = vmul.f32 %v2970_v6, %v4130_v15  ;;  %v5064_v58 = vld [vmem:[#allocation102_spill] sm:$0xff] }
 0x2e0   : > { %v1647_v6 = vmul.f32 %v1599_v52, %v5064_v58 }
 0x2e1   : > { %v4120_v43 = vpop.permute.xlu1 %1776  ;;  %v1648_v63 = vmul.f32 %v1600_v53, %v3761_v48  ;;  %v5066_v48 = vld [vmem:[#allocation103_spill] sm:$0xff] }
 0x2e2   : > { %v4123_v10 = vpop.permute.xlu0 %1941  ;;  %1808 = vrot.lane.b32.xlu1 %v1669_v57, %s2988_s30 }
 0x2e3   : > { %5057 = vst [vmem:[#allocation101_spill] sm:$0xff] %v4123_v10  ;;  %2021 = vperm.xlu0 %2831, %v1599_v52   ;;  %v4139_v10 = vld [vmem:[%s3800_s29 + $0x170] sm:$0xff] }
 0x2e4   : > { %5062 = vst [vmem:[#allocation124_spill] sm:$0xff] %v4139_v10  ;;  %v1624_v11 = vmul.f32 %v2974_v5, %v4139_v10 }
 0x2e5   : > { %v4132_v14 = vpop.permute.xlu1 %1936 }
 0x2e6   : > { %5060 = vst [vmem:[#allocation122_spill] sm:$0xff] %v4132_v14  ;;  %v4136_v1 = vpop.permute.xlu0 %2061  ;;  %2016 = vperm.xlu1 %2832, %v1598_v20   ;;  %v5065_v20 = vld [vmem:[#allocation104_spill] sm:$0xff]  ;;  %v2976_v12 = vpop.eup %2975 }
 0x2e7   : > { %5061 = vst [vmem:[#allocation123_spill] sm:$0xff] %v4136_v1  ;;  %2141 = vperm.xlu0 %2831, %v1623_v55   ;;  %v1672_v29 = vmul.f32 %v1624_v11, %v5065_v20  ;;  %v2978_v52 = vpop.eup %2977  ;;  %v4165_v20 = vld [vmem:[%s3800_s29 + $0x178] sm:$0xff] }
 0x2e9   : > { %v4141_v57 = vpop.permute.xlu1 %2056 }
 0x2ea   : > { %5063 = vst [vmem:[#allocation125_spill] sm:$0xff] %v4141_v57  ;;  %v1735_v14 = vpop.permute.xlu0 %1734  ;;  %2136 = vperm.xlu1 %2832, %v1622_v42   ;;  %v1671_v42 = vmul.f32 %v1623_v55, %v5066_v48  ;;  %v2989_v48 = vmov 1  }
 0x2eb   : > { %1766 = vrot.lane.b32.xlu0 %v1648_v63, %s2988_s30  ;;  %v1601_v63 = vmul.f32 %v2976_v12, %v4154_v13  ;;  %v1890_v12 = vsub.f32 %v3807_v61, %v4046_v3  ;;  %v1892_v61 = vsub.f32 %v3822_v33, %v4067_v23  ;;  %v1894_v23 = vsub.f32 %v3849_v37, %v4111_v45  ;;  %v5070_v45 = vld [vmem:[#allocation46_spill] sm:$0xff] }
 0x2ed   : > { %v4147_v1 = vpop.permute.xlu1 %1732 }
 0x2ee   : > { %v4150_v15 = vpop.permute.xlu0 %1782  ;;  %1764 = vrot.lane.b32.xlu1 %v1647_v6, %s2988_s30  ;;  %v1625_v6 = vmul.f32 %v2978_v52, %v4165_v20  ;;  %v1867_v52 = vsub.f32 %v3813_v62, %v4055_v22  ;;  %v1870_v22 = vsub.f32 %v3844_v34, %v4103_v7  ;;  %v1872_v34 = vsub.f32 %v3870_v17, %v1735_v14 }
 0x2ef   : > { %1814 = vrot.lane.b32.xlu0 %v1672_v29, %s2988_s30  ;;  %v1893_v17 = vsub.f32 %v3841_v56, %v4120_v43 }
 0x2f1   : > { %v4158_v5 = vpop.permute.xlu1 %1780 }
 0x2f2   : > { %v4161_v58 = vpop.permute.xlu0 %1951  ;;  %1812 = vrot.lane.b32.xlu1 %v1671_v42, %s2988_s30  ;;  %v1649_v42 = vmul.f32 %v1601_v63, %v3775_v25  ;;  %v1866_v25 = vsub.f32 %v3803_v44, %v4032_v0  ;;  %v1868_v44 = vsub.f32 %v3831_v32, %v4099_v9  ;;  %v5071_v32 = vld [vmem:[#allocation48_spill] sm:$0xff] }
 0x2f3   : > { %5067 = vst [vmem:[#allocation102_spill] sm:$0xff] %v4161_v58  ;;  %2031 = vperm.xlu0 %2831, %v1601_v63  }
 0x2f5   : > { %v4167_v57 = vpop.permute.xlu1 %1946 }
 0x2f6   : > { %5068 = vst [vmem:[#allocation104_spill] sm:$0xff] %v4167_v57  ;;  %v4170_v10 = vpop.permute.xlu0 %2071  ;;  %2026 = vperm.xlu1 %2832, %v1600_v53   ;;  %v1673_v53 = vmul.f32 %v1625_v6, %v3787_v18  ;;  %v1891_v18 = vsub.f32 %v3819_v31, %v4064_v50  ;;  %v1869_v31 = vsub.f32 %v3835_v28, %v4108_v47 }
 0x2f7   : > { %5069 = vst [vmem:[#allocation103_spill] sm:$0xff] %v4170_v10  ;;  %2151 = vperm.xlu0 %2831, %v1625_v6   ;;  %v1896_v6 = vsub.f32 %v3875_v51, %v4150_v15  ;;  %v5073_v15 = vld [vmem:[#allocation49_spill] sm:$0xff] }
 0x2f9   : > { %v4172_v29 = vpop.permute.xlu1 %2066 }
 0x2fa   : > { %v1739_v55 = vpop.permute.xlu0 %1738  ;;  %2146 = vperm.xlu1 %2832, %v1624_v11  }
 0x2fb   : > { %2834 = vset.pattern.permute.xlu0 %v2989_v48  ;;  %v1874_v28 = vsub.f32 %v3894_v40, %v1739_v55  ;;  %v1895_v40 = vsub.f32 %v3867_v49, %v4158_v5  ;;  %v5077_v49 = vld [vmem:[#allocation105_spill] sm:$0xff] }
 0x2fc   : > { %2372 = vperm.xlu0 %2834, %v1890_v12  }
 0x2fd   : > { %v1737_v58 = vpop.permute.xlu1 %1736 }
 0x2fe   : > { %v1787_v57 = vpop.permute.xlu0 %1786  ;;  %1768 = vrot.lane.b32.xlu1 %v1649_v42, %s2988_s30 }
 0x2ff   : > { %2833 = vset.pattern.permute.xlu1 %v2989_v48  ;;  %v5072_v48 = vld [vmem:[#allocation47_spill] sm:$0xff]  ;;  %v1898_v56 = vsub.f32 %v3899_v27, %v1787_v57  ;;  %v5075_v27 = vld [vmem:[#allocation54_spill] sm:$0xff] }
 0x300   : > { %2257 = vperm.xlu0 %2834, %v1867_v52   ;;  %v1871_v52 = vsub.f32 %v3860_v38, %v4147_v1 }
 0x301   : > { %v4181_v10 = vpop.permute.xlu1 %1784 }
 0x302   : > { %v4185_v3 = vpop.permute.xlu0 %1961  ;;  %1816 = vrot.lane.b32.xlu1 %v1673_v53, %s2988_s30  ;;  %v1897_v5 = vsub.f32 %v5077_v49, %v4181_v10  ;;  %v5087_v49 = vld [vmem:[#allocation64_spill] sm:$0xff] }
 0x304   : > { %2382 = vperm.xlu0 %2834, %v1892_v61  }
 0x305   : > { %v4190_v62 = vpop.permute.xlu1 %1956 }
 0x306   : > { %v4194_v11 = vpop.permute.xlu0 %2081  ;;  %2252 = vperm.xlu1 %2833, %v1866_v25  }
 0x308   : > { %2272 = vperm.xlu0 %2834, %v1870_v22   ;;  %v5074_v22 = vld [vmem:[#allocation98_spill] sm:$0xff] }
 0x309   : > { %v4198_v33 = vpop.permute.xlu1 %2076 }
 0x30a   : > { %v1743_v63 = vpop.permute.xlu0 %1742  ;;  %2377 = vperm.xlu1 %2833, %v1891_v18   ;;  %v1873_v18 = vsub.f32 %v5074_v22, %v1737_v58 }
 0x30b   : > { %v1876_v61 = vsub.f32 %v3918_v21, %v1743_v63 }
 0x30c   : > { %2392 = vperm.xlu0 %2834, %v1894_v23  }
 0x30d   : > { %v1741_v0 = vpop.permute.xlu1 %1740 }
 0x30e   : > { %v1791_v7 = vpop.permute.xlu0 %1790  ;;  %2262 = vperm.xlu1 %2833, %v1868_v44   ;;  %v5076_v44 = vld [vmem:[#allocation56_spill] sm:$0xff] }
 0x30f   : > { %v1900_v1 = vsub.f32 %v3923_v24, %v1791_v7  ;;  %v5079_v24 = vld [vmem:[#allocation52_spill] sm:$0xff] }
 0x310   : > { %2282 = vperm.xlu0 %2834, %v1872_v34  }
 0x311   : > { %v1789_v50 = vpop.permute.xlu1 %1788 }
 0x312   : > { %v1972_v37 = vpop.permute.xlu0 %1971  ;;  %2267 = vperm.xlu1 %2833, %v1869_v31   ;;  %v5078_v31 = vld [vmem:[#allocation50_spill] sm:$0xff] }
 0x313   : > { %v4210_v12 = vmul.f32 %v1972_v37, %v5070_v45  ;;  %v4213_v9 = vmul.f32 %v1972_v37, %v5071_v32  ;;  %v5080_v37 = vld [vmem:[#allocation55_spill] sm:$0xff]  ;;  %v5081_v32 = vld [vmem:[#allocation57_spill] sm:$0xff] }
 0x314   : > { %2402 = vperm.xlu0 %2834, %v1896_v6  }
 0x315   : > { %v4217_v14 = vpop.permute.xlu1 %1966 }
 0x316   : > { %v2092_v47 = vpop.permute.xlu0 %2091  ;;  %2387 = vperm.xlu1 %2833, %v1893_v17  }
 0x317   : > { %v4221_v51 = vmul.f32 %v2092_v47, %v5072_v48  ;;  %v4224_v42 = vmul.f32 %v2092_v47, %v5073_v15  ;;  %v5083_v15 = vld [vmem:[#allocation51_spill] sm:$0xff] }
 0x318   : > { %2292 = vperm.xlu0 %2834, %v1874_v28   ;;  %v5082_v28 = vld [vmem:[#allocation106_spill] sm:$0xff] }
 0x319   : > { %v4228_v53 = vpop.permute.xlu1 %2086  ;;  %v1875_v10 = vsub.f32 %v5082_v28, %v1741_v0  ;;  %v5085_v0 = vld [vmem:[#allocation107_spill] sm:$0xff] }
 0x31a   : > { %v1747_v43 = vpop.permute.xlu0 %1746  ;;  %2277 = vperm.xlu1 %2833, %v1871_v52  }
 0x31b   : > { %v1878_v63 = vsub.f32 %v3944_v46, %v1747_v43 }
 0x31c   : > { %2412 = vperm.xlu0 %2834, %v1898_v56   ;;  %v5084_v56 = vld [vmem:[#allocation53_spill] sm:$0xff] }
 0x31d   : > { %v1745_v55 = vpop.permute.xlu1 %1744 }
 0x31e   : > { %v1795_v25 = vpop.permute.xlu0 %1794  ;;  %2397 = vperm.xlu1 %2833, %v1895_v40   ;;  %v1899_v40 = vsub.f32 %v3915_v8, %v1789_v50 }
 0x31f   : > { %v1902_v46 = vsub.f32 %v3949_v39, %v1795_v25 }
 0x320   : > { %2302 = vperm.xlu0 %2834, %v1876_v61  }
 0x321   : > { %v1793_v38 = vpop.permute.xlu1 %1792 }
 0x322   : > { %v1982_v23 = vpop.permute.xlu0 %1981  ;;  %2287 = vperm.xlu1 %2833, %v1873_v18   ;;  %v1901_v8 = vsub.f32 %v3941_v26, %v1793_v38  ;;  %v5093_v38 = vld [vmem:[#allocation59_spill] sm:$0xff] }
 0x323   : > { %v4237_v57 = vmul.f32 %v1982_v23, %v5075_v27  ;;  %v4240_v34 = vmul.f32 %v1982_v23, %v5076_v44  ;;  %v5086_v27 = vld [vmem:[#allocation62_spill] sm:$0xff] }
 0x324   : > { %2422 = vperm.xlu0 %2834, %v1900_v1   ;;  %v1877_v1 = vsub.f32 %v5085_v0, %v1745_v55  ;;  %v5089_v55 = vld [vmem:[#allocation60_spill] sm:$0xff] }
 0x325   : > { %v1977_v21 = vpop.permute.xlu1 %1976 }
 0x326   : > { %v2102_v58 = vpop.permute.xlu0 %2101  ;;  %v4246_v6 = vmul.f32 %v1977_v21, %v5078_v31  ;;  %v4249_v7 = vmul.f32 %v1977_v21, %v5079_v24  ;;  %2407 = vperm.xlu1 %2833, %v1897_v5   ;;  %v5088_v21 = vld [vmem:[#allocation58_spill] sm:$0xff]  ;;  %v5091_v24 = vld [vmem:[#allocation65_spill] sm:$0xff] }
 0x327   : > { %v4252_v45 = vmul.f32 %v2102_v58, %v5080_v37  ;;  %v4255_v17 = vmul.f32 %v2102_v58, %v5081_v32  ;;  %v5092_v32 = vld [vmem:[#allocation108_spill] sm:$0xff] }
 0x328   : > { %2312 = vperm.xlu0 %2834, %v1878_v63  }
 0x329   : > { %v2097_v47 = vpop.permute.xlu1 %2096 }
 0x32a   : > { %v1751_v48 = vpop.permute.xlu0 %1750  ;;  %v4260_v52 = vmul.f32 %v2097_v47, %v5083_v15  ;;  %v4263_v43 = vmul.f32 %v2097_v47, %v5084_v56  ;;  %2297 = vperm.xlu1 %2833, %v1875_v10  }
 0x32b   : > { %v1880_v22 = vsub.f32 %v3970_v2, %v1751_v48 }
 0x32c   : > { %2432 = vperm.xlu0 %2834, %v1902_v46   ;;  %v5094_v46 = vld [vmem:[#allocation61_spill] sm:$0xff] }
 0x32d   : > { %v1749_v61 = vpop.permute.xlu1 %1748 }
 0x32e   : > { %v1799_v18 = vpop.permute.xlu0 %1798  ;;  %2417 = vperm.xlu1 %2833, %v1899_v40   ;;  %v1879_v28 = vsub.f32 %v5092_v32, %v1749_v61  ;;  %v5095_v61 = vld [vmem:[#allocation109_spill] sm:$0xff] }
 0x32f   : > { %v1904_v25 = vsub.f32 %v3977_v59, %v1799_v18  ;;  %v5090_v59 = vld [vmem:[#allocation63_spill] sm:$0xff] }
 0x330   : > { %2322 = vperm.xlu0 %2834, %v1880_v22  }
 0x331   : > { %v1797_v39 = vpop.permute.xlu1 %1796 }
 0x332   : > { %v1992_v23 = vpop.permute.xlu0 %1991  ;;  %2307 = vperm.xlu1 %2833, %v1877_v1   ;;  %v1903_v56 = vsub.f32 %v3967_v54, %v1797_v39 }
 0x333   : > { %v4270_v44 = vmul.f32 %v1992_v23, %v5086_v27  ;;  %v4273_v5 = vmul.f32 %v1992_v23, %v5087_v49  ;;  %v5096_v23 = vld [vmem:[#allocation70_spill] sm:$0xff]  ;;  %v5097_v49 = vld [vmem:[#allocation72_spill] sm:$0xff] }
 0x334   : > { %2442 = vperm.xlu0 %2834, %v1904_v25  }
 0x335   : > { %v1987_v2 = vpop.permute.xlu1 %1986 }
 0x336   : > { %v2112_v50 = vpop.permute.xlu0 %2111  ;;  %v4277_v63 = vmul.f32 %v1987_v2, %v5088_v21  ;;  %v4280_v58 = vmul.f32 %v1987_v2, %v5089_v55  ;;  %2427 = vperm.xlu1 %2833, %v1901_v8   ;;  %v5098_v2 = vld [vmem:[#allocation66_spill] sm:$0xff]  ;;  %v5100_v55 = vld [vmem:[#allocation71_spill] sm:$0xff] }
 0x337   : > { %v4283_v31 = vmul.f32 %v2112_v50, %v5090_v59  ;;  %v4286_v37 = vmul.f32 %v2112_v50, %v5091_v24  ;;  %v5101_v24 = vld [vmem:[#allocation73_spill] sm:$0xff] }
 0x339   : > { %v2107_v10 = vpop.permute.xlu1 %2106 }
 0x33a   : > { %v1755_v26 = vpop.permute.xlu0 %1754  ;;  %v4290_v47 = vmul.f32 %v2107_v10, %v5093_v38  ;;  %v4293_v48 = vmul.f32 %v2107_v10, %v5094_v46  ;;  %2317 = vperm.xlu1 %2833, %v1879_v28  }
 0x33b   : > { %v1882_v15 = vsub.f32 %v4005_v19, %v1755_v26  ;;  %v5102_v26 = vld [vmem:[#allocation67_spill] sm:$0xff] }
 0x33d   : > { %2332 = vperm.xlu0 %2834, %v1882_v15   ;;  %v1753_v40 = vpop.permute.xlu1 %1752 }
 0x33e   : > { %v1803_v22 = vpop.permute.xlu0 %1802  ;;  %2437 = vperm.xlu1 %2833, %v1903_v56   ;;  %v1881_v0 = vsub.f32 %v5095_v61, %v1753_v40 }
 0x33f   : > { %v1906_v18 = vsub.f32 %v4012_v4, %v1803_v22  ;;  %v5099_v4 = vld [vmem:[#allocation68_spill] sm:$0xff] }
 0x341   : > { %2452 = vperm.xlu0 %2834, %v1906_v18   ;;  %v1801_v1 = vpop.permute.xlu1 %1800 }
 0x342   : > { %v2002_v25 = vpop.permute.xlu0 %2001  ;;  %2327 = vperm.xlu1 %2833, %v1881_v0   ;;  %v1905_v54 = vsub.f32 %v4002_v36, %v1801_v1  ;;  %v5103_v36 = vld [vmem:[#allocation69_spill] sm:$0xff] }
 0x343   : > { %v4300_v27 = vmul.f32 %v2002_v25, %v5096_v23  ;;  %v4303_v8 = vmul.f32 %v2002_v25, %v5097_v49  ;;  %v5104_v25 = vld [vmem:[#allocation78_spill] sm:$0xff]  ;;  %v5105_v49 = vld [vmem:[#allocation80_spill] sm:$0xff] }
 0x345   : > { %v1997_v19 = vpop.permute.xlu1 %1996 }
 0x346   : > { %v2122_v39 = vpop.permute.xlu0 %2121  ;;  %v4307_v50 = vmul.f32 %v1997_v19, %v5098_v2  ;;  %v4310_v21 = vmul.f32 %v1997_v19, %v5099_v4  ;;  %2447 = vperm.xlu1 %2833, %v1905_v54   ;;  %v5108_v4 = vld [vmem:[#allocation79_spill] sm:$0xff] }
 0x347   : > { %v4313_v59 = vmul.f32 %v2122_v39, %v5100_v55  ;;  %v4316_v32 = vmul.f32 %v2122_v39, %v5101_v24  ;;  %v5106_v39 = vld [vmem:[#allocation74_spill] sm:$0xff]  ;;  %v5110_v24 = vld [vmem:[#allocation81_spill] sm:$0xff] }
 0x349   : > { %v2117_v28 = vpop.permute.xlu1 %2116 }
 0x34a   : > { %v1759_v10 = vpop.permute.xlu0 %1758  ;;  %v4319_v38 = vmul.f32 %v2117_v28, %v5102_v26  ;;  %v4322_v46 = vmul.f32 %v2117_v28, %v5103_v36  ;;  %v5112_v26 = vld [vmem:[#allocation75_spill] sm:$0xff] }
 0x34b   : > { %v1884_v15 = vsub.f32 %v4043_v41, %v1759_v10 }
 0x34d   : > { %2342 = vperm.xlu0 %2834, %v1884_v15   ;;  %v1757_v56 = vpop.permute.xlu1 %1756  ;;  %v5113_v15 = vld [vmem:[#allocation77_spill] sm:$0xff] }
 0x34e   : > { %v1807_v40 = vpop.permute.xlu0 %1806  ;;  %v1883_v22 = vsub.f32 %v4028_v30, %v1757_v56  ;;  %v5107_v30 = vld [vmem:[#allocation76_spill] sm:$0xff] }
 0x34f   : > { %v1908_v18 = vsub.f32 %v4053_v35, %v1807_v40 }
 0x350   : > { %2337 = vperm.xlu1 %2833, %v1883_v22  }
 0x351   : > { %2462 = vperm.xlu0 %2834, %v1908_v18   ;;  %v1805_v61 = vpop.permute.xlu1 %1804 }
 0x352   : > { %v2012_v0 = vpop.permute.xlu0 %2011  ;;  %v1907_v1 = vsub.f32 %v4040_v16, %v1805_v61  ;;  %v5114_v61 = vld [vmem:[#allocation114_spill] sm:$0xff] }
 0x353   : > { %v4329_v23 = vmul.f32 %v2012_v0, %v5104_v25  ;;  %v4332_v54 = vmul.f32 %v2012_v0, %v5105_v49 }
 0x354   : > { %2457 = vperm.xlu1 %2833, %v1907_v1   ;;  %v5115_v1 = vld [vmem:[#allocation120_spill] sm:$0xff] }
 0x355   : > { %v2007_v41 = vpop.permute.xlu1 %2006 }
 0x356   : > { %v2132_v19 = vpop.permute.xlu0 %2131  ;;  %v4335_v2 = vmul.f32 %v2007_v41, %v5106_v39  ;;  %v4338_v35 = vmul.f32 %v2007_v41, %v5107_v30  ;;  %v5117_v30 = vld [vmem:[#allocation86_spill] sm:$0xff] }
 0x357   : > { %v4341_v55 = vmul.f32 %v2132_v19, %v5108_v4  ;;  %v4344_v16 = vmul.f32 %v2132_v19, %v5110_v24  ;;  %v5116_v19 = vld [vmem:[#allocation117_spill] sm:$0xff]  ;;  %v5119_v24 = vld [vmem:[#allocation88_spill] sm:$0xff] }
 0x359   : > { %5109 = vst [vmem:[#allocation46_spill] sm:$0xff] %v4341_v55  ;;  %5111 = vst [vmem:[#allocation48_spill] sm:$0xff] %v4344_v16  ;;  %v2127_v28 = vpop.permute.xlu1 %2126  ;;  %v5134_v16 = vld [vmem:[#allocation94_spill] sm:$0xff] }
 0x35a   : > { %v1763_v10 = vpop.permute.xlu0 %1762  ;;  %v4347_v36 = vmul.f32 %v2127_v28, %v5112_v26  ;;  %v4350_v56 = vmul.f32 %v2127_v28, %v5113_v15  ;;  %v5121_v26 = vld [vmem:[#allocation82_spill] sm:$0xff] }
 0x35b   : > { %v1886_v40 = vsub.f32 %v4087_v60, %v1763_v10 }
 0x35d   : > { %2352 = vperm.xlu0 %2834, %v1886_v40   ;;  %v1761_v22 = vpop.permute.xlu1 %1760  ;;  %v5122_v40 = vld [vmem:[#allocation84_spill] sm:$0xff] }
 0x35e   : > { %v1811_v18 = vpop.permute.xlu0 %1810  ;;  %v1885_v0 = vsub.f32 %v5114_v61, %v1761_v22 }
 0x35f   : > { %v1910_v25 = vsub.f32 %v5115_v1, %v1811_v18  ;;  %v5123_v18 = vld [vmem:[#allocation87_spill] sm:$0xff] }
 0x360   : > { %2347 = vperm.xlu1 %2833, %v1885_v0   ;;  %v5125_v0 = vld [vmem:[#allocation89_spill] sm:$0xff] }
 0x361   : > { %2472 = vperm.xlu0 %2834, %v1910_v25   ;;  %v1809_v49 = vpop.permute.xlu1 %1808 }
 0x362   : > { %v2022_v41 = vpop.permute.xlu0 %2021  ;;  %v1909_v39 = vsub.f32 %v5116_v19, %v1809_v49  ;;  %v5127_v19 = vld [vmem:[#allocation83_spill] sm:$0xff] }
 0x363   : > { %v4357_v4 = vmul.f32 %v2022_v41, %v5117_v30  ;;  %v4360_v28 = vmul.f32 %v2022_v41, %v5119_v24  ;;  %v5130_v24 = vld [vmem:[#allocation121_spill] sm:$0xff] }
 0x364   : > { %2467 = vperm.xlu1 %2833, %v1909_v39   ;;  %v5128_v39 = vld [vmem:[#allocation85_spill] sm:$0xff] }
 0x365   : > { %5118 = vst [vmem:[#allocation47_spill] sm:$0xff] %v4357_v4  ;;  %5120 = vst [vmem:[#allocation49_spill] sm:$0xff] %v4360_v28  ;;  %v2017_v60 = vpop.permute.xlu1 %2016 }
 0x366   : > { %v2142_v10 = vpop.permute.xlu0 %2141  ;;  %v4363_v15 = vmul.f32 %v2017_v60, %v5121_v26  ;;  %v4366_v22 = vmul.f32 %v2017_v60, %v5122_v40  ;;  %v5131_v40 = vld [vmem:[#allocation99_spill] sm:$0xff] }
 0x367   : > { %v4369_v61 = vmul.f32 %v2142_v10, %v5123_v18  ;;  %v4372_v1 = vmul.f32 %v2142_v10, %v5125_v0  ;;  %v5132_v18 = vld [vmem:[#allocation124_spill] sm:$0xff] }
 0x369   : > { %5124 = vst [vmem:[#allocation98_spill] sm:$0xff] %v4369_v61  ;;  %5126 = vst [vmem:[#allocation54_spill] sm:$0xff] %v4372_v1  ;;  %v2137_v25 = vpop.permute.xlu1 %2136  ;;  %v5133_v1 = vld [vmem:[#allocation100_spill] sm:$0xff] }
 0x36a   : > { %v1767_v49 = vpop.permute.xlu0 %1766  ;;  %v4375_v41 = vmul.f32 %v2137_v25, %v5127_v19  ;;  %v4378_v30 = vmul.f32 %v2137_v25, %v5128_v39  ;;  %v5136_v25 = vld [vmem:[#allocation96_spill] sm:$0xff] }
 0x36b   : > { %v1888_v26 = vsub.f32 %v5130_v24, %v1767_v49 }
 0x36c   : > { %5129 = vst [vmem:[#allocation56_spill] sm:$0xff] %v4378_v30  ;;  %v5165_v30 = vld [vmem:[#allocation7_spill] sm:$0xff] }
 0x36d   : > { %2362 = vperm.xlu0 %2834, %v1888_v26   ;;  %v1765_v28 = vpop.permute.xlu1 %1764  ;;  %v5138_v26 = vld [vmem:[#allocation90_spill] sm:$0xff] }
 0x36e   : > { %v1815_v60 = vpop.permute.xlu0 %1814  ;;  %v1887_v4 = vsub.f32 %v5131_v40, %v1765_v28  ;;  %v5140_v40 = vld [vmem:[#allocation92_spill] sm:$0xff] }
 0x36f   : > { %v1912_v61 = vsub.f32 %v5132_v18, %v1815_v60  ;;  %v5144_v18 = vld [vmem:[#allocation97_spill] sm:$0xff] }
 0x370   : > { %2357 = vperm.xlu1 %2833, %v1887_v4   ;;  %v5142_v4 = vld [vmem:[#allocation95_spill] sm:$0xff] }
 0x371   : > { %2482 = vperm.xlu0 %2834, %v1912_v61   ;;  %v1813_v10 = vpop.permute.xlu1 %1812 }
 0x372   : > { %v2032_v0 = vpop.permute.xlu0 %2031  ;;  %v1911_v19 = vsub.f32 %v5133_v1, %v1813_v10  ;;  %v5146_v10 = vld [vmem:[#allocation3_spill] sm:$0xff] }
 0x373   : > { %v4385_v55 = vmul.f32 %v2032_v0, %v5134_v16  ;;  %v4388_v39 = vmul.f32 %v2032_v0, %v5136_v25  ;;  %v5147_v0 = vld [vmem:[#allocation111_spill] sm:$0xff] }
 0x374   : > { %2477 = vperm.xlu1 %2833, %v1911_v19   ;;  %v2202_v25 = vmul.f32 %v5147_v0, %v5146_v10  ;;  %v5148_v19 = vld [vmem:[#allocation5_spill] sm:$0xff]  ;;  %v5153_v10 = vld [vmem:[#allocation6_spill] sm:$0xff] }
 0x375   : > { %5135 = vst [vmem:[#allocation105_spill] sm:$0xff] %v4385_v55  ;;  %5137 = vst [vmem:[#allocation50_spill] sm:$0xff] %v4388_v39  ;;  %v2027_v49 = vpop.permute.xlu1 %2026  ;;  %v2203_v39 = vmul.f32 %v5147_v0, %v5148_v19  ;;  %v5149_v55 = vld [vmem:[#allocation91_spill] sm:$0xff]  ;;  %v5154_v0 = vld [vmem:[#allocation112_spill] sm:$0xff] }
 0x376   : > { %v2152_v24 = vpop.permute.xlu0 %2151  ;;  %v4391_v28 = vmul.f32 %v2027_v49, %v5138_v26  ;;  %v4394_v60 = vmul.f32 %v2027_v49, %v5140_v40  ;;  %v5155_v19 = vld [vmem:[#allocation8_spill] sm:$0xff] }
 0x377   : > { %v4397_v61 = vmul.f32 %v2152_v24, %v5142_v4  ;;  %v4400_v1 = vmul.f32 %v2152_v24, %v5144_v18 }
 0x378   : > { %5139 = vst [vmem:[#allocation52_spill] sm:$0xff] %v4391_v28  ;;  %5141 = vst [vmem:[#allocation55_spill] sm:$0xff] %v4394_v60  ;;  %v5151_v28 = vld [vmem:[#allocation93_spill] sm:$0xff] }
 0x379   : > { %5143 = vst [vmem:[#allocation57_spill] sm:$0xff] %v4397_v61  ;;  %5145 = vst [vmem:[#allocation106_spill] sm:$0xff] %v4400_v1  ;;  %v2147_v16 = vpop.permute.xlu1 %2146  ;;  %v5158_v60 = vld [vmem:[#allocation13_spill] sm:$0xff] }
 0x37a   : > { %v4408_v26 = vmul.f32 %v2147_v16, %v5149_v55  ;;  %v4411_v49 = vmul.f32 %v2147_v16, %v5151_v28  ;;  %v2156_v55 = vmul.f32 %v5154_v0, %v5153_v10  ;;  %v2157_v28 = vmul.f32 %v5154_v0, %v5155_v19  ;;  %v5161_v0 = vld [vmem:[#allocation4_spill] sm:$0xff] }
 0x37b   : > { %v2373_v24 = vpop.permute.xlu0 %2372 }
 0x37c   : > { %5150 = vst [vmem:[#allocation51_spill] sm:$0xff] %v4408_v26  ;;  %5152 = vst [vmem:[#allocation53_spill] sm:$0xff] %v4411_v49  ;;  %v2538_v40 = vadd.f32 %v2373_v24, %v2202_v25  ;;  %v2539_v4 = vadd.f32 %v2373_v24, %v2203_v39  ;;  %v5156_v26 = vld [vmem:[#allocation11_spill] sm:$0xff]  ;;  %v5157_v39 = vld [vmem:[#allocation118_spill] sm:$0xff] }
 0x37d   : > { %v1769_v18 = vpop.permute.xlu1 %1768  ;;  %v2206_v24 = vmul.f32 %v5157_v39, %v5156_v26  ;;  %v2207_v10 = vmul.f32 %v5157_v39, %v5158_v60  ;;  %v5163_v60 = vld [vmem:[#allocation122_spill] sm:$0xff]  ;;  %v5164_v39 = vld [vmem:[#allocation20_spill] sm:$0xff] }
 0x37e   : > { %2634 = vst [vmem:[%s4416_s7 + $0x180] sm:$0xff] %v2538_v40  ;;  %2635 = vst.msk [vmem:[%s4416_s7 + $0x188] sm:$0xff] %vm760_vm0, %v2539_v4  ;;  %v1889_v16 = vsub.f32 %v4154_v13, %v1769_v18  ;;  %v5159_v13 = vld [vmem:[#allocation2_spill] sm:$0xff] }
 0x37f   : > { %v2258_v1 = vpop.permute.xlu0 %2257  ;;  %v5160_v18 = vld [vmem:[#allocation110_spill] sm:$0xff] }
 0x380   : > { %v2492_v61 = vadd.f32 %v2258_v1, %v2156_v55  ;;  %v2493_v49 = vadd.f32 %v2258_v1, %v2157_v28  ;;  %2367 = vperm.xlu1 %2833, %v1889_v16   ;;  %v2154_v1 = vmul.f32 %v5160_v18, %v5159_v13  ;;  %v2155_v55 = vmul.f32 %v5160_v18, %v5161_v0  ;;  %v5162_v16 = vld [vmem:[#allocation18_spill] sm:$0xff]  ;;  %v5166_v18 = vld [vmem:[#allocation113_spill] sm:$0xff] }
 0x381   : > { %v1817_v25 = vpop.permute.xlu1 %1816 }
 0x382   : > { %2588 = vst [vmem:[%s4416_s7 + $0x10] sm:$0xff] %v2492_v61  ;;  %2589 = vst.msk [vmem:[%s4416_s7 + $0x18] sm:$0xff] %vm760_vm0, %v2493_v49  ;;  %v1913_v40 = vsub.f32 %v4165_v20, %v1817_v25  ;;  %v2162_v61 = vmul.f32 %v5163_v60, %v5162_v16  ;;  %v2163_v20 = vmul.f32 %v5163_v60, %v5164_v39  ;;  %v5169_v60 = vld [vmem:[#allocation125_spill] sm:$0xff] }
 0x383   : > { %v2383_v4 = vpop.permute.xlu0 %2382 }
 0x384   : > { %v2542_v19 = vadd.f32 %v2383_v4, %v2206_v24  ;;  %v2543_v28 = vadd.f32 %v2383_v4, %v2207_v10  ;;  %2487 = vperm.xlu1 %2833, %v1913_v40   ;;  %v2204_v24 = vmul.f32 %v5166_v18, %v5165_v30  ;;  %v5167_v10 = vld [vmem:[#allocation9_spill] sm:$0xff] }
 0x385   : > { %v2253_v26 = vpop.permute.xlu1 %2252  ;;  %v2205_v40 = vmul.f32 %v5166_v18, %v5167_v10  ;;  %v5172_v18 = vld [vmem:[#allocation115_spill] sm:$0xff] }
 0x386   : > { %2638 = vst [vmem:[%s4416_s7 + $0x1a0] sm:$0xff] %v2542_v19  ;;  %2639 = vst.msk [vmem:[%s4416_s7 + $0x1a8] sm:$0xff] %vm760_vm0, %v2543_v28  ;;  %v2490_v49 = vadd.f32 %v2253_v26, %v2154_v1  ;;  %v2491_v25 = vadd.f32 %v2253_v26, %v2155_v55  ;;  %v5168_v19 = vld [vmem:[#allocation19_spill] sm:$0xff]  ;;  %v5170_v1 = vld [vmem:[#allocation21_spill] sm:$0xff] }
 0x387   : > { %v2273_v13 = vpop.permute.xlu0 %2272  ;;  %v2210_v28 = vmul.f32 %v5169_v60, %v5168_v19  ;;  %v2211_v55 = vmul.f32 %v5169_v60, %v5170_v1  ;;  %v5175_v60 = vld [vmem:[#allocation104_spill] sm:$0xff] }
 0x388   : > { %2586 = vst [vmem:[%s4416_s7] sm:$0xff] %v2490_v49  ;;  %2587 = vst.msk [vmem:[%s4416_s7 + $0x8] sm:$0xff] %vm760_vm0, %v2491_v25  ;;  %v2498_v4 = vadd.f32 %v2273_v13, %v2162_v61  ;;  %v2499_v0 = vadd.f32 %v2273_v13, %v2163_v20  ;;  %v5171_v49 = vld [vmem:[#allocation10_spill] sm:$0xff]  ;;  %v5173_v61 = vld [vmem:[#allocation12_spill] sm:$0xff] }
 0x389   : > { %v2378_v16 = vpop.permute.xlu1 %2377  ;;  %v2158_v25 = vmul.f32 %v5172_v18, %v5171_v49  ;;  %v2159_v20 = vmul.f32 %v5172_v18, %v5173_v61  ;;  %v5178_v18 = vld [vmem:[#allocation116_spill] sm:$0xff] }
 0x38a   : > { %2594 = vst [vmem:[%s4416_s7 + $0x40] sm:$0xff] %v2498_v4  ;;  %2595 = vst.msk [vmem:[%s4416_s7 + $0x48] sm:$0xff] %vm760_vm0, %v2499_v0  ;;  %v2540_v30 = vadd.f32 %v2378_v16, %v2204_v24  ;;  %v2541_v26 = vadd.f32 %v2378_v16, %v2205_v40  ;;  %v5174_v4 = vld [vmem:[#allocation26_spill] sm:$0xff]  ;;  %v5176_v24 = vld [vmem:[#allocation28_spill] sm:$0xff] }
 0x38b   : > { %v2393_v39 = vpop.permute.xlu0 %2392  ;;  %v2166_v0 = vmul.f32 %v5175_v60, %v5174_v4  ;;  %v2167_v40 = vmul.f32 %v5175_v60, %v5176_v24 }
 0x38c   : > { %2636 = vst [vmem:[%s4416_s7 + $0x190] sm:$0xff] %v2540_v30  ;;  %2637 = vst.msk [vmem:[%s4416_s7 + $0x198] sm:$0xff] %vm760_vm0, %v2541_v26  ;;  %v2546_v13 = vadd.f32 %v2393_v39, %v2210_v28  ;;  %v2547_v10 = vadd.f32 %v2393_v39, %v2211_v55  ;;  %v5177_v30 = vld [vmem:[#allocation14_spill] sm:$0xff]  ;;  %v5179_v28 = vld [vmem:[#allocation16_spill] sm:$0xff] }
 0x38d   : > { %v2263_v19 = vpop.permute.xlu1 %2262  ;;  %v2160_v26 = vmul.f32 %v5178_v18, %v5177_v30  ;;  %v2161_v55 = vmul.f32 %v5178_v18, %v5179_v28  ;;  %v5183_v30 = vld [vmem:[#allocation119_spill] sm:$0xff]  ;;  %v5185_v28 = vld [vmem:[#allocation34_spill] sm:$0xff] }
 0x38e   : > { %2642 = vst [vmem:[%s4416_s7 + $0x1c0] sm:$0xff] %v2546_v13  ;;  %2643 = vst.msk [vmem:[%s4416_s7 + $0x1c8] sm:$0xff] %vm760_vm0, %v2547_v10  ;;  %v2494_v16 = vadd.f32 %v2263_v19, %v2158_v25  ;;  %v2495_v1 = vadd.f32 %v2263_v19, %v2159_v20  ;;  %v5180_v13 = vld [vmem:[#allocation27_spill] sm:$0xff]  ;;  %v5181_v25 = vld [vmem:[#allocation29_spill] sm:$0xff] }
 0x38f   : > { %v2283_v49 = vpop.permute.xlu0 %2282  ;;  %v2214_v10 = vmul.f32 %v4172_v29, %v5180_v13  ;;  %v2215_v20 = vmul.f32 %v4172_v29, %v5181_v25  ;;  %v5187_v25 = vld [vmem:[#allocation22_spill] sm:$0xff] }
 0x390   : > { %2590 = vst [vmem:[%s4416_s7 + $0x20] sm:$0xff] %v2494_v16  ;;  %2591 = vst.msk [vmem:[%s4416_s7 + $0x28] sm:$0xff] %vm760_vm0, %v2495_v1  ;;  %v2502_v39 = vadd.f32 %v2283_v49, %v2166_v0  ;;  %v2503_v61 = vadd.f32 %v2283_v49, %v2167_v40  ;;  %v5182_v16 = vld [vmem:[#allocation15_spill] sm:$0xff]  ;;  %v5184_v0 = vld [vmem:[#allocation17_spill] sm:$0xff] }
 0x391   : > { %v2268_v4 = vpop.permute.xlu1 %2267  ;;  %v2208_v1 = vmul.f32 %v5183_v30, %v5182_v16  ;;  %v2209_v40 = vmul.f32 %v5183_v30, %v5184_v0  ;;  %v5190_v30 = vld [vmem:[#allocation35_spill] sm:$0xff] }
 0x392   : > { %2598 = vst [vmem:[%s4416_s7 + $0x60] sm:$0xff] %v2502_v39  ;;  %2599 = vst.msk [vmem:[%s4416_s7 + $0x68] sm:$0xff] %vm760_vm0, %v2503_v61  ;;  %v2496_v19 = vadd.f32 %v2268_v4, %v2160_v26  ;;  %v2497_v60 = vadd.f32 %v2268_v4, %v2161_v55  ;;  %v2170_v39 = vmul.f32 %v4190_v62, %v5185_v28  ;;  %v5186_v26 = vld [vmem:[#allocation36_spill] sm:$0xff]  ;;  %v5192_v28 = vld [vmem:[#allocation23_spill] sm:$0xff] }
 0x393   : > { %v2403_v24 = vpop.permute.xlu0 %2402  ;;  %v2171_v55 = vmul.f32 %v4190_v62, %v5186_v26  ;;  %v2218_v0 = vmul.f32 %v4198_v33, %v5190_v30  ;;  %v5193_v26 = vld [vmem:[#allocation123_spill] sm:$0xff]  ;;  %v5198_v30 = vld [vmem:[#allocation102_spill] sm:$0xff] }
 0x394   : > { %2592 = vst [vmem:[%s4416_s7 + $0x30] sm:$0xff] %v2496_v19  ;;  %2593 = vst.msk [vmem:[%s4416_s7 + $0x38] sm:$0xff] %vm760_vm0, %v2497_v60  ;;  %v2550_v49 = vadd.f32 %v2403_v24, %v2214_v10  ;;  %v2551_v29 = vadd.f32 %v2403_v24, %v2215_v20  ;;  %v5188_v19 = vld [vmem:[#allocation101_spill] sm:$0xff]  ;;  %v5189_v10 = vld [vmem:[#allocation24_spill] sm:$0xff] }
 0x395   : > { %v2388_v18 = vpop.permute.xlu1 %2387  ;;  %v2164_v60 = vmul.f32 %v5188_v19, %v5187_v25  ;;  %v2165_v20 = vmul.f32 %v5188_v19, %v5189_v10  ;;  %v5195_v25 = vld [vmem:[#allocation42_spill] sm:$0xff] }
 0x396   : > { %2646 = vst [vmem:[%s4416_s7 + $0x1e0] sm:$0xff] %v2550_v49  ;;  %2647 = vst.msk [vmem:[%s4416_s7 + $0x1e8] sm:$0xff] %vm760_vm0, %v2551_v29  ;;  %v2544_v61 = vadd.f32 %v2388_v18, %v2208_v1  ;;  %v2545_v4 = vadd.f32 %v2388_v18, %v2209_v40  ;;  %v5191_v1 = vld [vmem:[#allocation37_spill] sm:$0xff]  ;;  %v2174_v19 = vmul.f32 %v4217_v14, %v5195_v25 }
 0x397   : > { %v2293_v13 = vpop.permute.xlu0 %2292  ;;  %v2219_v40 = vmul.f32 %v4198_v33, %v5191_v1 }
 0x398   : > { %2640 = vst [vmem:[%s4416_s7 + $0x1b0] sm:$0xff] %v2544_v61  ;;  %2641 = vst.msk [vmem:[%s4416_s7 + $0x1b8] sm:$0xff] %vm760_vm0, %v2545_v4  ;;  %v2506_v24 = vadd.f32 %v2293_v13, %v2170_v39  ;;  %v2507_v62 = vadd.f32 %v2293_v13, %v2171_v55  ;;  %v2212_v61 = vmul.f32 %v5193_v26, %v5192_v28  ;;  %v5194_v39 = vld [vmem:[#allocation25_spill] sm:$0xff] }
 0x399   : > { %v2278_v16 = vpop.permute.xlu1 %2277  ;;  %v2213_v55 = vmul.f32 %v5193_v26, %v5194_v39  ;;  %v5201_v26 = vld [vmem:[#allocation45_spill] sm:$0xff] }
 0x39a   : > { %2602 = vst [vmem:[%s4416_s7 + $0x80] sm:$0xff] %v2506_v24  ;;  %2603 = vst.msk [vmem:[%s4416_s7 + $0x88] sm:$0xff] %vm760_vm0, %v2507_v62  ;;  %v2500_v49 = vadd.f32 %v2278_v16, %v2164_v60  ;;  %v2501_v29 = vadd.f32 %v2278_v16, %v2165_v20  ;;  %v5196_v60 = vld [vmem:[#allocation44_spill] sm:$0xff]  ;;  %v5197_v16 = vld [vmem:[#allocation30_spill] sm:$0xff] }
 0x39b   : > { %v2413_v18 = vpop.permute.xlu0 %2412  ;;  %v2175_v10 = vmul.f32 %v4217_v14, %v5196_v60  ;;  %v2168_v1 = vmul.f32 %v5198_v30, %v5197_v16 }
 0x39c   : > { %2596 = vst [vmem:[%s4416_s7 + $0x50] sm:$0xff] %v2500_v49  ;;  %2597 = vst.msk [vmem:[%s4416_s7 + $0x58] sm:$0xff] %vm760_vm0, %v2501_v29  ;;  %v2554_v4 = vadd.f32 %v2413_v18, %v2218_v0  ;;  %v2555_v33 = vadd.f32 %v2413_v18, %v2219_v40  ;;  %v5199_v0 = vld [vmem:[#allocation32_spill] sm:$0xff]  ;;  %v5200_v18 = vld [vmem:[#allocation43_spill] sm:$0xff] }
 0x39d   : > { %v2398_v13 = vpop.permute.xlu1 %2397  ;;  %v2169_v40 = vmul.f32 %v5198_v30, %v5199_v0  ;;  %v2222_v28 = vmul.f32 %v4228_v53, %v5200_v18  ;;  %v5205_v30 = vld [vmem:[#allocation38_spill] sm:$0xff]  ;;  %v5206_v0 = vld [vmem:[#allocation40_spill] sm:$0xff] }
 0x39e   : > { %2650 = vst [vmem:[%s4416_s7 + $0x200] sm:$0xff] %v2554_v4  ;;  %2651 = vst.msk [vmem:[%s4416_s7 + $0x208] sm:$0xff] %vm760_vm0, %v2555_v33  ;;  %v2548_v20 = vadd.f32 %v2398_v13, %v2212_v61  ;;  %v2549_v24 = vadd.f32 %v2398_v13, %v2213_v55  ;;  %v2223_v61 = vmul.f32 %v4228_v53, %v5201_v26  ;;  %v5202_v33 = vld [vmem:[#allocation31_spill] sm:$0xff] }
 0x39f   : > { %v2303_v62 = vpop.permute.xlu0 %2302  ;;  %v5203_v13 = vld [vmem:[#allocation103_spill] sm:$0xff] }
 0x3a0   : > { %2644 = vst [vmem:[%s4416_s7 + $0x1d0] sm:$0xff] %v2548_v20  ;;  %2645 = vst.msk [vmem:[%s4416_s7 + $0x1d8] sm:$0xff] %vm760_vm0, %v2549_v24  ;;  %v2510_v49 = vadd.f32 %v2303_v62, %v2174_v19  ;;  %v2511_v14 = vadd.f32 %v2303_v62, %v2175_v10  ;;  %v2216_v25 = vmul.f32 %v5203_v13, %v5202_v33  ;;  %v5204_v19 = vld [vmem:[#allocation33_spill] sm:$0xff] }
 0x3a1   : > { %v2288_v29 = vpop.permute.xlu1 %2287  ;;  %v2217_v60 = vmul.f32 %v5203_v13, %v5204_v19 }
 0x3a2   : > { %2606 = vst [vmem:[%s4416_s7 + $0xa0] sm:$0xff] %v2510_v49  ;;  %2607 = vst.msk [vmem:[%s4416_s7 + $0xa8] sm:$0xff] %vm760_vm0, %v2511_v14  ;;  %v2504_v39 = vadd.f32 %v2288_v29, %v2168_v1  ;;  %v2505_v55 = vadd.f32 %v2288_v29, %v2169_v40  ;;  %v2172_v1 = vmul.f32 %v4185_v3, %v5205_v30 }
 0x3a3   : > { %v2423_v4 = vpop.permute.xlu0 %2422  ;;  %v2173_v40 = vmul.f32 %v4185_v3, %v5206_v0 }
 0x3a4   : > { %2600 = vst [vmem:[%s4416_s7 + $0x70] sm:$0xff] %v2504_v39  ;;  %2601 = vst.msk [vmem:[%s4416_s7 + $0x78] sm:$0xff] %vm760_vm0, %v2505_v55  ;;  %v2558_v10 = vadd.f32 %v2423_v4, %v2222_v28  ;;  %v2559_v53 = vadd.f32 %v2423_v4, %v2223_v61  ;;  %v5207_v61 = vld [vmem:[#allocation39_spill] sm:$0xff]  ;;  %v5208_v39 = vld [vmem:[#allocation41_spill] sm:$0xff] }
 0x3a5   : > { %v2408_v20 = vpop.permute.xlu1 %2407  ;;  %v2220_v3 = vmul.f32 %v4194_v11, %v5207_v61  ;;  %v2221_v55 = vmul.f32 %v4194_v11, %v5208_v39  ;;  %v5209_v61 = vld [vmem:[#allocation56_spill] sm:$0xff] }
 0x3a6   : > { %2654 = vst [vmem:[%s4416_s7 + $0x220] sm:$0xff] %v2558_v10  ;;  %2655 = vst.msk [vmem:[%s4416_s7 + $0x228] sm:$0xff] %vm760_vm0, %v2559_v53  ;;  %v2552_v24 = vadd.f32 %v2408_v20, %v2216_v25  ;;  %v2553_v62 = vadd.f32 %v2408_v20, %v2217_v60 }
 0x3a7   : > { %v2313_v16 = vpop.permute.xlu0 %2312 }
 0x3a8   : > { %2648 = vst [vmem:[%s4416_s7 + $0x1f0] sm:$0xff] %v2552_v24  ;;  %2649 = vst.msk [vmem:[%s4416_s7 + $0x1f8] sm:$0xff] %vm760_vm0, %v2553_v62  ;;  %v2514_v49 = vadd.f32 %v2313_v16, %v4246_v6  ;;  %v2515_v14 = vadd.f32 %v2313_v16, %v4249_v7 }
 0x3a9   : > { %v2298_v29 = vpop.permute.xlu1 %2297 }
 0x3aa   : > { %2610 = vst [vmem:[%s4416_s7 + $0xc0] sm:$0xff] %v2514_v49  ;;  %2611 = vst.msk [vmem:[%s4416_s7 + $0xc8] sm:$0xff] %vm760_vm0, %v2515_v14  ;;  %v2508_v18 = vadd.f32 %v2298_v29, %v2172_v1  ;;  %v2509_v28 = vadd.f32 %v2298_v29, %v2173_v40 }
 0x3ab   : > { %v2433_v26 = vpop.permute.xlu0 %2432 }
 0x3ac   : > { %2604 = vst [vmem:[%s4416_s7 + $0x90] sm:$0xff] %v2508_v18  ;;  %2605 = vst.msk [vmem:[%s4416_s7 + $0x98] sm:$0xff] %vm760_vm0, %v2509_v28  ;;  %v2562_v6 = vadd.f32 %v2433_v26, %v4260_v52  ;;  %v2563_v7 = vadd.f32 %v2433_v26, %v4263_v43 }
 0x3ad   : > { %v2418_v4 = vpop.permute.xlu1 %2417 }
 0x3ae   : > { %2658 = vst [vmem:[%s4416_s7 + $0x240] sm:$0xff] %v2562_v6  ;;  %2659 = vst.msk [vmem:[%s4416_s7 + $0x248] sm:$0xff] %vm760_vm0, %v2563_v7  ;;  %v2556_v33 = vadd.f32 %v2418_v4, %v2220_v3  ;;  %v2557_v13 = vadd.f32 %v2418_v4, %v2221_v55  ;;  %v5211_v55 = vld [vmem:[#allocation48_spill] sm:$0xff]  ;;  %v5213_v7 = vld [vmem:[#allocation55_spill] sm:$0xff] }
 0x3af   : > { %v2323_v25 = vpop.permute.xlu0 %2322 }
 0x3b0   : > { %2652 = vst [vmem:[%s4416_s7 + $0x210] sm:$0xff] %v2556_v33  ;;  %2653 = vst.msk [vmem:[%s4416_s7 + $0x218] sm:$0xff] %vm760_vm0, %v2557_v13  ;;  %v2518_v11 = vadd.f32 %v2323_v25, %v4277_v63  ;;  %v2519_v52 = vadd.f32 %v2323_v25, %v4280_v58  ;;  %v5214_v25 = vld [vmem:[#allocation47_spill] sm:$0xff] }
 0x3b1   : > { %v2308_v43 = vpop.permute.xlu1 %2307 }
 0x3b2   : > { %2614 = vst [vmem:[%s4416_s7 + $0xe0] sm:$0xff] %v2518_v11  ;;  %2615 = vst.msk [vmem:[%s4416_s7 + $0xe8] sm:$0xff] %vm760_vm0, %v2519_v52  ;;  %v2512_v19 = vadd.f32 %v2308_v43, %v4210_v12  ;;  %v2513_v60 = vadd.f32 %v2308_v43, %v4213_v9  ;;  %v5215_v52 = vld [vmem:[#allocation49_spill] sm:$0xff] }
 0x3b3   : > { %v2443_v10 = vpop.permute.xlu0 %2442 }
 0x3b4   : > { %2608 = vst [vmem:[%s4416_s7 + $0xb0] sm:$0xff] %v2512_v19  ;;  %2609 = vst.msk [vmem:[%s4416_s7 + $0xb8] sm:$0xff] %vm760_vm0, %v2513_v60  ;;  %v2566_v63 = vadd.f32 %v2443_v10, %v4290_v47  ;;  %v2567_v58 = vadd.f32 %v2443_v10, %v4293_v48  ;;  %v5216_v19 = vld [vmem:[#allocation51_spill] sm:$0xff]  ;;  %v5217_v10 = vld [vmem:[#allocation53_spill] sm:$0xff] }
 0x3b5   : > { %v2428_v53 = vpop.permute.xlu1 %2427 }
 0x3b6   : > { %2662 = vst [vmem:[%s4416_s7 + $0x260] sm:$0xff] %v2566_v63  ;;  %2663 = vst.msk [vmem:[%s4416_s7 + $0x268] sm:$0xff] %vm760_vm0, %v2567_v58  ;;  %v2560_v20 = vadd.f32 %v2428_v53, %v4221_v51  ;;  %v2561_v12 = vadd.f32 %v2428_v53, %v4224_v42  ;;  %v5218_v53 = vld [vmem:[#allocation98_spill] sm:$0xff] }
 0x3b8   : > { %2656 = vst [vmem:[%s4416_s7 + $0x230] sm:$0xff] %v2560_v20  ;;  %2657 = vst.msk [vmem:[%s4416_s7 + $0x238] sm:$0xff] %vm760_vm0, %v2561_v12  ;;  %v5219_v12 = vld [vmem:[#allocation54_spill] sm:$0xff] }
 0x3b9   : > { %v2318_v9 = vpop.permute.xlu1 %2317 }
 0x3ba   : > { %v2516_v47 = vadd.f32 %v2318_v9, %v4237_v57  ;;  %v2517_v48 = vadd.f32 %v2318_v9, %v4240_v34 }
 0x3bc   : > { %2612 = vst [vmem:[%s4416_s7 + $0xd0] sm:$0xff] %v2516_v47  ;;  %2613 = vst.msk [vmem:[%s4416_s7 + $0xd8] sm:$0xff] %vm760_vm0, %v2517_v48  ;;  %v2333_v24 = vpop.permute.xlu0 %2332  ;;  %v5220_v48 = vld [vmem:[#allocation105_spill] sm:$0xff] }
 0x3bd   : > { %v2522_v51 = vadd.f32 %v2333_v24, %v4307_v50  ;;  %v2523_v42 = vadd.f32 %v2333_v24, %v4310_v21  ;;  %v2438_v62 = vpop.permute.xlu1 %2437 }
 0x3be   : > { %v2564_v16 = vadd.f32 %v2438_v62, %v4252_v45  ;;  %v2565_v30 = vadd.f32 %v2438_v62, %v4255_v17 }
 0x3bf   : > { %2618 = vst [vmem:[%s4416_s7 + $0x100] sm:$0xff] %v2522_v51  ;;  %2619 = vst.msk [vmem:[%s4416_s7 + $0x108] sm:$0xff] %vm760_vm0, %v2523_v42  ;;  %v5221_v51 = vld [vmem:[#allocation50_spill] sm:$0xff] }
 0x3c0   : > { %2660 = vst [vmem:[%s4416_s7 + $0x250] sm:$0xff] %v2564_v16  ;;  %2661 = vst.msk [vmem:[%s4416_s7 + $0x258] sm:$0xff] %vm760_vm0, %v2565_v30  ;;  %v2453_v57 = vpop.permute.xlu0 %2452  ;;  %v5222_v16 = vld [vmem:[#allocation57_spill] sm:$0xff] }
 0x3c1   : > { %v2570_v34 = vadd.f32 %v2453_v57, %v4319_v38  ;;  %v2571_v50 = vadd.f32 %v2453_v57, %v4322_v46  ;;  %v2328_v21 = vpop.permute.xlu1 %2327  ;;  %v5223_v57 = vld [vmem:[#allocation106_spill] sm:$0xff] }
 0x3c2   : > { %v2520_v45 = vadd.f32 %v2328_v21, %v4270_v44  ;;  %v2521_v17 = vadd.f32 %v2328_v21, %v4273_v5 }
 0x3c3   : > { %2666 = vst [vmem:[%s4416_s7 + $0x280] sm:$0xff] %v2570_v34  ;;  %2667 = vst.msk [vmem:[%s4416_s7 + $0x288] sm:$0xff] %vm760_vm0, %v2571_v50 }
 0x3c4   : > { %2616 = vst [vmem:[%s4416_s7 + $0xf0] sm:$0xff] %v2520_v45  ;;  %2617 = vst.msk [vmem:[%s4416_s7 + $0xf8] sm:$0xff] %vm760_vm0, %v2521_v17 }
 0x3c5   : > { %v2448_v1 = vpop.permute.xlu1 %2447 }
 0x3c6   : > { %v2568_v0 = vadd.f32 %v2448_v1, %v4283_v31  ;;  %v2569_v38 = vadd.f32 %v2448_v1, %v4286_v37 }
 0x3c8   : > { %2664 = vst [vmem:[%s4416_s7 + $0x270] sm:$0xff] %v2568_v0  ;;  %2665 = vst.msk [vmem:[%s4416_s7 + $0x278] sm:$0xff] %vm760_vm0, %v2569_v38 }
 0x3cc   : > { %v2343_v44 = vpop.permute.xlu0 %2342 }
 0x3cd   : > { %v2526_v5 = vadd.f32 %v2343_v44, %v4335_v2  ;;  %v2527_v46 = vadd.f32 %v2343_v44, %v4338_v35 }
 0x3cf   : > { %2622 = vst [vmem:[%s4416_s7 + $0x120] sm:$0xff] %v2526_v5  ;;  %2623 = vst.msk [vmem:[%s4416_s7 + $0x128] sm:$0xff] %vm760_vm0, %v2527_v46  ;;  %v2338_v40 = vpop.permute.xlu1 %2337 }
 0x3d0   : > { %v2463_v31 = vpop.permute.xlu0 %2462  ;;  %v2524_v49 = vadd.f32 %v2338_v40, %v4300_v27  ;;  %v2525_v37 = vadd.f32 %v2338_v40, %v4303_v8 }
 0x3d1   : > { %v2574_v14 = vadd.f32 %v2463_v31, %v4347_v36  ;;  %v2575_v29 = vadd.f32 %v2463_v31, %v4350_v56 }
 0x3d2   : > { %2620 = vst [vmem:[%s4416_s7 + $0x110] sm:$0xff] %v2524_v49  ;;  %2621 = vst.msk [vmem:[%s4416_s7 + $0x118] sm:$0xff] %vm760_vm0, %v2525_v37 }
 0x3d3   : > { %2670 = vst [vmem:[%s4416_s7 + $0x2a0] sm:$0xff] %v2574_v14  ;;  %2671 = vst.msk [vmem:[%s4416_s7 + $0x2a8] sm:$0xff] %vm760_vm0, %v2575_v29  ;;  %v2458_v2 = vpop.permute.xlu1 %2457 }
 0x3d4   : > { %v2572_v35 = vadd.f32 %v2458_v2, %v4313_v59  ;;  %v2573_v27 = vadd.f32 %v2458_v2, %v4316_v32 }
 0x3d6   : > { %2668 = vst [vmem:[%s4416_s7 + $0x290] sm:$0xff] %v2572_v35  ;;  %2669 = vst.msk [vmem:[%s4416_s7 + $0x298] sm:$0xff] %vm760_vm0, %v2573_v27 }
 0x3dc   : > { %v2353_v8 = vpop.permute.xlu0 %2352 }
 0x3dd   : > { %v2530_v36 = vadd.f32 %v2353_v8, %v4363_v15  ;;  %v2531_v56 = vadd.f32 %v2353_v8, %v4366_v22  ;;  %v5210_v22 = vld [vmem:[#allocation46_spill] sm:$0xff] }
 0x3df   : > { %2626 = vst [vmem:[%s4416_s7 + $0x140] sm:$0xff] %v2530_v36  ;;  %2627 = vst.msk [vmem:[%s4416_s7 + $0x148] sm:$0xff] %vm760_vm0, %v2531_v56  ;;  %v2348_v18 = vpop.permute.xlu1 %2347 }
 0x3e0   : > { %v2473_v59 = vpop.permute.xlu0 %2472  ;;  %v2528_v28 = vadd.f32 %v2348_v18, %v4329_v23  ;;  %v2529_v32 = vadd.f32 %v2348_v18, %v4332_v54 }
 0x3e1   : > { %v2578_v26 = vadd.f32 %v2473_v59, %v4375_v41  ;;  %v2579_v3 = vadd.f32 %v2473_v59, %v5209_v61  ;;  %v5212_v41 = vld [vmem:[#allocation52_spill] sm:$0xff] }
 0x3e2   : > { %2624 = vst [vmem:[%s4416_s7 + $0x130] sm:$0xff] %v2528_v28  ;;  %2625 = vst.msk [vmem:[%s4416_s7 + $0x138] sm:$0xff] %vm760_vm0, %v2529_v32 }
 0x3e3   : > { %2674 = vst [vmem:[%s4416_s7 + $0x2c0] sm:$0xff] %v2578_v26  ;;  %2675 = vst.msk [vmem:[%s4416_s7 + $0x2c8] sm:$0xff] %vm760_vm0, %v2579_v3  ;;  %v2468_v15 = vpop.permute.xlu1 %2467 }
 0x3e4   : > { %v2576_v39 = vadd.f32 %v2468_v15, %v5210_v22  ;;  %v2577_v23 = vadd.f32 %v2468_v15, %v5211_v55 }
 0x3e6   : > { %2672 = vst [vmem:[%s4416_s7 + $0x2b0] sm:$0xff] %v2576_v39  ;;  %2673 = vst.msk [vmem:[%s4416_s7 + $0x2b8] sm:$0xff] %vm760_vm0, %v2577_v23 }
 0x3ec   : > { %v2363_v54 = vpop.permute.xlu0 %2362 }
 0x3ed   : > { %v2534_v6 = vadd.f32 %v2363_v54, %v5212_v41  ;;  %v2535_v4 = vadd.f32 %v2363_v54, %v5213_v7 }
 0x3ef   : > { %2630 = vst [vmem:[%s4416_s7 + $0x160] sm:$0xff] %v2534_v6  ;;  %2631 = vst.msk [vmem:[%s4416_s7 + $0x168] sm:$0xff] %vm760_vm0, %v2535_v4  ;;  %v2358_v33 = vpop.permute.xlu1 %2357 }
 0x3f0   : > { %v2483_v13 = vpop.permute.xlu0 %2482  ;;  %v2532_v11 = vadd.f32 %v2358_v33, %v5214_v25  ;;  %v2533_v43 = vadd.f32 %v2358_v33, %v5215_v52 }
 0x3f1   : > { %v2582_v60 = vadd.f32 %v2483_v13, %v5216_v19  ;;  %v2583_v63 = vadd.f32 %v2483_v13, %v5217_v10 }
 0x3f2   : > { %2628 = vst [vmem:[%s4416_s7 + $0x150] sm:$0xff] %v2532_v11  ;;  %2629 = vst.msk [vmem:[%s4416_s7 + $0x158] sm:$0xff] %vm760_vm0, %v2533_v43 }
 0x3f3   : > { %2678 = vst [vmem:[%s4416_s7 + $0x2e0] sm:$0xff] %v2582_v60  ;;  %2679 = vst.msk [vmem:[%s4416_s7 + $0x2e8] sm:$0xff] %vm760_vm0, %v2583_v63  ;;  %v2478_v58 = vpop.permute.xlu1 %2477 }
 0x3f4   : > { %v2580_v20 = vadd.f32 %v2478_v58, %v5218_v53  ;;  %v2581_v9 = vadd.f32 %v2478_v58, %v5219_v12 }
 0x3f6   : > { %2676 = vst [vmem:[%s4416_s7 + $0x2d0] sm:$0xff] %v2580_v20  ;;  %2677 = vst.msk [vmem:[%s4416_s7 + $0x2d8] sm:$0xff] %vm760_vm0, %v2581_v9 }
 0x3ff   : > { %v2368_v47 = vpop.permute.xlu1 %2367 }
 0x400   : > { %v2536_v24 = vadd.f32 %v2368_v47, %v5220_v48  ;;  %v2537_v42 = vadd.f32 %v2368_v47, %v5221_v51 }
 0x402   : > { %2632 = vst [vmem:[%s4416_s7 + $0x170] sm:$0xff] %v2536_v24  ;;  %2633 = vst.msk [vmem:[%s4416_s7 + $0x178] sm:$0xff] %vm760_vm0, %v2537_v42 }
 0x403   : > { %v2488_v62 = vpop.permute.xlu1 %2487 }
 0x404   : > { %v2584_v30 = vadd.f32 %v2488_v62, %v5222_v16  ;;  %v2585_v34 = vadd.f32 %v2488_v62, %v5223_v57 }
 0x406   : > { %2680 = vst [vmem:[%s4416_s7 + $0x2f0] sm:$0xff] %v2584_v30  ;;  %2681 = vst.msk [vmem:[%s4416_s7 + $0x2f8] sm:$0xff] %vm760_vm0, %v2585_v34 }
 0x407 PF: > { %s13_s12 = sadd.s32 1, %s2985_s12  }
 0x408   : > { %p10_p4 = scmp.ge.s32.totalorder %s13_s12, 4  }
 0x40a   :  { %12 = sbr.rel (!%p10_p4) target bundleno = 1 (0x1), region = 65 }

</bundles_post_ra>
